<compile_context>
chip_gen: v7x
topology: tpu7x:2x2x1
jax: 0.10.0
libtpu: 0.0.40
codegen_flags: <defaults>
</compile_context>

<pallas_src>
import functools

import jax
import jax.numpy as jnp
from jax.experimental import pallas as pl
from jax.experimental.pallas import tpu as pltpu

_GELU_K0 = 0.7978845608028654  # sqrt(2/pi)
_GELU_K1 = 0.044715


def _gelu_tanh(x):
    # tanh-approximation GELU: transcendental lands on the EUP slot (nearly free),
    # vs. the VALU-heavy erf polynomial of torch's default GELU.
    return 0.5 * x * (1.0 + jnp.tanh(_GELU_K0 * (x + _GELU_K1 * x * x * x)))


def _round_up(x, m):
    return (x + m - 1) // m * m


def _elementwise_bf16_default():
    # bf16 bias/GELU only where the VPU/EUP have a native bf16 path (v6e, v7x, ...).
    try:
        kind = jax.devices()[0].device_kind.lower()
    except Exception:
        return False
    if "tpu" not in kind:
        return False
    for old in ("v2", "v3", "v4", "v5"):
        if old in kind:
            return False
    return True


def _mlp_kernel(x_ref,
                w0_ref, b0_ref,
                w1_ref, b1_ref,
                w2_ref, b2_ref,
                w3_ref, b3_ref,
                w4_ref, b4_ref,
                w5_ref, b5_ref,
                o_ref, *, act_dtype):
    def linear(h, w_ref, b_ref):
        # bf16 operands into the MXU, f32 accumulation + bias add, then cast to the
        # (generation-dependent) elementwise dtype for the GELU / next layer.
        y = jnp.dot(h.astype(jnp.bfloat16), w_ref[...],
                    preferred_element_type=jnp.float32)
        return (y + b_ref[...]).astype(act_dtype)

    h = x_ref[...]                                 # bf16 input tile
    h = linear(h, w0_ref, b0_ref)                  # Linear(F, 256)
    h = linear(_gelu_tanh(h), w1_ref, b1_ref)      # GELU -> Dropout(id) -> Linear(256, 256)
    h = linear(_gelu_tanh(h), w2_ref, b2_ref)      # GELU -> Dropout(id) -> Linear(256, 128)
    h = linear(_gelu_tanh(h), w3_ref, b3_ref)      # GELU -> Dropout(id) -> Linear(128, 64)
    h = linear(_gelu_tanh(h), w4_ref, b4_ref)      # GELU -> Dropout(id) -> Linear(64, 32)
    h = linear(_gelu_tanh(h), w5_ref, b5_ref)      # GELU -> output Linear(32, C_pad)
    o_ref[...] = h.astype(o_ref.dtype)             # lane-dense bf16 writeback


def feedforward_classifier(x, params, *, tile_m=1024, elementwise_bf16=None):
    """x: (B, F) float32; params: list of 6 (W[in, out] bf16, b[1, out] f32)."""
    B, F = x.shape
    C = params[-1][0].shape[1]
    if elementwise_bf16 is None:
        elementwise_bf16 = _elementwise_bf16_default()
    act_dtype = jnp.bfloat16 if elementwise_bf16 else jnp.float32

    # Lane-dense output: pad the output layer up to a multiple of 128 lanes
    # (zero columns), slice logits back after the kernel.
    C_pad = _round_up(C, 128)
    w_last, b_last = params[-1]
    if C_pad != C:
        w_last = jnp.pad(w_last, ((0, 0), (0, C_pad - C)))
        b_last = jnp.pad(b_last, ((0, 0), (0, C_pad - C)))
    padded_params = list(params[:-1]) + [(w_last, b_last)]

    # Big batch tiles (amortize ~0.35us/grid-step overhead, fill MXU rows), but:
    #   * keep >= 2 grid programs when B allows it (v7x megacore sharding),
    #   * cap at 2048 rows (~10 MB of tiles/intermediates -> fits v7x's 64 MiB VMEM),
    #   * keep tile_m a multiple of 16 (bf16 sublane packing).
    tile_m = _round_up(max(16, tile_m), 16)
    tile_m = min(tile_m, _round_up(pl.cdiv(B, 2), 16), 2048)
    B_pad = _round_up(B, tile_m)

    # Stream x as bf16 (the kernel casts to bf16 before the first dot anyway):
    # halves input HBM bytes and the double-buffered x tile.
    x = x.astype(jnp.bfloat16)
    if B_pad != B:
        x = jnp.pad(x, ((0, B_pad - B), (0, 0)))

    grid = (B_pad // tile_m,)

    # Weight / bias BlockSpecs: full-array blocks, constant index_map -> loaded once,
    # resident across all grid steps. (pl.Buffered(1) skipped; ~220 KB saving only.)
    param_specs = []
    flat_params = []
    for (W, b) in padded_params:
        param_specs.append(pl.BlockSpec(W.shape, lambda i: (0, 0)))
        param_specs.append(pl.BlockSpec(b.shape, lambda i: (0, 0)))
        flat_params.extend([W, b])

    in_specs = [pl.BlockSpec((tile_m, F), lambda i: (i, 0))] + param_specs
    out_specs = pl.BlockSpec((tile_m, C_pad), lambda i: (i, 0))

    # Advisory cost estimate so XLA schedules surrounding ops sensibly.
    dims = [F] + [W.shape[1] for (W, _) in padded_params]
    flops = 2 * B_pad * sum(a * b for a, b in zip(dims[:-1], dims[1:]))
    transcendentals = B_pad * sum(dims[1:-1])  # one tanh per pre-output activation
    bytes_accessed = (
        B_pad * F * 2                                      # bf16 input
        + sum(W.size * W.dtype.itemsize + b.size * b.dtype.itemsize
              for (W, b) in padded_params)
        + B_pad * C_pad * 2                                # bf16 output
    )

    kernel = functools.partial(_mlp_kernel, act_dtype=act_dtype)

    out = pl.pallas_call(
        kernel,
        out_shape=jax.ShapeDtypeStruct((B_pad, C_pad), jnp.bfloat16),
        grid_spec=pltpu.PrefetchScalarGridSpec(
            num_scalar_prefetch=0,
            grid=grid,
            in_specs=in_specs,
            out_specs=out_specs,
        ),
        compiler_params=pltpu.CompilerParams(
            dimension_semantics=("parallel",),
            vmem_limit_bytes=48 * 1024 * 1024,
        ),
        cost_estimate=pl.CostEstimate(
            flops=flops,
            transcendentals=transcendentals,
            bytes_accessed=bytes_accessed,
        ),
    )(x, *flat_params)

    return out[:B, :C].astype(jnp.float32)


def init_params(key, input_features, n_classes, hidden_layer_sizes=(256, 128, 64, 32)):
    # Layer widths implied by the module:
    #   Linear(F,256), Linear(256,256), Linear(256,128), Linear(128,64),
    #   Linear(64,32), Linear(32,n_classes)
    dims = [input_features, 256] + list(hidden_layer_sizes) + [n_classes]
    params = []
    for i in range(len(dims) - 1):
        fan_in, fan_out = dims[i], dims[i + 1]
        key, kw, kb = jax.random.split(key, 3)
        bound = 1.0 / float(fan_in) ** 0.5  # PyTorch default Linear init range
        W = jax.random.uniform(kw, (fan_in, fan_out), jnp.float32, -bound, bound)
        b = jax.random.uniform(kb, (1, fan_out), jnp.float32, -bound, bound)
        params.append((W.astype(jnp.bfloat16), b))  # bf16 weights, f32 biases
    return params


def reference_forward(x, params, act_dtype):
    # Plain-JAX reference mirroring the kernel's math exactly (eval mode): bf16
    # matmul operands, f32 accumulation + bias, tanh-GELU in act_dtype, bf16 output.
    h = x.astype(jnp.bfloat16)
    n = len(params)
    for i, (W, b) in enumerate(params):
        h = (jnp.dot(h.astype(jnp.bfloat16), W.astype(jnp.bfloat16),
                     preferred_element_type=jnp.float32)
             + b.astype(jnp.float32)).astype(act_dtype)
        if i < n - 1:
            h = _gelu_tanh(h)
    return h.astype(jnp.bfloat16).astype(jnp.float32)


if __name__ == "__main__":
    key = jax.random.PRNGKey(0)
    k_params, k_x = jax.random.split(key)

    # Small demo shapes: batch=256, input_features=64, n_classes=10.  With the
    # grid-split cap the tile becomes 128 rows -> 2 programs (exercises megacore).
    B, F, C = 256, 64, 10
    params = init_params(k_params, F, C)
    x = jax.random.normal(k_x, (B, F), jnp.float32)

    out = feedforward_classifier(x, params)
    out = jax.block_until_ready(out)

    act_dtype = jnp.bfloat16 if _elementwise_bf16_default() else jnp.float32
    ref = reference_forward(x, params, act_dtype)
    assert out.shape == (B, C)
    # Tolerance covers bf16 elementwise / tanh lowering differences vs. the XLA ref.
    assert jnp.allclose(out, ref, atol=5e-2, rtol=5e-2), "mismatch vs. reference"

    print("KERNEL_OK")
</pallas_src>

<mosaic_0001>
module attributes {stable_mosaic.version = 11 : i64} {
  func.func @_mlp_kernel(%arg0: i32, %arg1: memref<128x64xbf16, #tpu.memory_space<vmem>>, %arg2: memref<64x256xbf16, #tpu.memory_space<vmem>>, %arg3: memref<1x256xf32, #tpu.memory_space<vmem>>, %arg4: memref<256x256xbf16, #tpu.memory_space<vmem>>, %arg5: memref<1x256xf32, #tpu.memory_space<vmem>>, %arg6: memref<256x128xbf16, #tpu.memory_space<vmem>>, %arg7: memref<1x128xf32, #tpu.memory_space<vmem>>, %arg8: memref<128x64xbf16, #tpu.memory_space<vmem>>, %arg9: memref<1x64xf32, #tpu.memory_space<vmem>>, %arg10: memref<64x32xbf16, #tpu.memory_space<vmem>>, %arg11: memref<1x32xf32, #tpu.memory_space<vmem>>, %arg12: memref<32x128xbf16, #tpu.memory_space<vmem>>, %arg13: memref<1x128xf32, #tpu.memory_space<vmem>>, %arg14: memref<128x128xbf16, #tpu.memory_space<vmem>>) attributes {dimension_semantics = [#tpu.dimension_semantics<parallel>], iteration_bounds = array<i64: 2>, scalar_prefetch = 0 : i64, scratch_operands = 0 : i64, tpu.core_type = #tpu.core_type<tc>, window_params = [{transform_indices = @transform_0, window_bounds = array<i64: 128, 64>}, {pipeline_mode = #tpu.pipeline_mode<synchronous>, transform_indices = @transform_1, window_bounds = array<i64: 64, 256>}, {pipeline_mode = #tpu.pipeline_mode<synchronous>, transform_indices = @transform_2, window_bounds = array<i64: 1, 256>}, {pipeline_mode = #tpu.pipeline_mode<synchronous>, transform_indices = @transform_3, window_bounds = array<i64: 256, 256>}, {pipeline_mode = #tpu.pipeline_mode<synchronous>, transform_indices = @transform_4, window_bounds = array<i64: 1, 256>}, {pipeline_mode = #tpu.pipeline_mode<synchronous>, transform_indices = @transform_5, window_bounds = array<i64: 256, 128>}, {pipeline_mode = #tpu.pipeline_mode<synchronous>, transform_indices = @transform_6, window_bounds = array<i64: 1, 128>}, {pipeline_mode = #tpu.pipeline_mode<synchronous>, transform_indices = @transform_7, window_bounds = array<i64: 128, 64>}, {pipeline_mode = #tpu.pipeline_mode<synchronous>, transform_indices = @transform_8, window_bounds = array<i64: 1, 64>}, {pipeline_mode = #tpu.pipeline_mode<synchronous>, transform_indices = @transform_9, window_bounds = array<i64: 64, 32>}, {pipeline_mode = #tpu.pipeline_mode<synchronous>, transform_indices = @transform_10, window_bounds = array<i64: 1, 32>}, {pipeline_mode = #tpu.pipeline_mode<synchronous>, transform_indices = @transform_11, window_bounds = array<i64: 32, 128>}, {pipeline_mode = #tpu.pipeline_mode<synchronous>, transform_indices = @transform_12, window_bounds = array<i64: 1, 128>}, {transform_indices = @transform_13, window_bounds = array<i64: 128, 128>}]} {
    %c0 = arith.constant 0 : index
    %c0_0 = arith.constant 0 : index
    %0 = vector.load %arg1[%c0, %c0_0] : memref<128x64xbf16, #tpu.memory_space<vmem>>, vector<128x64xbf16>
    %c0_1 = arith.constant 0 : index
    %c0_2 = arith.constant 0 : index
    %1 = vector.load %arg2[%c0_1, %c0_2] : memref<64x256xbf16, #tpu.memory_space<vmem>>, vector<64x256xbf16>
    %cst = arith.constant dense<0.000000e+00> : vector<128x256xf32>
    %2 = tpu.matmul %0, %1, %cst {dimension_numbers = #tpu.dot_dimension_numbers<[1], [0], [0], [1], [0, 0, 1, 1], [], []>} : vector<128x64xbf16>, vector<64x256xbf16>, vector<128x256xf32> -> vector<128x256xf32>
    %c0_3 = arith.constant 0 : index
    %c0_4 = arith.constant 0 : index
    %3 = vector.load %arg3[%c0_3, %c0_4] : memref<1x256xf32, #tpu.memory_space<vmem>>, vector<1x256xf32>
    %4 = vector.broadcast %3 : vector<1x256xf32> to vector<128x256xf32>
    %5 = arith.addf %2, %4 : vector<128x256xf32>
    %cst_5 = arith.constant 5.000000e-01 : f32
    %6 = vector.broadcast %cst_5 : f32 to vector<128x256xf32>
    %7 = arith.mulf %6, %5 : vector<128x256xf32>
    %cst_6 = arith.constant 4.471500e-02 : f32
    %8 = vector.broadcast %cst_6 : f32 to vector<128x256xf32>
    %9 = arith.mulf %8, %5 : vector<128x256xf32>
    %10 = arith.mulf %9, %5 : vector<128x256xf32>
    %11 = arith.mulf %10, %5 : vector<128x256xf32>
    %12 = arith.addf %5, %11 : vector<128x256xf32>
    %cst_7 = arith.constant 0.797884583 : f32
    %13 = vector.broadcast %cst_7 : f32 to vector<128x256xf32>
    %14 = arith.mulf %13, %12 : vector<128x256xf32>
    %15 = math.tanh %14 : vector<128x256xf32>
    %cst_8 = arith.constant 1.000000e+00 : f32
    %16 = vector.broadcast %cst_8 : f32 to vector<128x256xf32>
    %17 = arith.addf %16, %15 : vector<128x256xf32>
    %18 = arith.mulf %7, %17 : vector<128x256xf32>
    %19 = arith.truncf %18 : vector<128x256xf32> to vector<128x256xbf16>
    %c0_9 = arith.constant 0 : index
    %c0_10 = arith.constant 0 : index
    %20 = vector.load %arg4[%c0_9, %c0_10] : memref<256x256xbf16, #tpu.memory_space<vmem>>, vector<256x256xbf16>
    %cst_11 = arith.constant dense<0.000000e+00> : vector<128x256xf32>
    %21 = tpu.matmul %19, %20, %cst_11 {dimension_numbers = #tpu.dot_dimension_numbers<[1], [0], [0], [1], [0, 0, 1, 1], [], []>} : vector<128x256xbf16>, vector<256x256xbf16>, vector<128x256xf32> -> vector<128x256xf32>
    %c0_12 = arith.constant 0 : index
    %c0_13 = arith.constant 0 : index
    %22 = vector.load %arg5[%c0_12, %c0_13] : memref<1x256xf32, #tpu.memory_space<vmem>>, vector<1x256xf32>
    %23 = vector.broadcast %22 : vector<1x256xf32> to vector<128x256xf32>
    %24 = arith.addf %21, %23 : vector<128x256xf32>
    %cst_14 = arith.constant 5.000000e-01 : f32
    %25 = vector.broadcast %cst_14 : f32 to vector<128x256xf32>
    %26 = arith.mulf %25, %24 : vector<128x256xf32>
    %cst_15 = arith.constant 4.471500e-02 : f32
    %27 = vector.broadcast %cst_15 : f32 to vector<128x256xf32>
    %28 = arith.mulf %27, %24 : vector<128x256xf32>
    %29 = arith.mulf %28, %24 : vector<128x256xf32>
    %30 = arith.mulf %29, %24 : vector<128x256xf32>
    %31 = arith.addf %24, %30 : vector<128x256xf32>
    %cst_16 = arith.constant 0.797884583 : f32
    %32 = vector.broadcast %cst_16 : f32 to vector<128x256xf32>
    %33 = arith.mulf %32, %31 : vector<128x256xf32>
    %34 = math.tanh %33 : vector<128x256xf32>
    %cst_17 = arith.constant 1.000000e+00 : f32
    %35 = vector.broadcast %cst_17 : f32 to vector<128x256xf32>
    %36 = arith.addf %35, %34 : vector<128x256xf32>
    %37 = arith.mulf %26, %36 : vector<128x256xf32>
    %38 = arith.truncf %37 : vector<128x256xf32> to vector<128x256xbf16>
    %c0_18 = arith.constant 0 : index
    %c0_19 = arith.constant 0 : index
    %39 = vector.load %arg6[%c0_18, %c0_19] : memref<256x128xbf16, #tpu.memory_space<vmem>>, vector<256x128xbf16>
    %cst_20 = arith.constant dense<0.000000e+00> : vector<128x128xf32>
    %40 = tpu.matmul %38, %39, %cst_20 {dimension_numbers = #tpu.dot_dimension_numbers<[1], [0], [0], [1], [0, 0, 1, 1], [], []>} : vector<128x256xbf16>, vector<256x128xbf16>, vector<128x128xf32> -> vector<128x128xf32>
    %c0_21 = arith.constant 0 : index
    %c0_22 = arith.constant 0 : index
    %41 = vector.load %arg7[%c0_21, %c0_22] : memref<1x128xf32, #tpu.memory_space<vmem>>, vector<1x128xf32>
    %42 = vector.broadcast %41 : vector<1x128xf32> to vector<128x128xf32>
    %43 = arith.addf %40, %42 : vector<128x128xf32>
    %cst_23 = arith.constant 5.000000e-01 : f32
    %44 = vector.broadcast %cst_23 : f32 to vector<128x128xf32>
    %45 = arith.mulf %44, %43 : vector<128x128xf32>
    %cst_24 = arith.constant 4.471500e-02 : f32
    %46 = vector.broadcast %cst_24 : f32 to vector<128x128xf32>
    %47 = arith.mulf %46, %43 : vector<128x128xf32>
    %48 = arith.mulf %47, %43 : vector<128x128xf32>
    %49 = arith.mulf %48, %43 : vector<128x128xf32>
    %50 = arith.addf %43, %49 : vector<128x128xf32>
    %cst_25 = arith.constant 0.797884583 : f32
    %51 = vector.broadcast %cst_25 : f32 to vector<128x128xf32>
    %52 = arith.mulf %51, %50 : vector<128x128xf32>
    %53 = math.tanh %52 : vector<128x128xf32>
    %cst_26 = arith.constant 1.000000e+00 : f32
    %54 = vector.broadcast %cst_26 : f32 to vector<128x128xf32>
    %55 = arith.addf %54, %53 : vector<128x128xf32>
    %56 = arith.mulf %45, %55 : vector<128x128xf32>
    %57 = arith.truncf %56 : vector<128x128xf32> to vector<128x128xbf16>
    %c0_27 = arith.constant 0 : index
    %c0_28 = arith.constant 0 : index
    %58 = vector.load %arg8[%c0_27, %c0_28] : memref<128x64xbf16, #tpu.memory_space<vmem>>, vector<128x64xbf16>
    %cst_29 = arith.constant dense<0.000000e+00> : vector<128x64xf32>
    %59 = tpu.matmul %57, %58, %cst_29 {dimension_numbers = #tpu.dot_dimension_numbers<[1], [0], [0], [1], [0, 0, 1, 1], [], []>} : vector<128x128xbf16>, vector<128x64xbf16>, vector<128x64xf32> -> vector<128x64xf32>
    %c0_30 = arith.constant 0 : index
    %c0_31 = arith.constant 0 : index
    %60 = vector.load %arg9[%c0_30, %c0_31] : memref<1x64xf32, #tpu.memory_space<vmem>>, vector<1x64xf32>
    %61 = vector.broadcast %60 : vector<1x64xf32> to vector<128x64xf32>
    %62 = arith.addf %59, %61 : vector<128x64xf32>
    %cst_32 = arith.constant 5.000000e-01 : f32
    %63 = vector.broadcast %cst_32 : f32 to vector<128x64xf32>
    %64 = arith.mulf %63, %62 : vector<128x64xf32>
    %cst_33 = arith.constant 4.471500e-02 : f32
    %65 = vector.broadcast %cst_33 : f32 to vector<128x64xf32>
    %66 = arith.mulf %65, %62 : vector<128x64xf32>
    %67 = arith.mulf %66, %62 : vector<128x64xf32>
    %68 = arith.mulf %67, %62 : vector<128x64xf32>
    %69 = arith.addf %62, %68 : vector<128x64xf32>
    %cst_34 = arith.constant 0.797884583 : f32
    %70 = vector.broadcast %cst_34 : f32 to vector<128x64xf32>
    %71 = arith.mulf %70, %69 : vector<128x64xf32>
    %72 = math.tanh %71 : vector<128x64xf32>
    %cst_35 = arith.constant 1.000000e+00 : f32
    %73 = vector.broadcast %cst_35 : f32 to vector<128x64xf32>
    %74 = arith.addf %73, %72 : vector<128x64xf32>
    %75 = arith.mulf %64, %74 : vector<128x64xf32>
    %76 = arith.truncf %75 : vector<128x64xf32> to vector<128x64xbf16>
    %c0_36 = arith.constant 0 : index
    %c0_37 = arith.constant 0 : index
    %77 = vector.load %arg10[%c0_36, %c0_37] : memref<64x32xbf16, #tpu.memory_space<vmem>>, vector<64x32xbf16>
    %cst_38 = arith.constant dense<0.000000e+00> : vector<128x32xf32>
    %78 = tpu.matmul %76, %77, %cst_38 {dimension_numbers = #tpu.dot_dimension_numbers<[1], [0], [0], [1], [0, 0, 1, 1], [], []>} : vector<128x64xbf16>, vector<64x32xbf16>, vector<128x32xf32> -> vector<128x32xf32>
    %c0_39 = arith.constant 0 : index
    %c0_40 = arith.constant 0 : index
    %79 = vector.load %arg11[%c0_39, %c0_40] : memref<1x32xf32, #tpu.memory_space<vmem>>, vector<1x32xf32>
    %80 = vector.broadcast %79 : vector<1x32xf32> to vector<128x32xf32>
    %81 = arith.addf %78, %80 : vector<128x32xf32>
    %cst_41 = arith.constant 5.000000e-01 : f32
    %82 = vector.broadcast %cst_41 : f32 to vector<128x32xf32>
    %83 = arith.mulf %82, %81 : vector<128x32xf32>
    %cst_42 = arith.constant 4.471500e-02 : f32
    %84 = vector.broadcast %cst_42 : f32 to vector<128x32xf32>
    %85 = arith.mulf %84, %81 : vector<128x32xf32>
    %86 = arith.mulf %85, %81 : vector<128x32xf32>
    %87 = arith.mulf %86, %81 : vector<128x32xf32>
    %88 = arith.addf %81, %87 : vector<128x32xf32>
    %cst_43 = arith.constant 0.797884583 : f32
    %89 = vector.broadcast %cst_43 : f32 to vector<128x32xf32>
    %90 = arith.mulf %89, %88 : vector<128x32xf32>
    %91 = math.tanh %90 : vector<128x32xf32>
    %cst_44 = arith.constant 1.000000e+00 : f32
    %92 = vector.broadcast %cst_44 : f32 to vector<128x32xf32>
    %93 = arith.addf %92, %91 : vector<128x32xf32>
    %94 = arith.mulf %83, %93 : vector<128x32xf32>
    %95 = arith.truncf %94 : vector<128x32xf32> to vector<128x32xbf16>
    %c0_45 = arith.constant 0 : index
    %c0_46 = arith.constant 0 : index
    %96 = vector.load %arg12[%c0_45, %c0_46] : memref<32x128xbf16, #tpu.memory_space<vmem>>, vector<32x128xbf16>
    %cst_47 = arith.constant dense<0.000000e+00> : vector<128x128xf32>
    %97 = tpu.matmul %95, %96, %cst_47 {dimension_numbers = #tpu.dot_dimension_numbers<[1], [0], [0], [1], [0, 0, 1, 1], [], []>} : vector<128x32xbf16>, vector<32x128xbf16>, vector<128x128xf32> -> vector<128x128xf32>
    %c0_48 = arith.constant 0 : index
    %c0_49 = arith.constant 0 : index
    %98 = vector.load %arg13[%c0_48, %c0_49] : memref<1x128xf32, #tpu.memory_space<vmem>>, vector<1x128xf32>
    %99 = vector.broadcast %98 : vector<1x128xf32> to vector<128x128xf32>
    %100 = arith.addf %97, %99 : vector<128x128xf32>
    %101 = arith.truncf %100 : vector<128x128xf32> to vector<128x128xbf16>
    %c0_50 = arith.constant 0 : index
    %c0_51 = arith.constant 0 : index
    %102 = vector.load %arg14[%c0_50, %c0_51] : memref<128x128xbf16, #tpu.memory_space<vmem>>, vector<128x128xbf16>
    tpu.vector_store %arg14[%c0_50, %c0_51], %101 {strides = array<i32>} : memref<128x128xbf16, #tpu.memory_space<vmem>>, vector<128x128xbf16>,
    return
  }
  func.func @transform_0(%arg0: i32) -> (i32, i32) {
    %c0_i32 = arith.constant 0 : i32
    %c0_i32_0 = arith.constant 0 : i32
    return %arg0, %c0_i32 : i32, i32
  }
  func.func @transform_1(%arg0: i32) -> (i32, i32) {
    %c0_i32 = arith.constant 0 : i32
    %c0_i32_0 = arith.constant 0 : i32
    %c0_i32_1 = arith.constant 0 : i32
    return %c0_i32, %c0_i32_0 : i32, i32
  }
  func.func @transform_2(%arg0: i32) -> (i32, i32) {
    %c0_i32 = arith.constant 0 : i32
    %c0_i32_0 = arith.constant 0 : i32
    %c0_i32_1 = arith.constant 0 : i32
    return %c0_i32, %c0_i32_0 : i32, i32
  }
  func.func @transform_3(%arg0: i32) -> (i32, i32) {
    %c0_i32 = arith.constant 0 : i32
    %c0_i32_0 = arith.constant 0 : i32
    %c0_i32_1 = arith.constant 0 : i32
    return %c0_i32, %c0_i32_0 : i32, i32
  }
  func.func @transform_4(%arg0: i32) -> (i32, i32) {
    %c0_i32 = arith.constant 0 : i32
    %c0_i32_0 = arith.constant 0 : i32
    %c0_i32_1 = arith.constant 0 : i32
    return %c0_i32, %c0_i32_0 : i32, i32
  }
  func.func @transform_5(%arg0: i32) -> (i32, i32) {
    %c0_i32 = arith.constant 0 : i32
    %c0_i32_0 = arith.constant 0 : i32
    %c0_i32_1 = arith.constant 0 : i32
    return %c0_i32, %c0_i32_0 : i32, i32
  }
  func.func @transform_6(%arg0: i32) -> (i32, i32) {
    %c0_i32 = arith.constant 0 : i32
    %c0_i32_0 = arith.constant 0 : i32
    %c0_i32_1 = arith.constant 0 : i32
    return %c0_i32, %c0_i32_0 : i32, i32
  }
  func.func @transform_7(%arg0: i32) -> (i32, i32) {
    %c0_i32 = arith.constant 0 : i32
    %c0_i32_0 = arith.constant 0 : i32
    %c0_i32_1 = arith.constant 0 : i32
    return %c0_i32, %c0_i32_0 : i32, i32
  }
  func.func @transform_8(%arg0: i32) -> (i32, i32) {
    %c0_i32 = arith.constant 0 : i32
    %c0_i32_0 = arith.constant 0 : i32
    %c0_i32_1 = arith.constant 0 : i32
    return %c0_i32, %c0_i32_0 : i32, i32
  }
  func.func @transform_9(%arg0: i32) -> (i32, i32) {
    %c0_i32 = arith.constant 0 : i32
    %c0_i32_0 = arith.constant 0 : i32
    %c0_i32_1 = arith.constant 0 : i32
    return %c0_i32, %c0_i32_0 : i32, i32
  }
  func.func @transform_10(%arg0: i32) -> (i32, i32) {
    %c0_i32 = arith.constant 0 : i32
    %c0_i32_0 = arith.constant 0 : i32
    %c0_i32_1 = arith.constant 0 : i32
    return %c0_i32, %c0_i32_0 : i32, i32
  }
  func.func @transform_11(%arg0: i32) -> (i32, i32) {
    %c0_i32 = arith.constant 0 : i32
    %c0_i32_0 = arith.constant 0 : i32
    %c0_i32_1 = arith.constant 0 : i32
    return %c0_i32, %c0_i32_0 : i32, i32
  }
  func.func @transform_12(%arg0: i32) -> (i32, i32) {
    %c0_i32 = arith.constant 0 : i32
    %c0_i32_0 = arith.constant 0 : i32
    %c0_i32_1 = arith.constant 0 : i32
    return %c0_i32, %c0_i32_0 : i32, i32
  }
  func.func @transform_13(%arg0: i32) -> (i32, i32) {
    %c0_i32 = arith.constant 0 : i32
    %c0_i32_0 = arith.constant 0 : i32
    return %arg0, %c0_i32 : i32, i32
  }
}

</mosaic_0001>

<bundles_post_ra>
// kernel: tpu_custom_call.1
= control target key start
LH: loop header
LB: loop body
LE: loop exit
PB: predicated region body
PF: predicated region fallthrough
CT: control target
= control target key end

     0   :  { %s5234_s0 = inlined_call_operand.vmem [shape: bf16[256,64], index: 0, kind: input, shape index: {}]   ;;  %s5235_s1 = inlined_call_operand.vmem [shape: bf16[64,256], index: 1, kind: input, shape index: {}]   ;;  %s5236_s2 = inlined_call_operand.vmem [shape: f32[1,256], index: 2, kind: input, shape index: {}]   ;;  %s5237_s3 = inlined_call_operand.vmem [shape: bf16[256,256], index: 3, kind: input, shape index: {}]   ;;  %s5238_s4 = inlined_call_operand.hbm [shape: f32[1,256], index: 4, kind: input, shape index: {}]   ;;  %s5239_s5 = inlined_call_operand.hbm [shape: bf16[256,128], index: 5, kind: input, shape index: {}]   ;;  %s5240_s6 = inlined_call_operand.hbm [shape: f32[1,128], index: 6, kind: input, shape index: {}]   ;;  %s5241_s7 = inlined_call_operand.vmem [shape: bf16[128,64], index: 7, kind: input, shape index: {}]   ;;  %s5242_s8 = inlined_call_operand.hbm [shape: f32[1,64], index: 8, kind: input, shape index: {}]   ;;  %s5243_s9 = inlined_call_operand.vmem [shape: bf16[64,32], index: 9, kind: input, shape index: {}]   ;;  %s5244_s10 = inlined_call_operand.vmem [shape: f32[1,32], index: 10, kind: input, shape index: {}]   ;;  %s5245_s11 = inlined_call_operand.hbm [shape: bf16[32,128], index: 11, kind: input, shape index: {}]   ;;  %s5246_s12 = inlined_call_operand.vmem [shape: f32[1,128], index: 12, kind: input, shape index: {}]   ;;  %s5247_s13 = inlined_call_operand.hbm [shape: bf16[256,128], index: 13, kind: output, shape index: {}]  }
   0x1   :  { %5261 = sst [smem:[#allocation23_spill]] %s5246_s12 }
   0x2   :  { %5262 = sst [smem:[#allocation24_spill]] %s5247_s13 }
   0x3   :  { %18 = vsyncpa [#allocation3], 0 }
   0x4   :  { %19 = vsyncpa [#allocation6], 0 }
   0x5   :  { %20 = vsyncpa [#allocation9], 0 }
   0x6   :  { %21 = vsyncpa [#allocation4], 0 }
   0x7   :  { %23 = vsyncpa [#allocation4 + $0x1], 0  ;;  %s4160_s25 = smov 0   ;;  %s4162_s26 = smov 0  }
   0x8   :  { %s4164_s27 = smov 0   ;;  %s4166_s28 = smov 0  }
   0x9 LB: > { %5263 = sst [smem:[#allocation16_spill]] %s4065_s25  ;;  %s4181_s29 = sadd.s32 4294967295, %s4077_s28   ;;  %s4077_s28 = sphi %s4166_s28, %s5291_s28   ;;  %s4073_s27 = sphi %s4164_s27, %s5293_s27   ;;  %s4069_s26 = sphi %s4162_s26, %s5295_s26   ;;  %s4065_s25 = sphi %s4160_s25, %s5294_s25  }
   0xa   : > { %5264 = sst [smem:[#allocation17_spill]] %s4073_s27  ;;  %s3056_s30 = sadd.s32 4294967294, %s4077_s28  }
   0xb   : > { %5265 = sst [smem:[#allocation18_spill]] %s4077_s28  ;;  %s4185_s14 = sadd.s32 1, %s4077_s28  }
   0xc   : > { %5266 = sst [smem:[#allocation19_spill]] %s4185_s14  ;;  %s314_s15 = sadd.s32 1, %s4073_s27 }
   0xd   : > { %s311_s16 = ssub.s32 %s4077_s28, %s4185_s14  ;;  %p324_p0 = scmp.ne.s32.totalorder %s4073_s27, %s4069_s26 }
   0xe   : > { %p312_p1 = scmp.eq.s32.totalorder %s311_s16, 0  ;;  %p325_p2 = scmp.eq.s32.totalorder %s4181_s29, 1 }
   0xf   : > { %p330_p3 = scmp.ne.s32.totalorder %s4069_s26, %s4065_s25  ;;  %p331_p4 = scmp.eq.s32.totalorder %s3056_s30, 1 }
  0x10   : > { %s4196_s17 = scalar_select %p312_p1, %s4073_s27, %s314_s15  }
  0x11   : > { %p4198_p5 = por %p325_p2, %p324_p0  ;;  %p4202_p6 = por %p331_p4, %p330_p3 }
  0x12   : > { %5267 = sst [smem:[#allocation20_spill]] %s4196_s17  ;;  %p3057_p7 = scmp.ge.s32.totalorder %s4077_s28, 1 }
  0x13   : > { %s5268_s18 = scalar_select %p4198_p5, 1, 0 }
  0x14   : > { %s5270_s19 = scalar_select %p4202_p6, 1, 0 }
  0x15   : > { %5269 = sst [smem:[#allocation21_spill]] %s5268_s18  ;;  %p338_p8 = scmp.lt.s32.totalorder %s4077_s28, 3 }
  0x16   : > { %5271 = sst [smem:[#allocation22_spill]] %s5270_s19  ;;  %p5253_p9 = scmp.eq.s32.totalorder %s4181_s29, 0 }
  0x17   : > { %p4209_p10 = pnand %p3057_p7, %p338_p8  ;;  %s4079_s21 = smov [#allocation5]  }
  0x18   : > { %s370_s22 = sshll.u32 %s4079_s21, 4  ;;  %s4080_s24 = smov [#allocation8]   ;;  %s4215_s22 = int_to_ptr.vmem [resolvable:$true] %s370_s22 }
  0x19   : > { %s5272_s20 = scalar_select %p4209_p10, 1, 0 }
  0x1a   : > { %p3468_p11 = pneg %p4209_p10  ;;  %s398_s30 = sshll.u32 %s4080_s24, 4  ;;  %s4223_s30 = int_to_ptr.vmem [resolvable:$true] %s398_s30 }
  0x1b   : > { %s4081_s15 = smov [#allocation2]   ;;  %s3863_s21 = scalar_lea.hbm %s5239_s5, 2048 }
  0x1c   : > { %p4219_p12 = pnand %p5253_p9, %p3468_p11  ;;  %s4225_s16 = sshll.u32 %s4081_s15, 4  ;;  %s361_s16 = int_to_ptr.vmem [resolvable:$true] %s4225_s16 }
  0x1d   : > { %p3864_p13 = scmp.ne.s32.totalorder %s5239_s5, %s3863_s21  ;;  %p3870_p3 = scmp.lt.u32.totalorder %s3863_s21, %s5239_s5 }
  0x1e   : > { %p4235_p0 = pneg %p4219_p12 }
  0x20   : > { %p3866_p1 = pnand %p4235_p0, %p3864_p13 }
  0x22   : > { %p3867_p2 = pneg %p3866_p1 }
  0x24   : > { %p3872_p4 = pnand %p3870_p3, %p3867_p2 }
  0x26   : > { %3875 = shalt.err (!%p3872_p4)
}
  0x27   : > { %s3876_s27 = scalar_lea.vmem %s4215_s22, 2048  ;;  %p3884_p9 = scmp.lt.s32.totalorder %s4215_s22, %s4215_s22 }
  0x28   : > { %p3877_p7 = scmp.ne.s32.totalorder %s4215_s22, %s3876_s27  ;;  %p3885_p6 = scmp.lt.s32.totalorder %s3876_s27, %s3876_s27 }
  0x2a   : > { %p3879_p8 = pnand %p3877_p7, %p4235_p0  ;;  %p3886_p13 = por %p3885_p6, %p3884_p9 }
  0x2c   : > { %p3880_p11 = pneg %p3879_p8 }
  0x2e   : > { %p3887_p1 = pnand %p3886_p13, %p3880_p11 }
  0x30   : > { %3890 = shalt.err (!%p3887_p1)
}
  0x31   : > { %s5260_s14 = smov 64   ;;  %s4083_s17 = smov 4  }
  0x32   : > { %3474 = dma.hbm_to_vmem [thread:$0]  (!%p4219_p12), %s5239_s5, 2048, %s4215_s22, [#allocation6], %s5260_s14, %s5260_s14, %s4083_s17  }
  0x33   : > { %s3891_s27 = scalar_lea.hbm %s5242_s8, 16 }
  0x34   : > { %p3892_p6 = scmp.ne.s32.totalorder %s5242_s8, %s3891_s27  ;;  %p3898_p3 = scmp.lt.u32.totalorder %s3891_s27, %s5242_s8 }
  0x36   : > { %p3894_p9 = pnand %p3892_p6, %p4235_p0 }
  0x38   : > { %p3895_p2 = pneg %p3894_p9 }
  0x3a   : > { %p3900_p4 = pnand %p3898_p3, %p3895_p2 }
  0x3c   : > { %3903 = shalt.err (!%p3900_p4)
}
  0x3d   : > { %s3904_s22 = scalar_lea.vmem %s4223_s30, 16  ;;  %s3911_s13 = scalar_lea.vmem %s4223_s30, 32 }
  0x3e   : > { %p3905_p7 = scmp.ne.s32.totalorder %s4223_s30, %s3904_s22  ;;  %p3912_p13 = scmp.lt.s32.totalorder %s4223_s30, %s4223_s30 }
  0x3f   : > { %p3913_p1 = scmp.lt.s32.totalorder %s3911_s13, %s3904_s22 }
  0x40   : > { %p3907_p8 = pnand %p3905_p7, %p4235_p0 }
  0x41   : > { %p3914_p6 = por %p3913_p1, %p3912_p13 }
  0x42   : > { %p3908_p11 = pneg %p3907_p8 }
  0x44   : > { %p3915_p9 = pnand %p3914_p6, %p3908_p11 }
  0x46   : > { %3918 = shalt.err (!%p3915_p9)
}
  0x47   : > { %3480 = dma.hbm_to_vmem [thread:$0]  (!%p4219_p12), %s5242_s8, 16, %s4223_s30, [#allocation9]  }
  0x48   : > { %s3919_s21 = scalar_lea.hbm %s5238_s4, 32 }
  0x49   : > { %p3920_p2 = scmp.ne.s32.totalorder %s5238_s4, %s3919_s21  ;;  %p3926_p7 = scmp.lt.u32.totalorder %s3919_s21, %s5238_s4 }
  0x4b   : > { %p3922_p3 = pnand %p3920_p2, %p4235_p0 }
  0x4d   : > { %p3923_p4 = pneg %p3922_p3 }
  0x4f   : > { %p3928_p8 = pnand %p3926_p7, %p3923_p4 }
  0x51   : > { %3931 = shalt.err (!%p3928_p8)
}
  0x52   : > { %s3932_s13 = scalar_lea.vmem %s361_s16, 32  ;;  %p3940_p6 = scmp.lt.s32.totalorder %s361_s16, %s361_s16 }
  0x53   : > { %p3933_p11 = scmp.ne.s32.totalorder %s361_s16, %s3932_s13  ;;  %p3941_p9 = scmp.lt.s32.totalorder %s3932_s13, %s3932_s13 }
  0x55   : > { %p3935_p13 = pnand %p3933_p11, %p4235_p0  ;;  %p3942_p5 = por %p3941_p9, %p3940_p6 }
  0x57   : > { %p3936_p1 = pneg %p3935_p13 }
  0x59   : > { %p3943_p10 = pnand %p3942_p5, %p3936_p1 }
  0x5b   : > { %3946 = shalt.err (!%p3943_p10)
}
  0x5c   : > { %3471 = dma.hbm_to_vmem [thread:$0]  (!%p4219_p12), %s5238_s4, 32, %s361_s16, [#allocation3]  }
  0x5d   : > { %s4084_s28 = smov [#allocation7]   ;;  %s4085_s19 = smov [#allocation10]  }
  0x5e   : > { %s384_s18 = sshll.u32 %s4084_s28, 4  ;;  %s414_s21 = sshll.u32 %s4085_s19, 4  ;;  %s385_s18 = int_to_ptr.vmem [resolvable:$true] %s384_s18  ;;  %s415_s21 = int_to_ptr.vmem [resolvable:$true] %s414_s21 }
  0x5f   : > { %s3947_s27 = scalar_lea.hbm %s5240_s6, 16 }
  0x60   : > { %p3948_p5 = scmp.ne.s32.totalorder %s5240_s6, %s3947_s27  ;;  %p3954_p3 = scmp.lt.u32.totalorder %s3947_s27, %s5240_s6 }
  0x62   : > { %p3950_p10 = pnand %p3948_p5, %p4235_p0 }
  0x64   : > { %p3951_p2 = pneg %p3950_p10 }
  0x66   : > { %p3956_p4 = pnand %p3954_p3, %p3951_p2 }
  0x68   : > { %3959 = shalt.err (!%p3956_p4)
}
  0x69   : > { %s3960_s16 = scalar_lea.vmem %s385_s18, 16  ;;  %s3967_s12 = scalar_lea.vmem %s385_s18, 32 }
  0x6a   : > { %p3961_p7 = scmp.ne.s32.totalorder %s385_s18, %s3960_s16  ;;  %p3968_p13 = scmp.lt.s32.totalorder %s385_s18, %s385_s18 }
  0x6b   : > { %p3969_p1 = scmp.lt.s32.totalorder %s3967_s12, %s3960_s16 }
  0x6c   : > { %p3963_p8 = pnand %p3961_p7, %p4235_p0 }
  0x6d   : > { %p3970_p6 = por %p3969_p1, %p3968_p13 }
  0x6e   : > { %p3964_p11 = pneg %p3963_p8 }
  0x70   : > { %p3971_p9 = pnand %p3970_p6, %p3964_p11 }
  0x72   : > { %3974 = shalt.err (!%p3971_p9)
}
  0x73   : > { %3477 = dma.hbm_to_vmem [thread:$0]  (!%p4219_p12), %s5240_s6, 16, %s385_s18, [#allocation6]  }
  0x74   : > { %s3975_s15 = scalar_lea.hbm %s5245_s11, 256 }
  0x75   : > { %p3976_p5 = scmp.ne.s32.totalorder %s5245_s11, %s3975_s15  ;;  %p3982_p3 = scmp.lt.u32.totalorder %s3975_s15, %s5245_s11 }
  0x77   : > { %p3978_p10 = pnand %p3976_p5, %p4235_p0 }
  0x79   : > { %p3979_p2 = pneg %p3978_p10 }
  0x7b   : > { %p3984_p4 = pnand %p3982_p3, %p3979_p2 }
  0x7d   : > { %3987 = shalt.err (!%p3984_p4)
}
  0x7e   : > { %s3988_s16 = scalar_lea.vmem %s415_s21, 256  ;;  %p3996_p13 = scmp.lt.s32.totalorder %s415_s21, %s415_s21 }
  0x7f   : > { %p3989_p7 = scmp.ne.s32.totalorder %s415_s21, %s3988_s16  ;;  %p3997_p1 = scmp.lt.s32.totalorder %s3988_s16, %s3988_s16 }
  0x81   : > { %p3991_p8 = pnand %p3989_p7, %p4235_p0  ;;  %p3998_p6 = por %p3997_p1, %p3996_p13 }
  0x83   : > { %p3992_p11 = pneg %p3991_p8 }
  0x85   : > { %p3999_p9 = pnand %p3998_p6, %p3992_p11 }
  0x87   : > { %4002 = shalt.err (!%p3999_p9)
}
  0x88   : > { %s5275_s18 = smov 64   ;;  %p5276_p5 = scmp.ne.s32.totalorder %s5272_s20, 0 }
  0x89   : > { %3483 = dma.hbm_to_vmem [thread:$0]  (!%p4219_p12), %s5245_s11, 256, %s415_s21, [#allocation9], %s5275_s18, %s5275_s18, %s4083_s17  }
  0x8a   : > { %442 = sbr.rel (%p5276_p5) target bundleno = 1707 (0x6ab), region = 72  ;;  %p5277_p0 = scmp.eq.s32.totalorder (!%p5276_p5), %s4181_s29, 0 }
  0x91   : > { %4048 = dma.done.wait (%p5277_p0), [#allocation3], 32   ;;  %p5278_p10 = pmov %p5277_p0 }
  0x92   : > { %p5279_p2 = pmov %p5277_p0 }
  0x93   : > { %4050 = vsyncadd (%p5278_p10), [#allocation3], 4294967264 }
  0x94   : > { %4052 = dma.done.wait (%p5279_p2), [#allocation6], 2064   ;;  %p5280_p3 = pmov %p5277_p0 }
  0x95   : > { %p5281_p4 = pmov %p5277_p0 }
  0x96   : > { %4054 = vsyncadd (%p5280_p3), [#allocation6], 4294965232 }
  0x97   : > { %4056 = dma.done.wait (%p5281_p4), [#allocation9], 272   ;;  %p5282_p12 = pmov %p5277_p0 }
  0x98   : > { %s3071_s25 = sshll.u32 %s4181_s29, 4  ;;  %v4086_v0 = vmov 0   ;;  %v3541_v1 = vld [vmem:[%s5235_s1 + $0x4] ss:$8 sps:$4 sm:$0xff]   ;;  %v3543_v2 = vld [vmem:[%s5235_s1] ss:$8 sps:$4 sm:$0xff]   ;;  %v536_v54 = vlaneseq }
  0x99   : > { %4058 = vsyncadd (%p5282_p12), [#allocation9], 4294967024  ;;  %683 = vmatprep.mubr.bf16.mxu0 %v4086_v0  ;;  %p503_p7 = scmp.lt.s32.totalorder %s3071_s25, 31  ;;  %651 = vmatprep.subr.bf16.mxu0 %v3541_v1  ;;  %v3544_v3 = vld [vmem:[%s5235_s1 + $0x14] ss:$8 sps:$4 sm:$0xff]   ;;  %vm626_vm0 = vcmask 523264  }
  0x9a   : > { %652 = vmatpush1.bf16.msra.mxu0 %v3543_v2  ;;  %v3546_v4 = vld [vmem:[%s5235_s1 + $0x10] ss:$8 sps:$4 sm:$0xff]   ;;  %v3547_v5 = vld [vmem:[%s5235_s1 + $0x24] ss:$8 sps:$4 sm:$0xff]   ;;  %v3549_v6 = vld [vmem:[%s5235_s1 + $0x20] ss:$8 sps:$4 sm:$0xff]  }
  0x9b   : > { %s5297_s25 = smov (!%p503_p7, %s3071_s25), 31  ;;  %653 = vmatprep.subr.bf16.mxu0 %v3544_v3  ;;  %v3550_v7 = vld [vmem:[%s5235_s1 + $0x34] ss:$8 sps:$4 sm:$0xff]   ;;  %v3552_v8 = vld [vmem:[%s5235_s1 + $0x30] ss:$8 sps:$4 sm:$0xff]   ;;  %v3609_v49 = vld [vmem:[#allocation5 + $0x40] sm:$0xff]  }
  0x9c   : > { %s3072_s19 = sshll.u32 %s5297_s25, 2  ;;  %v3561_v10 = vld [vmem:[%s5237_s3 + $0x4] ss:$8 sps:$4 sm:$0xff]   ;;  %v3563_v11 = vld [vmem:[%s5237_s3] ss:$8 sps:$4 sm:$0xff]   ;;  %v3613_v53 = vld [vmem:[#allocation5 + $0x50] sm:$0xff]  }
  0x9d   : > { %s4375_s18 = scalar_lea.vmem %s5234_s0, %s3072_s19  ;;  %v3564_v12 = vld [vmem:[%s5237_s3 + $0x14] ss:$8 sps:$4 sm:$0xff]   ;;  %1272 = vmatprep.subr.bf16.mxu1 %v3561_v10  ;;  %v3566_v13 = vld [vmem:[%s5237_s3 + $0x10] ss:$8 sps:$4 sm:$0xff]   ;;  %v3567_v14 = vld [vmem:[%s5237_s3 + $0x24] ss:$8 sps:$4 sm:$0xff]  }
  0x9e   : > { %654 = vmatpush1.bf16.msra.mxu0 %v3546_v4  ;;  %v3553_v9 = vld [vmem:[%s4375_s18] sm:$0xff]   ;;  %1273 = vmatpush1.bf16.msra.mxu1 %v3563_v11  ;;  %v3554_v16 = vld [vmem:[%s4375_s18 + $0x8] sm:$0xff]   ;;  %v3570_v17 = vld [vmem:[%s5237_s3 + $0x34] ss:$8 sps:$4 sm:$0xff]   ;;  %v4505_v57 = vshrl.u32 %v536_v54, 7  ;;  %vm2728_vm1 = vcmask 261120  }
  0x9f   : > { %655 = vmatprep.subr.bf16.mxu0 %v3547_v5  ;;  %1274 = vmatprep.subr.bf16.mxu1 %v3564_v12  ;;  %v3569_v15 = vld [vmem:[%s5237_s3 + $0x20] ss:$8 sps:$4 sm:$0xff]   ;;  %v3572_v18 = vld [vmem:[%s5237_s3 + $0x30] ss:$8 sps:$4 sm:$0xff]   ;;  %v3573_v19 = vld [vmem:[%s5237_s3 + $0x44] ss:$8 sps:$4 sm:$0xff]  }
  0xa0   : > { %v3575_v20 = vld [vmem:[%s5237_s3 + $0x40] ss:$8 sps:$4 sm:$0xff]   ;;  %v3555_v21 = vld [vmem:[%s4375_s18 + $0x10] sm:$0xff]   ;;  %v3579_v24 = vld [vmem:[%s5237_s3 + $0x64] ss:$8 sps:$4 sm:$0xff]   ;;  %v538_v59 = vsub.s32 0, %v4505_v57 }
  0xa1   : > { %v3576_v22 = vld [vmem:[%s5237_s3 + $0x54] ss:$8 sps:$4 sm:$0xff]   ;;  %v3578_v23 = vld [vmem:[%s5237_s3 + $0x50] ss:$8 sps:$4 sm:$0xff]   ;;  %v3581_v25 = vld [vmem:[%s5237_s3 + $0x60] ss:$8 sps:$4 sm:$0xff]  }
  0xa2   : > { %656 = vmatpush1.bf16.msra.mxu0 %v3549_v6  ;;  %1275 = vmatpush1.bf16.msra.mxu1 %v3566_v13  ;;  %v3556_v26 = vld [vmem:[%s4375_s18 + $0x18] sm:$0xff]   ;;  %v3557_v29 = vld [vmem:[%s4375_s18 + $0x20] sm:$0xff]   ;;  %v3558_v30 = vld [vmem:[%s4375_s18 + $0x28] sm:$0xff]   ;;  %v542_v61 = vsub.s32 1, %v4505_v57  ;;  %s499_s30 = sand.u32 1, %s4069_s26   ;;  %s5283_s28 = sld [smem:[#allocation23_spill]] }
  0xa3   : > { %657 = vmatprep.subr.bf16.mxu0 %v3550_v7  ;;  %1276 = vmatprep.subr.bf16.mxu1 %v3567_v14  ;;  %v3582_v27 = vld [vmem:[%s5237_s3 + $0x74] ss:$8 sps:$4 sm:$0xff]   ;;  %v3584_v28 = vld [vmem:[%s5237_s3 + $0x70] ss:$8 sps:$4 sm:$0xff]   ;;  %v3585_v33 = vld [vmem:[%s5237_s3 + $0x84] ss:$8 sps:$4 sm:$0xff]  }
  0xa4   : > { %v3559_v31 = vld [vmem:[%s4375_s18 + $0x30] sm:$0xff]   ;;  %v3560_v32 = vld [vmem:[%s4375_s18 + $0x38] sm:$0xff]   ;;  %v3587_v34 = vld [vmem:[%s5237_s3 + $0x80] ss:$8 sps:$4 sm:$0xff]   ;;  %s3070_s25 = sshll.u32 %s499_s30, 6  ;;  %s5284_s17 = sld [smem:[#allocation21_spill]] }
  0xa5   : > { %v3588_v35 = vld [vmem:[%s5237_s3 + $0x94] ss:$8 sps:$4 sm:$0xff]   ;;  %v3590_v36 = vld [vmem:[%s5237_s3 + $0x90] ss:$8 sps:$4 sm:$0xff]   ;;  %v3591_v37 = vld [vmem:[%s5237_s3 + $0xa4] ss:$8 sps:$4 sm:$0xff]  }
  0xa6   : > { %658 = vmatpush1.bf16.msra.mxu0 %v3552_v8  ;;  %1277 = vmatpush1.bf16.msra.mxu1 %v3569_v15  ;;  %v3593_v38 = vld [vmem:[%s5237_s3 + $0xa0] ss:$8 sps:$4 sm:$0xff]   ;;  %v3594_v39 = vld [vmem:[%s5237_s3 + $0xb4] ss:$8 sps:$4 sm:$0xff]   ;;  %v3596_v40 = vld [vmem:[%s5237_s3 + $0xb0] ss:$8 sps:$4 sm:$0xff]  }
  0xa7   : > { %1278 = vmatprep.subr.bf16.mxu1 %v3570_v17  ;;  %v3597_v41 = vld [vmem:[%s5237_s3 + $0xc4] ss:$8 sps:$4 sm:$0xff]   ;;  %v3599_v42 = vld [vmem:[%s5237_s3 + $0xc0] ss:$8 sps:$4 sm:$0xff]   ;;  %v3600_v43 = vld [vmem:[%s5237_s3 + $0xd4] ss:$8 sps:$4 sm:$0xff]   ;;  %3264 = vmatprep.subr.bf16.mxu0 %v3609_v49 }
  0xa8   : > { %v3602_v44 = vld [vmem:[%s5237_s3 + $0xd0] ss:$8 sps:$4 sm:$0xff]   ;;  %v3603_v45 = vld [vmem:[%s5237_s3 + $0xe4] ss:$8 sps:$4 sm:$0xff]   ;;  %v3605_v46 = vld [vmem:[%s5237_s3 + $0xe0] ss:$8 sps:$4 sm:$0xff]  }
  0xa9   : > { %3089 = vmatmul.mubr.msk.bf16.vlgmr.msra.gmra.mrb[0].mxu0 %vm626_vm0, %v3553_v9  ;;  %v3606_v47 = vld [vmem:[%s5237_s3 + $0xf4] ss:$8 sps:$4 sm:$0xff]   ;;  %v3608_v48 = vld [vmem:[%s5237_s3 + $0xf0] ss:$8 sps:$4 sm:$0xff]   ;;  %v3610_v50 = vld [vmem:[#allocation5] sm:$0xff]   ;;  %s5172_s20 = scalar_lea.vmem [#allocation11], %s3070_s25 }
  0xaa   : > { %693 = vmatprep.mubr.bf16.mxu0 %v4086_v0  ;;  %1279 = vmatpush1.bf16.msra.mxu1 %v3572_v18  ;;  %v3611_v51 = vld [vmem:[#allocation5 + $0x48] sm:$0xff]   ;;  %v3614_v55 = vld [vmem:[#allocation5 + $0x10] sm:$0xff]   ;;  %v3615_v56 = vld [vmem:[#allocation5 + $0x58] sm:$0xff]   ;;  %s2944_s23 = sshll.u32 %s5172_s20, 4  ;;  %s3216_s21 = sshll.u32 %s4181_s29, 10  ;;  %s5182_s23 = int_to_ptr.vmem [resolvable:$true] %s2944_s23 }
  0xab   : > { %1280 = vmatprep.subr.bf16.mxu1 %v3573_v19  ;;  %3265 = vmatpush3.bf16.msra.mxu0 %v3610_v50  ;;  %v3612_v52 = vld [vmem:[#allocation5 + $0x8] sm:$0xff]   ;;  %v3616_v58 = vld [vmem:[#allocation5 + $0x18] sm:$0xff]   ;;  %s5285_s24 = sld [smem:[#allocation24_spill]]  ;;  %s5193_s27 = scalar_lea.sflag [#allocation4], %s499_s30 }
  0xac   : > { %3266 = vmatprep.subr.bf16.mxu0 %v3611_v51  ;;  %v534_v60 = vld [vmem:[%s5236_s2] sm:$0x3]  ;;  %s4003_s29 = scalar_lea.vmem %s5182_s23, 1024  ;;  %p5286_p11 = scmp.ne.s32.totalorder %s5284_s17, 0 }
  0xad   : > { %v4514_v62 = vrot.slane %v534_v60, %v538_v59  ;;  %v4518_v63 = vrot.slane %v534_v60, %v542_v61  ;;  %p4004_p8 = scmp.ne.s32.totalorder %s5182_s23, %s4003_s29  ;;  %s4087_s22 = smov [#allocation11]  }
  0xae   : > { %1281 = vmatpush1.bf16.msra.mxu1 %v3575_v20  ;;  %s4007_s13 = sshll.u32 %s4087_s22, 4  ;;  %s4008_s13 = int_to_ptr.vmem [resolvable:$false] %s4007_s13 }
  0xaf   : > { %1282 = vmatprep.subr.bf16.mxu1 %v3576_v22  ;;  %3267 = vmatpush3.bf16.msra.mxu0 %v3612_v52  ;;  %p4005_p13 = pnand %p4004_p8, %p5286_p11  ;;  %s4009_s18 = scalar_lea.vmem %s4008_s13, 2048 }
  0xb0   : > { %3268 = vmatprep.subr.bf16.mxu0 %v3613_v53  ;;  %p4010_p6 = scmp.lt.s32.totalorder %s5182_s23, %s4008_s13  ;;  %p4011_p9 = scmp.lt.s32.totalorder %s4009_s18, %s4003_s29 }
  0xb1   : > { %3090 = vmatmul.mubr.msk.bf16.gmra.mrb[4].mxu0 %vm626_vm0, %v3554_v16  ;;  %s5187_s15 = scalar_lea.hbm %s5285_s24, %s3216_s21  ;;  %p4006_p1 = pneg %p4005_p13 }
  0xb2   : > { %703 = vmatprep.mubr.bf16.mxu0 %v4086_v0  ;;  %1283 = vmatpush1.bf16.msra.mxu1 %v3578_v23  ;;  %p4012_p5 = por %p4011_p9, %p4010_p6 }
  0xb3   : > { %1284 = vmatprep.subr.bf16.mxu1 %v3579_v24  ;;  %3269 = vmatpush3.bf16.msra.mxu0 %v3614_v55 }
  0xb4   : > { %3270 = vmatprep.subr.bf16.mxu0 %v3615_v56  ;;  %p4013_p0 = pnand %p4012_p5, %p4006_p1 }
  0xb6   : > { %1285 = vmatpush1.bf16.msra.mxu1 %v3581_v25 }
  0xb7   : > { %1286 = vmatprep.subr.bf16.mxu1 %v3582_v27  ;;  %3271 = vmatpush3.bf16.msra.mxu0 %v3616_v58 }
  0xb9   : > { %3091 = vmatmul.mubr.msk.bf16.gmra.mrb[8].mxu0 %vm626_vm0, %v3555_v21 }
  0xba   : > { %713 = vmatprep.mubr.bf16.mxu0 %v4086_v0  ;;  %1287 = vmatpush1.bf16.msra.mxu1 %v3584_v28 }
  0xbb   : > { %1288 = vmatprep.subr.bf16.mxu1 %v3585_v33 }
  0xbe   : > { %1289 = vmatpush1.bf16.msra.mxu1 %v3587_v34 }
  0xbf   : > { %1290 = vmatprep.subr.bf16.mxu1 %v3588_v35 }
  0xc1   : > { %3092 = vmatmul.mubr.msk.bf16.gmra.mrb[12].mxu0 %vm626_vm0, %v3556_v26 }
  0xc2   : > { %723 = vmatprep.mubr.bf16.mxu0 %v4086_v0  ;;  %1291 = vmatpush1.bf16.msra.mxu1 %v3590_v36 }
  0xc3   : > { %1292 = vmatprep.subr.bf16.mxu1 %v3591_v37 }
  0xc6   : > { %1293 = vmatpush1.bf16.msra.mxu1 %v3593_v38 }
  0xc7   : > { %1294 = vmatprep.subr.bf16.mxu1 %v3594_v39 }
  0xc9   : > { %3093 = vmatmul.mubr.msk.bf16.gmra.mrb[16].mxu0 %vm626_vm0, %v3557_v29 }
  0xca   : > { %733 = vmatprep.mubr.bf16.mxu0 %v4086_v0  ;;  %1295 = vmatpush1.bf16.msra.mxu1 %v3596_v40 }
  0xcb   : > { %1296 = vmatprep.subr.bf16.mxu1 %v3597_v41 }
  0xce   : > { %1297 = vmatpush1.bf16.msra.mxu1 %v3599_v42 }
  0xcf   : > { %1298 = vmatprep.subr.bf16.mxu1 %v3600_v43 }
  0xd1   : > { %3094 = vmatmul.mubr.msk.bf16.gmra.mrb[20].mxu0 %vm626_vm0, %v3558_v30 }
  0xd2   : > { %743 = vmatprep.mubr.bf16.mxu0 %v4086_v0  ;;  %1299 = vmatpush1.bf16.msra.mxu1 %v3602_v44 }
  0xd3   : > { %1300 = vmatprep.subr.bf16.mxu1 %v3603_v45 }
  0xd6   : > { %1301 = vmatpush1.bf16.msra.mxu1 %v3605_v46 }
  0xd7   : > { %1302 = vmatprep.subr.bf16.mxu1 %v3606_v47 }
  0xd9   : > { %3095 = vmatmul.mubr.msk.bf16.gmra.mrb[24].mxu0 %vm626_vm0, %v3559_v31 }
  0xda   : > { %753 = vmatprep.mubr.bf16.mxu0 %v4086_v0  ;;  %1303 = vmatpush1.bf16.msra.mxu1 %v3608_v48 }
  0xe1   : > { %3096 = vmatmul.mubr.msk.bf16.gmra.mrb[28].mxu0 %vm626_vm0, %v3560_v32 }
 0x17c   : > { %v685_v0 = vpop.f32.mrb[0].mxu0 }
 0x17d   : > { %v686_v1 = vadd.f32 %v685_v0, %v4514_v62  ;;  %v687_v2 = vpop.f32.mrb[1].mxu0 }
 0x17e   : > { %v4522_v3 = vadd.f32 %v687_v2, %v4518_v63  ;;  %v689_v4 = vpop.f32.mrb[2].mxu0 }
 0x17f   : > { %v796_v5 = vmul.f32 0.044715, %v686_v1  ;;  %v4525_v6 = vadd.f32 %v689_v4, %v4514_v62  ;;  %v691_v7 = vpop.f32.mrb[3].mxu0  ;;  %v764_v56 = vmul.f32 0.5, %v686_v1 }
 0x180   : > { %v797_v8 = vmul.f32 0.044715, %v4522_v3  ;;  %v4529_v9 = vadd.f32 %v691_v7, %v4518_v63  ;;  %v765_v7 = vmul.f32 0.5, %v4522_v3 }
 0x181   : > { %v828_v10 = vmul.f32 %v796_v5, %v686_v1  ;;  %v798_v11 = vmul.f32 0.044715, %v4525_v6 }
 0x182   : > { %v799_v12 = vmul.f32 0.044715, %v4529_v9  ;;  %v829_v13 = vmul.f32 %v797_v8, %v4522_v3 }
 0x183   : > { %v860_v14 = vmul.f32 %v828_v10, %v686_v1  ;;  %v830_v15 = vmul.f32 %v798_v11, %v4525_v6 }
 0x184   : > { %v695_v16 = vpop.f32.mrb[4].mxu0  ;;  %v831_v17 = vmul.f32 %v799_v12, %v4529_v9  ;;  %v861_v18 = vmul.f32 %v829_v13, %v4522_v3 }
 0x185   : > { %v862_v19 = vmul.f32 %v830_v15, %v4525_v6  ;;  %v4539_v20 = vadd.f32 %v695_v16, %v4514_v62  ;;  %v697_v21 = vpop.f32.mrb[5].mxu0  ;;  %v892_v22 = vadd.f32 %v860_v14, %v686_v1  ;;  %v767_v15 = vmul.f32 0.5, %v4529_v9 }
 0x186   : > { %v698_v23 = vadd.f32 %v697_v21, %v4518_v63  ;;  %v699_v24 = vpop.f32.mrb[6].mxu0  ;;  %v863_v25 = vmul.f32 %v831_v17, %v4529_v9  ;;  %v893_v26 = vadd.f32 %v861_v18, %v4522_v3  ;;  %v766_v16 = vmul.f32 0.5, %v4525_v6 }
 0x187   : > { %v800_v27 = vmul.f32 0.044715, %v4539_v20  ;;  %v4546_v28 = vadd.f32 %v699_v24, %v4514_v62  ;;  %v701_v29 = vpop.f32.mrb[7].mxu0  ;;  %v894_v30 = vadd.f32 %v862_v19, %v4525_v6  ;;  %v924_v31 = vmul.f32 0.7978846, %v892_v22 }
 0x188   : > { %v801_v32 = vmul.f32 0.044715, %v698_v23  ;;  %v702_v33 = vadd.f32 %v701_v29, %v4518_v63  ;;  %v895_v34 = vadd.f32 %v863_v25, %v4529_v9  ;;  %v925_v35 = vmul.f32 0.7978846, %v893_v26 }
 0x189   : > { %v832_v36 = vmul.f32 %v800_v27, %v4539_v20  ;;  %v802_v37 = vmul.f32 0.044715, %v4546_v28  ;;  %v926_v38 = vmul.f32 0.7978846, %v894_v30  ;;  %3639 = vtanh.f32 %v924_v31 }
 0x18a   : > { %v833_v39 = vmul.f32 %v801_v32, %v698_v23  ;;  %v803_v40 = vmul.f32 0.044715, %v702_v33  ;;  %v927_v41 = vmul.f32 0.7978846, %v895_v34  ;;  %3641 = vtanh.f32 %v925_v35 }
 0x18b   : > { %v864_v42 = vmul.f32 %v832_v36, %v4539_v20  ;;  %v834_v43 = vmul.f32 %v802_v37, %v4546_v28  ;;  %3643 = vtanh.f32 %v926_v38  ;;  %v4578_v21 = vmul.f32 0.5, %v698_v23 }
 0x18c   : > { %v865_v44 = vmul.f32 %v833_v39, %v698_v23  ;;  %v835_v45 = vmul.f32 %v803_v40, %v702_v33  ;;  %v705_v46 = vpop.f32.mrb[8].mxu0  ;;  %3645 = vtanh.f32 %v927_v41  ;;  %v771_v27 = vmul.f32 0.5, %v702_v33 }
 0x18d   : > { %v866_v47 = vmul.f32 %v834_v43, %v4546_v28  ;;  %v707_v48 = vpop.f32.mrb[9].mxu0  ;;  %v896_v53 = vadd.f32 %v864_v42, %v4539_v20  ;;  %v4561_v54 = vadd.f32 %v705_v46, %v4514_v62  ;;  %v770_v43 = vmul.f32 0.5, %v4546_v28 }
 0x18e   : > { %v867_v49 = vmul.f32 %v835_v45, %v702_v33  ;;  %v4557_v50 = vadd.f32 %v707_v48, %v4518_v63  ;;  %v709_v51 = vpop.f32.mrb[10].mxu0  ;;  %v897_v52 = vadd.f32 %v865_v44, %v698_v23 }
 0x18f   : > { %v711_v55 = vpop.f32.mrb[11].mxu0  ;;  %v898_v58 = vadd.f32 %v866_v47, %v4546_v28  ;;  %v4569_v5 = vadd.f32 %v709_v51, %v4514_v62  ;;  %v928_v8 = vmul.f32 0.7978846, %v896_v53  ;;  %v804_v14 = vmul.f32 0.044715, %v4561_v54 }
 0x190   : > { %v805_v60 = vmul.f32 0.044715, %v4557_v50  ;;  %v4566_v0 = vadd.f32 %v711_v55, %v4518_v63  ;;  %v899_v2 = vadd.f32 %v867_v49, %v702_v33  ;;  %v929_v4 = vmul.f32 0.7978846, %v897_v52 }
 0x191   : > { %v930_v10 = vmul.f32 0.7978846, %v898_v58  ;;  %v806_v9 = vmul.f32 0.044715, %v4569_v5  ;;  %v836_v23 = vmul.f32 %v804_v14, %v4561_v54  ;;  %v768_v33 = vmul.f32 0.5, %v4539_v20 }
 0x192   : > { %v837_v11 = vmul.f32 %v805_v60, %v4557_v50  ;;  %v807_v1 = vmul.f32 0.044715, %v4566_v0  ;;  %v931_v12 = vmul.f32 0.7978846, %v899_v2  ;;  %3647 = vtanh.f32 %v929_v4 }
 0x193   : > { %v3640_v13 = vpop.eup %3639  ;;  %3649 = vtanh.f32 %v928_v8  ;;  %v838_v45 = vmul.f32 %v806_v9, %v4569_v5  ;;  %v4600_v20 = vmul.f32 0.5, %v4561_v54  ;;  %v868_v55 = vmul.f32 %v836_v23, %v4561_v54 }
 0x194   : > { %v3642_v17 = vpop.eup %3641  ;;  %v839_v18 = vmul.f32 %v807_v1, %v4566_v0  ;;  %v715_v3 = vpop.f32.mrb[12].mxu0  ;;  %v988_v19 = vadd.f32 1.0, %v3640_v13  ;;  %3651 = vtanh.f32 %v931_v12  ;;  %v869_v24 = vmul.f32 %v837_v11, %v4557_v50 }
 0x195   : > { %v3644_v22 = vpop.eup %3643  ;;  %v717_v25 = vpop.f32.mrb[13].mxu0  ;;  %v989_v26 = vadd.f32 1.0, %v3642_v17  ;;  %3653 = vtanh.f32 %v930_v10  ;;  %v4588_v34 = vadd.f32 %v715_v3, %v4514_v62  ;;  %v4613_v10 = vmul.f32 0.5, %v4557_v50 }
 0x196   : > { %v3646_v29 = vpop.eup %3645  ;;  %v871_v6 = vmul.f32 %v839_v18, %v4566_v0  ;;  %v4584_v30 = vadd.f32 %v717_v25, %v4518_v63  ;;  %v719_v31 = vpop.f32.mrb[14].mxu0  ;;  %v990_v32 = vadd.f32 1.0, %v3644_v22  ;;  %v1020_v39 = vmul.f32 %v988_v19, %v764_v56 }
 0x197   : > { %v721_v35 = vpop.f32.mrb[15].mxu0  ;;  %v991_v36 = vadd.f32 1.0, %v3646_v29  ;;  %v1021_v41 = vmul.f32 %v989_v26, %v765_v7  ;;  %v901_v44 = vadd.f32 %v869_v24, %v4557_v50  ;;  %v808_v48 = vmul.f32 0.044715, %v4588_v34 }
 0x198   : > { %v809_v37 = vmul.f32 0.044715, %v4584_v30  ;;  %v4593_v38 = vadd.f32 %v721_v35, %v4518_v63  ;;  %v1022_v40 = vmul.f32 %v990_v32, %v766_v16  ;;  %v903_v47 = vadd.f32 %v871_v6, %v4566_v0 }
 0x199   : > { %v1023_v42 = vmul.f32 %v991_v36, %v767_v15  ;;  %v933_v52 = vmul.f32 0.7978846, %v901_v44  ;;  %v4607_v56 = vadd.f32 %v719_v31, %v4514_v62  ;;  %v870_v1 = vmul.f32 %v838_v45, %v4569_v5 }
 0x19a   : > { %v1052_v46 = vpack.c.bf16 %v1022_v40, %v1020_v39  ;;  %v811_v49 = vmul.f32 0.044715, %v4593_v38  ;;  %v841_v28 = vmul.f32 %v809_v37, %v4584_v30  ;;  %v935_v60 = vmul.f32 0.7978846, %v903_v47 }
 0x19b   : > { %v1053_v51 = vpack.c.bf16 %v1023_v42, %v1021_v41  ;;  %3655 = vtanh.f32 %v933_v52  ;;  %v840_v16 = vmul.f32 %v808_v48, %v4588_v34  ;;  %v810_v22 = vmul.f32 0.044715, %v4607_v56 }
 0x19c   : > { %v3648_v53 = vpop.eup %3647  ;;  %v725_v58 = vpop.f32.mrb[16].mxu0  ;;  %3657 = vtanh.f32 %v935_v60  ;;  %v843_v17 = vmul.f32 %v811_v49, %v4593_v38  ;;  %v873_v19 = vmul.f32 %v841_v28, %v4584_v30  ;;  %v900_v6 = vadd.f32 %v868_v55, %v4561_v54 }
 0x19d   : > { %v3650_v2 = vpop.eup %3649  ;;  %v4610_v4 = vadd.f32 %v725_v58, %v4514_v62  ;;  %v727_v7 = vpop.f32.mrb[17].mxu0  ;;  %1304 = vmatprep.mubr.bf16.mxu1 %v1053_v51  ;;  %v993_v8 = vadd.f32 1.0, %v3648_v53  ;;  %v902_v35 = vadd.f32 %v870_v1, %v4569_v5  ;;  %v842_v41 = vmul.f32 %v810_v22, %v4607_v56 }
 0x19e   : > { %v3652_v11 = vpop.eup %3651  ;;  %v4617_v12 = vadd.f32 %v727_v7, %v4518_v63  ;;  %v729_v13 = vpop.f32.mrb[18].mxu0  ;;  %1305 = vmatmul.mubr.bf16.vlgmr.msra.gmra.mrb[0].mxu1 %v1052_v46  ;;  %v992_v14 = vadd.f32 1.0, %v3650_v2  ;;  %v875_v36 = vmul.f32 %v843_v17, %v4593_v38  ;;  %v932_v40 = vmul.f32 0.7978846, %v900_v6 }
 0x19f   : > { %v3654_v15 = vpop.eup %3653  ;;  %v4622_v18 = vadd.f32 %v729_v13, %v4514_v62  ;;  %v731_v50 = vpop.f32.mrb[19].mxu0  ;;  %v995_v3 = vadd.f32 1.0, %v3652_v11  ;;  %v812_v24 = vmul.f32 0.044715, %v4610_v4  ;;  %v1025_v29 = vmul.f32 %v993_v8, %v4578_v21 }
 0x1a0   : > { %v994_v25 = vadd.f32 1.0, %v3654_v15  ;;  %v813_v26 = vmul.f32 0.044715, %v4617_v12  ;;  %v4631_v31 = vadd.f32 %v731_v50, %v4518_v63  ;;  %v1024_v32 = vmul.f32 %v992_v14, %v768_v33 }
 0x1a1   : > { %v1027_v9 = vmul.f32 %v995_v3, %v771_v27  ;;  %v814_v37 = vmul.f32 0.044715, %v4622_v18  ;;  %v775_v27 = vmul.f32 0.5, %v4566_v0  ;;  %v934_v54 = vmul.f32 0.7978846, %v902_v35 }
 0x1a2   : > { %v1026_v23 = vmul.f32 %v994_v25, %v770_v43  ;;  %v872_v44 = vmul.f32 %v840_v16, %v4588_v34  ;;  %v844_v33 = vmul.f32 %v812_v24, %v4610_v4  ;;  %3659 = vtanh.f32 %v932_v40 }
 0x1a3   : > { %v1055_v39 = vpack.c.bf16 %v1027_v9, %v1025_v29  ;;  %v845_v46 = vmul.f32 %v813_v26, %v4617_v12  ;;  %v815_v47 = vmul.f32 0.044715, %v4631_v31  ;;  %3661 = vtanh.f32 %v934_v54 }
 0x1a4   : > { %v735_v42 = vpop.f32.mrb[20].mxu0  ;;  %v1054_v21 = vpack.c.bf16 %v1026_v23, %v1024_v32  ;;  %v846_v51 = vmul.f32 %v814_v37, %v4622_v18  ;;  %v774_v53 = vmul.f32 0.5, %v4569_v5  ;;  %v905_v55 = vadd.f32 %v873_v19, %v4584_v30 }
 0x1a5   : > { %v4641_v43 = vadd.f32 %v735_v42, %v4514_v62  ;;  %v737_v45 = vpop.f32.mrb[21].mxu0  ;;  %1314 = vmatprep.mubr.bf16.mxu1 %v1055_v39  ;;  %v3656_v0 = vpop.eup %3655  ;;  %v907_v28 = vadd.f32 %v875_v36, %v4593_v38  ;;  %v874_v60 = vmul.f32 %v842_v41, %v4607_v56  ;;  %v4660_v11 = vmul.f32 %v844_v33, %v4610_v4 }
 0x1a6   : > { %v4646_v48 = vadd.f32 %v737_v45, %v4518_v63  ;;  %v739_v49 = vpop.f32.mrb[22].mxu0  ;;  %1315 = vmatmul.mubr.bf16.gmra.mrb[4].mxu1 %v1054_v21  ;;  %v3658_v58 = vpop.eup %3657  ;;  %v997_v8 = vadd.f32 1.0, %v3656_v0  ;;  %v937_v13 = vmul.f32 0.7978846, %v905_v55  ;;  %v877_v14 = vmul.f32 %v845_v46, %v4617_v12 }
 0x1a7   : > { %v741_v52 = vpop.f32.mrb[23].mxu0  ;;  %v4654_v2 = vadd.f32 %v739_v49, %v4514_v62  ;;  %v816_v1 = vmul.f32 0.044715, %v4641_v43  ;;  %v999_v5 = vadd.f32 1.0, %v3658_v58  ;;  %v847_v15 = vmul.f32 %v815_v47, %v4631_v31 }
 0x1a8   : > { %v4657_v7 = vadd.f32 %v741_v52, %v4518_v63  ;;  %v817_v16 = vmul.f32 0.044715, %v4646_v48  ;;  %v939_v17 = vmul.f32 0.7978846, %v907_v28  ;;  %v4667_v50 = vmul.f32 %v846_v51, %v4622_v18 }
 0x1a9   : > { %v1029_v3 = vmul.f32 %v997_v8, %v4613_v10  ;;  %v1031_v19 = vmul.f32 %v999_v5, %v775_v27  ;;  %3663 = vtanh.f32 %v937_v13  ;;  %v818_v22 = vmul.f32 0.044715, %v4654_v2 }
 0x1aa   : > { %v819_v24 = vmul.f32 0.044715, %v4657_v7  ;;  %v4673_v26 = vmul.f32 0.5, %v4584_v30  ;;  %3665 = vtanh.f32 %v939_v17  ;;  %v848_v29 = vmul.f32 %v816_v1, %v4641_v43 }
 0x1ab   : > { %v1057_v32 = vpack.c.bf16 %v1031_v19, %v1029_v3  ;;  %v904_v10 = vadd.f32 %v872_v44, %v4588_v34  ;;  %v879_v23 = vmul.f32 %v847_v15, %v4631_v31  ;;  %v849_v35 = vmul.f32 %v817_v16, %v4646_v48 }
 0x1ac   : > { %v745_v25 = vpop.f32.mrb[24].mxu0  ;;  %v779_v37 = vmul.f32 0.5, %v4593_v38  ;;  %v906_v30 = vadd.f32 %v874_v60, %v4607_v56  ;;  %v3660_v39 = vpop.eup %3659  ;;  %v4691_v21 = vmul.f32 0.5, %v4588_v34  ;;  %v850_v44 = vmul.f32 %v818_v22, %v4654_v2 }
 0x1ad   : > { %v4677_v9 = vadd.f32 %v745_v25, %v4514_v62  ;;  %v747_v6 = vpop.f32.mrb[25].mxu0  ;;  %1324 = vmatprep.mubr.bf16.mxu1 %v1057_v32  ;;  %v936_v27 = vmul.f32 0.7978846, %v904_v10  ;;  %v3662_v54 = vpop.eup %3661  ;;  %v851_v38 = vmul.f32 %v819_v24, %v4657_v7  ;;  %v996_v33 = vadd.f32 1.0, %v3660_v39 }
 0x1ae   : > { %v749_v36 = vpop.f32.mrb[26].mxu0  ;;  %v4685_v40 = vadd.f32 %v747_v6, %v4518_v63  ;;  %v938_v45 = vmul.f32 0.7978846, %v906_v30  ;;  %v4696_v46 = vmul.f32 %v848_v29, %v4641_v43  ;;  %v998_v47 = vadd.f32 1.0, %v3662_v54 }
 0x1af   : > { %v4688_v41 = vadd.f32 %v749_v36, %v4514_v62  ;;  %v751_v42 = vpop.f32.mrb[27].mxu0  ;;  %3667 = vtanh.f32 %v936_v27  ;;  %v881_v0 = vmul.f32 %v849_v35, %v4646_v48  ;;  %v820_v34 = vmul.f32 0.044715, %v4677_v9 }
 0x1b0   : > { %v4699_v49 = vadd.f32 %v751_v42, %v4518_v63  ;;  %v778_v51 = vmul.f32 0.5, %v4607_v56  ;;  %3669 = vtanh.f32 %v938_v45  ;;  %v821_v52 = vmul.f32 0.044715, %v4685_v40 }
 0x1b1   : > { %v1028_v55 = vmul.f32 %v996_v33, %v4600_v20  ;;  %v1030_v28 = vmul.f32 %v998_v47, %v774_v53  ;;  %v909_v58 = vadd.f32 %v877_v14, %v4617_v12  ;;  %v882_v60 = vmul.f32 %v850_v44, %v4654_v2 }
 0x1b2   : > { %v883_v8 = vmul.f32 %v851_v38, %v4657_v7  ;;  %v822_v1 = vmul.f32 0.044715, %v4688_v41  ;;  %v911_v13 = vadd.f32 %v879_v23, %v4631_v31  ;;  %v823_v56 = vmul.f32 0.044715, %v4699_v49 }
 0x1b3   : > { %v3664_v15 = vpop.eup %3663  ;;  %v1056_v16 = vpack.c.bf16 %v1030_v28, %v1028_v55  ;;  %v941_v53 = vmul.f32 0.7978846, %v909_v58  ;;  %v852_v14 = vmul.f32 %v820_v34, %v4677_v9  ;;  %v853_v29 = vmul.f32 %v821_v52, %v4685_v40 }
 0x1b4   : > { %v755_v5 = vpop.f32.mrb[28].mxu0  ;;  %v3666_v3 = vpop.eup %3665  ;;  %v1001_v22 = vadd.f32 1.0, %v3664_v15  ;;  %v943_v25 = vmul.f32 0.7978846, %v911_v13  ;;  %v854_v23 = vmul.f32 %v822_v1, %v4688_v41  ;;  %v781_v36 = vmul.f32 0.5, %v4617_v12 }
 0x1b5   : > { %v4713_v17 = vadd.f32 %v755_v5, %v4514_v62  ;;  %v757_v20 = vpop.f32.mrb[29].mxu0  ;;  %1325 = vmatmul.mubr.bf16.gmra.mrb[8].mxu1 %v1056_v16  ;;  %v1003_v6 = vadd.f32 1.0, %v3666_v3  ;;  %3671 = vtanh.f32 %v941_v53  ;;  %v855_v30 = vmul.f32 %v823_v56, %v4699_v49 }
 0x1b6   : > { %v4717_v19 = vadd.f32 %v757_v20, %v4518_v63  ;;  %v759_v24 = vpop.f32.mrb[30].mxu0  ;;  %3673 = vtanh.f32 %v943_v25  ;;  %v1033_v42 = vmul.f32 %v1001_v22, %v4673_v26  ;;  %v908_v44 = vadd.f32 %v4660_v11, %v4610_v4 }
 0x1b7   : > { %v4721_v32 = vadd.f32 %v759_v24, %v4514_v62  ;;  %v761_v10 = vpop.f32.mrb[31].mxu0  ;;  %v1035_v27 = vmul.f32 %v1003_v6, %v779_v37  ;;  %v824_v62 = vmul.f32 0.044715, %v4713_v17  ;;  %v884_v12 = vmul.f32 %v852_v14, %v4677_v9 }
 0x1b8   : > { %v4725_v35 = vadd.f32 %v761_v10, %v4518_v63  ;;  %v825_v39 = vmul.f32 0.044715, %v4717_v19  ;;  %v910_v63 = vadd.f32 %v4667_v50, %v4622_v18  ;;  %v885_v33 = vmul.f32 %v853_v29, %v4685_v40 }
 0x1b9   : > { %v3668_v38 = vpop.eup %3667  ;;  %v1059_v45 = vpack.c.bf16 %v1035_v27, %v1033_v42  ;;  %v783_v47 = vmul.f32 0.5, %v4631_v31  ;;  %v886_v37 = vmul.f32 %v854_v23, %v4688_v41  ;;  %v826_v34 = vmul.f32 0.044715, %v4721_v32 }
 0x1ba   : > { %v827_v54 = vmul.f32 0.044715, %v4725_v35  ;;  %v3670_v26 = vpop.eup %3669  ;;  %v1000_v52 = vadd.f32 1.0, %v3668_v38  ;;  %v940_v55 = vmul.f32 0.7978846, %v908_v44  ;;  %v857_v11 = vmul.f32 %v825_v39, %v4717_v19 }
 0x1bb   : > { %1334 = vmatprep.mubr.bf16.mxu1 %v1059_v45  ;;  %v1002_v28 = vadd.f32 1.0, %v3670_v26  ;;  %v942_v58 = vmul.f32 0.7978846, %v910_v63  ;;  %v887_v1 = vmul.f32 %v855_v30, %v4699_v49  ;;  %v856_v5 = vmul.f32 %v824_v62, %v4713_v17 }
 0x1bc   : > { %v859_v50 = vmul.f32 %v827_v54, %v4725_v35  ;;  %3675 = vtanh.f32 %v940_v55  ;;  %v913_v31 = vadd.f32 %v881_v0, %v4646_v48  ;;  %v1032_v13 = vmul.f32 %v1000_v52, %v4691_v21 }
 0x1bd   : > { %v1034_v15 = vmul.f32 %v1002_v28, %v778_v51  ;;  %3677 = vtanh.f32 %v942_v58  ;;  %v915_v16 = vadd.f32 %v883_v8, %v4657_v7  ;;  %v858_v56 = vmul.f32 %v826_v34, %v4721_v32 }
 0x1be   : > { %v945_v20 = vmul.f32 0.7978846, %v913_v31  ;;  %v912_v53 = vadd.f32 %v4696_v46, %v4641_v43  ;;  %v914_v3 = vadd.f32 %v882_v60, %v4654_v2  ;;  %v889_v22 = vmul.f32 %v857_v11, %v4717_v19 }
 0x1bf   : > { %v3672_v14 = vpop.eup %3671  ;;  %v1058_v24 = vpack.c.bf16 %v1034_v15, %v1032_v13  ;;  %v891_v0 = vmul.f32 %v859_v50, %v4725_v35  ;;  %v947_v25 = vmul.f32 0.7978846, %v915_v16  ;;  %v917_v10 = vadd.f32 %v885_v33, %v4685_v40 }
 0x1c0   : > { %v3674_v21 = vpop.eup %3673  ;;  %v1005_v51 = vadd.f32 1.0, %v3672_v14  ;;  %3679 = vtanh.f32 %v945_v20  ;;  %v944_v29 = vmul.f32 0.7978846, %v912_v53  ;;  %v946_v8 = vmul.f32 0.7978846, %v914_v3 }
 0x1c1   : > { %1335 = vmatmul.mubr.bf16.gmra.mrb[12].mxu1 %v1058_v24  ;;  %v1007_v6 = vadd.f32 1.0, %v3674_v21  ;;  %3681 = vtanh.f32 %v947_v25  ;;  %v919_v46 = vadd.f32 %v887_v1, %v4699_v49  ;;  %v949_v30 = vmul.f32 0.7978846, %v917_v10 }
 0x1c2   : > { %v1037_v60 = vmul.f32 %v1005_v51, %v781_v36  ;;  %3683 = vtanh.f32 %v944_v29  ;;  %v888_v42 = vmul.f32 %v856_v5, %v4713_v17  ;;  %v890_v27 = vmul.f32 %v858_v56, %v4721_v32 }
 0x1c3   : > { %v1039_v23 = vmul.f32 %v1007_v6, %v783_v47  ;;  %3685 = vtanh.f32 %v946_v8  ;;  %v951_v39 = vmul.f32 0.7978846, %v919_v46  ;;  %v916_v62 = vadd.f32 %v884_v12, %v4677_v9 }
 0x1c4   : > { %v918_v54 = vadd.f32 %v886_v37, %v4688_v41  ;;  %3687 = vtanh.f32 %v949_v30  ;;  %v921_v63 = vadd.f32 %v889_v22, %v4717_v19  ;;  %v923_v38 = vadd.f32 %v891_v0, %v4725_v35 }
 0x1c5   : > { %v1061_v44 = vpack.c.bf16 %v1039_v23, %v1037_v60  ;;  %v780_v33 = vmul.f32 0.5, %v4610_v4  ;;  %3689 = vtanh.f32 %v951_v39  ;;  %v948_v45 = vmul.f32 0.7978846, %v916_v62 }
 0x1c6   : > { %v3676_v36 = vpop.eup %3675  ;;  %v950_v47 = vmul.f32 0.7978846, %v918_v54  ;;  %v782_v34 = vmul.f32 0.5, %v4622_v18  ;;  %v953_v12 = vmul.f32 0.7978846, %v921_v63  ;;  %v920_v11 = vadd.f32 %v888_v42, %v4713_v17 }
 0x1c7   : > { %v3678_v26 = vpop.eup %3677  ;;  %1344 = vmatprep.mubr.bf16.mxu1 %v1061_v44  ;;  %v1004_v52 = vadd.f32 1.0, %v3676_v36  ;;  %v955_v55 = vmul.f32 0.7978846, %v923_v38  ;;  %3691 = vtanh.f32 %v948_v45  ;;  %v922_v28 = vadd.f32 %v890_v27, %v4721_v32 }
 0x1c8   : > { %v1006_v37 = vadd.f32 1.0, %v3678_v26  ;;  %3693 = vtanh.f32 %v950_v47  ;;  %v952_v1 = vmul.f32 0.7978846, %v920_v11  ;;  %v785_v13 = vmul.f32 0.5, %v4646_v48 }
 0x1c9   : > { %v1036_v50 = vmul.f32 %v1004_v52, %v780_v33  ;;  %3695 = vtanh.f32 %v953_v12  ;;  %v954_v5 = vmul.f32 0.7978846, %v922_v28  ;;  %v787_v56 = vmul.f32 0.5, %v4657_v7 }
 0x1ca   : > { %v3680_v58 = vpop.eup %3679  ;;  %v1038_v4 = vmul.f32 %v1006_v37, %v782_v34  ;;  %3697 = vtanh.f32 %v955_v55  ;;  %v784_v3 = vmul.f32 0.5, %v4641_v43  ;;  %v786_v0 = vmul.f32 0.5, %v4654_v2 }
 0x1cb   : > { %v3682_v31 = vpop.eup %3681  ;;  %v1009_v18 = vadd.f32 1.0, %v3680_v58  ;;  %3699 = vtanh.f32 %v952_v1  ;;  %v789_v7 = vmul.f32 0.5, %v4685_v40  ;;  %v791_v10 = vmul.f32 0.5, %v4699_v49  ;;  %v3618_v58 = vld [vmem:[#allocation5 + $0x20] sm:$0xff]   ;;  %v3622_v1 = vld [vmem:[#allocation5 + $0x30] sm:$0xff]  }
 0x1cc   : > { %v3684_v15 = vpop.eup %3683  ;;  %v1060_v16 = vpack.c.bf16 %v1038_v4, %v1036_v50  ;;  %v1011_v20 = vadd.f32 1.0, %v3682_v31  ;;  %3701 = vtanh.f32 %v954_v5  ;;  %v788_v27 = vmul.f32 0.5, %v4677_v9  ;;  %v3619_v4 = vld [vmem:[#allocation5 + $0x68] sm:$0xff]   ;;  %v3623_v5 = vld [vmem:[#allocation5 + $0x78] sm:$0xff]  }
 0x1cd   : > { %v3686_v53 = vpop.eup %3685  ;;  %v1008_v14 = vadd.f32 1.0, %v3684_v15  ;;  %v1041_v22 = vmul.f32 %v1009_v18, %v785_v13  ;;  %v790_v62 = vmul.f32 0.5, %v4688_v41  ;;  %v793_v40 = vmul.f32 0.5, %v4717_v19  ;;  %v3624_v31 = vld [vmem:[#allocation5 + $0x38] sm:$0xff]  }
 0x1ce   : > { %1345 = vmatmul.mubr.bf16.gmra.mrb[16].mxu1 %v1060_v16  ;;  %v1043_v24 = vmul.f32 %v1011_v20, %v787_v56  ;;  %v1010_v25 = vadd.f32 1.0, %v3686_v53  ;;  %v3688_v48 = vpop.eup %3687  ;;  %v795_v45 = vmul.f32 0.5, %v4725_v35  ;;  %v792_v34 = vmul.f32 0.5, %v4713_v17  ;;  %v3617_v35 = vld [vmem:[#allocation5 + $0x60] sm:$0xff]   ;;  %v3620_v17 = vld [vmem:[#allocation5 + $0x28] sm:$0xff]  }
 0x1cf   : > { %v3690_v21 = vpop.eup %3689  ;;  %v1040_v29 = vmul.f32 %v1008_v14, %v784_v3  ;;  %v1013_v6 = vadd.f32 1.0, %v3688_v48  ;;  %v794_v9 = vmul.f32 0.5, %v4721_v32  ;;  %3272 = vmatprep.subr.bf16.mxu0 %v3617_v35  ;;  %v3621_v32 = vld [vmem:[#allocation5 + $0x70] sm:$0xff]   ;;  %v1100_v13 = vld [vmem:[#allocation2] sm:$0x3] }
 0x1d0   : > { %v1063_v51 = vpack.c.bf16 %v1043_v24, %v1041_v22  ;;  %v1042_v8 = vmul.f32 %v1010_v25, %v786_v0  ;;  %v1015_v46 = vadd.f32 1.0, %v3690_v21  ;;  %3273 = vmatpush3.bf16.msra.mxu0 %v3618_v58  ;;  %v4781_v18 = vrot.slane %v1100_v13, %v538_v59 }
 0x1d1   : > { %v3692_v43 = vpop.eup %3691  ;;  %v1045_v30 = vmul.f32 %v1013_v6, %v789_v7  ;;  %3274 = vmatprep.subr.bf16.mxu0 %v3619_v4  ;;  %v4785_v15 = vrot.slane %v1100_v13, %v542_v61 }
 0x1d2   : > { %1354 = vmatprep.mubr.bf16.mxu1 %v1063_v51  ;;  %v1062_v60 = vpack.c.bf16 %v1042_v8, %v1040_v29  ;;  %v3694_v23 = vpop.eup %3693  ;;  %v1047_v39 = vmul.f32 %v1015_v46, %v791_v10  ;;  %v1012_v42 = vadd.f32 1.0, %v3692_v43 }
 0x1d3   : > { %v3696_v2 = vpop.eup %3695  ;;  %v1014_v54 = vadd.f32 1.0, %v3694_v23 }
 0x1d4   : > { %v3698_v44 = vpop.eup %3697  ;;  %v1065_v63 = vpack.c.bf16 %v1047_v39, %v1045_v30  ;;  %v1017_v38 = vadd.f32 1.0, %v3696_v2  ;;  %v1044_v36 = vmul.f32 %v1012_v42, %v788_v27  ;;  %3275 = vmatpush3.bf16.msra.mxu0 %v3620_v17 }
 0x1d5   : > { %v3700_v49 = vpop.eup %3699  ;;  %v1046_v33 = vmul.f32 %v1014_v54, %v790_v62  ;;  %v1019_v47 = vadd.f32 1.0, %v3698_v44  ;;  %3276 = vmatprep.subr.bf16.mxu0 %v3621_v32 }
 0x1d6   : > { %1355 = vmatmul.mubr.bf16.gmra.mrb[20].mxu1 %v1062_v60  ;;  %v3702_v26 = vpop.eup %3701  ;;  %v1016_v41 = vadd.f32 1.0, %v3700_v49  ;;  %v1049_v12 = vmul.f32 %v1017_v38, %v793_v40 }
 0x1d7   : > { %1364 = vmatprep.mubr.bf16.mxu1 %v1065_v63  ;;  %v1064_v52 = vpack.c.bf16 %v1046_v33, %v1044_v36  ;;  %v1051_v55 = vmul.f32 %v1019_v47, %v795_v45  ;;  %v1018_v37 = vadd.f32 1.0, %v3702_v26 }
 0x1d8   : > { %v1048_v11 = vmul.f32 %v1016_v41, %v792_v34  ;;  %3277 = vmatpush3.bf16.msra.mxu0 %v3622_v1 }
 0x1d9   : > { %v1067_v19 = vpack.c.bf16 %v1051_v55, %v1049_v12  ;;  %v1050_v28 = vmul.f32 %v1018_v37, %v794_v9  ;;  %3278 = vmatprep.subr.bf16.mxu0 %v3623_v5 }
 0x1db   : > { %v1066_v50 = vpack.c.bf16 %v1050_v28, %v1048_v11 }
 0x1dc   : > { %3279 = vmatpush3.bf16.msra.mxu0 %v3624_v31 }
 0x1de   : > { %1365 = vmatmul.mubr.bf16.gmra.mrb[24].mxu1 %v1064_v52 }
 0x1df   : > { %1374 = vmatprep.mubr.bf16.mxu1 %v1067_v19 }
 0x1e6   : > { %1375 = vmatmul.mubr.bf16.gmra.mrb[28].mxu1 %v1066_v50 }
 0x271   : > { %v1306_v16 = vpop.f32.mrb[0].mxu1 }
 0x272   : > { %v4788_v56 = vadd.f32 %v1306_v16, %v4781_v18  ;;  %v1308_v20 = vpop.f32.mrb[1].mxu1 }
 0x273   : > { %v4791_v53 = vadd.f32 %v1308_v20, %v4785_v15  ;;  %v1310_v3 = vpop.f32.mrb[2].mxu1 }
 0x274   : > { %v1417_v14 = vmul.f32 0.044715, %v4788_v56  ;;  %v4795_v22 = vadd.f32 %v1310_v3, %v4781_v18  ;;  %v1312_v59 = vpop.f32.mrb[3].mxu1  ;;  %v1385_v20 = vmul.f32 0.5, %v4788_v56 }
 0x275   : > { %v1418_v24 = vmul.f32 0.044715, %v4791_v53  ;;  %v4799_v57 = vadd.f32 %v1312_v59, %v4785_v15 }
 0x276   : > { %v1449_v61 = vmul.f32 %v1417_v14, %v4788_v56  ;;  %v1419_v0 = vmul.f32 0.044715, %v4795_v22  ;;  %v1387_v3 = vmul.f32 0.5, %v4795_v22 }
 0x277   : > { %v1450_v25 = vmul.f32 %v1418_v24, %v4791_v53  ;;  %v1420_v48 = vmul.f32 0.044715, %v4799_v57 }
 0x278   : > { %v1481_v21 = vmul.f32 %v1449_v61, %v4788_v56  ;;  %v1451_v51 = vmul.f32 %v1419_v0, %v4795_v22 }
 0x279   : > { %v1482_v29 = vmul.f32 %v1450_v25, %v4791_v53  ;;  %v1452_v8 = vmul.f32 %v1420_v48, %v4799_v57  ;;  %v1316_v6 = vpop.f32.mrb[4].mxu1  ;;  %v1386_v25 = vmul.f32 0.5, %v4791_v53  ;;  %v1388_v48 = vmul.f32 0.5, %v4799_v57 }
 0x27a   : > { %v1513_v7 = vadd.f32 %v1481_v21, %v4788_v56  ;;  %v1483_v10 = vmul.f32 %v1451_v51, %v4795_v22  ;;  %v4812_v46 = vadd.f32 %v1316_v6, %v4781_v18  ;;  %v1318_v43 = vpop.f32.mrb[5].mxu1 }
 0x27b   : > { %v1484_v60 = vmul.f32 %v1452_v8, %v4799_v57  ;;  %v4816_v23 = vadd.f32 %v1318_v43, %v4785_v15  ;;  %v1320_v30 = vpop.f32.mrb[6].mxu1  ;;  %v1514_v39 = vadd.f32 %v1482_v29, %v4791_v53 }
 0x27c   : > { %v1545_v42 = vmul.f32 0.7978846, %v1513_v7  ;;  %v1515_v2 = vadd.f32 %v1483_v10, %v4795_v22  ;;  %v1421_v27 = vmul.f32 0.044715, %v4812_v46  ;;  %v4822_v62 = vadd.f32 %v1320_v30, %v4781_v18  ;;  %v1322_v54 = vpop.f32.mrb[7].mxu1 }
 0x27d   : > { %v1422_v44 = vmul.f32 0.044715, %v4816_v23  ;;  %v4826_v63 = vadd.f32 %v1322_v54, %v4785_v15  ;;  %v1516_v40 = vadd.f32 %v1484_v60, %v4799_v57  ;;  %v1546_v38 = vmul.f32 0.7978846, %v1514_v39 }
 0x27e   : > { %3703 = vtanh.f32 %v1545_v42  ;;  %v1547_v49 = vmul.f32 0.7978846, %v1515_v2  ;;  %v1453_v36 = vmul.f32 %v1421_v27, %v4812_v46  ;;  %v1423_v33 = vmul.f32 0.044715, %v4822_v62 }
 0x27f   : > { %v1454_v45 = vmul.f32 %v1422_v44, %v4816_v23  ;;  %v1424_v47 = vmul.f32 0.044715, %v4826_v63  ;;  %v1548_v26 = vmul.f32 0.7978846, %v1516_v40  ;;  %3705 = vtanh.f32 %v1546_v38 }
 0x280   : > { %3707 = vtanh.f32 %v1547_v49  ;;  %v1485_v34 = vmul.f32 %v1453_v36, %v4812_v46  ;;  %v1455_v9 = vmul.f32 %v1423_v33, %v4822_v62  ;;  %v1390_v40 = vmul.f32 0.5, %v4816_v23 }
 0x281   : > { %v1486_v41 = vmul.f32 %v1454_v45, %v4816_v23  ;;  %v1456_v52 = vmul.f32 %v1424_v47, %v4826_v63  ;;  %3709 = vtanh.f32 %v1548_v26  ;;  %v1389_v47 = vmul.f32 0.5, %v4812_v46 }
 0x282   : > { %v1487_v12 = vmul.f32 %v1455_v9, %v4822_v62  ;;  %v1517_v55 = vadd.f32 %v1485_v34, %v4812_v46  ;;  %v1391_v9 = vmul.f32 0.5, %v4822_v62 }
 0x283   : > { %v1488_v37 = vmul.f32 %v1456_v52, %v4826_v63  ;;  %v1518_v19 = vadd.f32 %v1486_v41, %v4816_v23 }
 0x284   : > { %v1519_v11 = vadd.f32 %v1487_v12, %v4822_v62  ;;  %v1549_v28 = vmul.f32 0.7978846, %v1517_v55  ;;  %v1392_v12 = vmul.f32 0.5, %v4826_v63 }
 0x285   : > { %v1520_v50 = vadd.f32 %v1488_v37, %v4826_v63  ;;  %v1550_v35 = vmul.f32 0.7978846, %v1518_v19 }
 0x286   : > { %v1551_v58 = vmul.f32 0.7978846, %v1519_v11  ;;  %3711 = vtanh.f32 %v1549_v28 }
 0x287   : > { %v1552_v4 = vmul.f32 0.7978846, %v1520_v50  ;;  %3713 = vtanh.f32 %v1550_v35 }
 0x288   : > { %v3704_v17 = vpop.eup %3703  ;;  %3715 = vtanh.f32 %v1551_v58  ;;  %v1326_v31 = vpop.f32.mrb[8].mxu1 }
 0x289   : > { %v3706_v32 = vpop.eup %3705  ;;  %v1609_v1 = vadd.f32 1.0, %v3704_v17  ;;  %3717 = vtanh.f32 %v1552_v4  ;;  %v4846_v14 = vadd.f32 %v1326_v31, %v4781_v18  ;;  %v1328_v59 = vpop.f32.mrb[9].mxu1 }
 0x28a   : > { %v3708_v5 = vpop.eup %3707  ;;  %v1610_v13 = vadd.f32 1.0, %v3706_v32  ;;  %v4849_v61 = vadd.f32 %v1328_v59, %v4785_v15  ;;  %v1330_v0 = vpop.f32.mrb[10].mxu1 }
 0x28b   : > { %v3710_v16 = vpop.eup %3709  ;;  %v1611_v24 = vadd.f32 1.0, %v3708_v5  ;;  %v1425_v51 = vmul.f32 0.044715, %v4846_v14  ;;  %v4855_v56 = vadd.f32 %v1330_v0, %v4781_v18  ;;  %v1332_v22 = vpop.f32.mrb[11].mxu1  ;;  %v1641_v29 = vmul.f32 %v1609_v1, %v1385_v20 }
 0x28c   : > { %v1612_v21 = vadd.f32 1.0, %v3710_v16  ;;  %v1426_v6 = vmul.f32 0.044715, %v4849_v61  ;;  %v4859_v7 = vadd.f32 %v1332_v22, %v4785_v15  ;;  %v1642_v10 = vmul.f32 %v1610_v13, %v1386_v25 }
 0x28d   : > { %v1643_v8 = vmul.f32 %v1611_v24, %v1387_v3  ;;  %v1457_v53 = vmul.f32 %v1425_v51, %v4846_v14  ;;  %v1427_v57 = vmul.f32 0.044715, %v4855_v56 }
 0x28e   : > { %v1644_v43 = vmul.f32 %v1612_v21, %v1388_v48  ;;  %v1458_v39 = vmul.f32 %v1426_v6, %v4849_v61  ;;  %v1428_v42 = vmul.f32 0.044715, %v4859_v7 }
 0x28f   : > { %v1673_v60 = vpack.c.bf16 %v1643_v8, %v1641_v29  ;;  %v1489_v54 = vmul.f32 %v1457_v53, %v4846_v14  ;;  %v1459_v44 = vmul.f32 %v1427_v57, %v4855_v56 }
 0x290   : > { %v3712_v30 = vpop.eup %3711  ;;  %v1674_v2 = vpack.c.bf16 %v1644_v43, %v1642_v10  ;;  %v1490_v36 = vmul.f32 %v1458_v39, %v4849_v61  ;;  %v1460_v33 = vmul.f32 %v1428_v42, %v4859_v7  ;;  %v1393_v39 = vmul.f32 0.5, %v4846_v14 }
 0x291   : > { %v3714_v27 = vpop.eup %3713  ;;  %v1613_v38 = vadd.f32 1.0, %v3712_v30  ;;  %v1491_v34 = vmul.f32 %v1459_v44, %v4855_v56  ;;  %v1521_v52 = vadd.f32 %v1489_v54, %v4846_v14  ;;  %v1394_v30 = vmul.f32 0.5, %v4849_v61 }
 0x292   : > { %v3716_v49 = vpop.eup %3715  ;;  %1856 = vmatprep.mubr.bf16.mxu0 %v1674_v2  ;;  %v1614_v45 = vadd.f32 1.0, %v3714_v27  ;;  %v1492_v23 = vmul.f32 %v1460_v33, %v4859_v7  ;;  %v1522_v37 = vadd.f32 %v1490_v36, %v4849_v61  ;;  %v1395_v54 = vmul.f32 0.5, %v4855_v56 }
 0x293   : > { %v3718_v26 = vpop.eup %3717  ;;  %1857 = vmatmul.mubr.bf16.vlgmr.msra.gmra.mrb[32].mxu0 %v1673_v60  ;;  %v1615_v41 = vadd.f32 1.0, %v3716_v49  ;;  %v1645_v19 = vmul.f32 %v1613_v38, %v1389_v47  ;;  %v1523_v46 = vadd.f32 %v1491_v34, %v4855_v56  ;;  %v1553_v28 = vmul.f32 0.7978846, %v1521_v52 }
 0x294   : > { %v1616_v55 = vadd.f32 1.0, %v3718_v26  ;;  %v1336_v50 = vpop.f32.mrb[12].mxu1  ;;  %v1646_v35 = vmul.f32 %v1614_v45, %v1390_v40  ;;  %v1524_v62 = vadd.f32 %v1492_v23, %v4859_v7  ;;  %v1554_v4 = vmul.f32 0.7978846, %v1522_v37 }
 0x295   : > { %v1647_v11 = vmul.f32 %v1615_v41, %v1391_v9  ;;  %v4880_v17 = vadd.f32 %v1336_v50, %v4781_v18  ;;  %v1338_v32 = vpop.f32.mrb[13].mxu1  ;;  %v1555_v63 = vmul.f32 0.7978846, %v1523_v46  ;;  %3719 = vtanh.f32 %v1553_v28 }
 0x296   : > { %v1648_v58 = vmul.f32 %v1616_v55, %v1392_v12  ;;  %v4883_v5 = vadd.f32 %v1338_v32, %v4785_v15  ;;  %v1340_v31 = vpop.f32.mrb[14].mxu1  ;;  %v1556_v16 = vmul.f32 0.7978846, %v1524_v62  ;;  %3721 = vtanh.f32 %v1554_v4 }
 0x297   : > { %v1675_v1 = vpack.c.bf16 %v1647_v11, %v1645_v19  ;;  %v1429_v20 = vmul.f32 0.044715, %v4880_v17  ;;  %v4887_v3 = vadd.f32 %v1340_v31, %v4781_v18  ;;  %v1342_v59 = vpop.f32.mrb[15].mxu1  ;;  %3723 = vtanh.f32 %v1555_v63 }
 0x298   : > { %v1676_v13 = vpack.c.bf16 %v1648_v58, %v1646_v35  ;;  %v1430_v24 = vmul.f32 0.044715, %v4883_v5  ;;  %v4891_v0 = vadd.f32 %v1342_v59, %v4785_v15  ;;  %3725 = vtanh.f32 %v1556_v16 }
 0x299   : > { %v1461_v25 = vmul.f32 %v1429_v20, %v4880_v17  ;;  %v1431_v48 = vmul.f32 0.044715, %v4887_v3  ;;  %v1396_v33 = vmul.f32 0.5, %v4859_v7  ;;  %v1397_v16 = vmul.f32 0.5, %v4880_v17 }
 0x29a   : > { %1864 = vmatprep.mubr.bf16.mxu0 %v1676_v13  ;;  %v1462_v21 = vmul.f32 %v1430_v24, %v4883_v5  ;;  %v1432_v51 = vmul.f32 0.044715, %v4891_v0 }
 0x29b   : > { %1865 = vmatmul.mubr.bf16.gmra.mrb[36].mxu0 %v1675_v1  ;;  %v1493_v22 = vmul.f32 %v1461_v25, %v4880_v17  ;;  %v1463_v29 = vmul.f32 %v1431_v48, %v4887_v3  ;;  %v1398_v48 = vmul.f32 0.5, %v4883_v5 }
 0x29c   : > { %v1494_v8 = vmul.f32 %v1462_v21, %v4883_v5  ;;  %v1464_v6 = vmul.f32 %v1432_v51, %v4891_v0 }
 0x29d   : > { %v1495_v10 = vmul.f32 %v1463_v29, %v4887_v3  ;;  %v1525_v43 = vadd.f32 %v1493_v22, %v4880_v17  ;;  %v1399_v17 = vmul.f32 0.5, %v4887_v3 }
 0x29e   : > { %v1496_v53 = vmul.f32 %v1464_v6, %v4891_v0  ;;  %v1526_v57 = vadd.f32 %v1494_v8, %v4883_v5 }
 0x29f   : > { %v3720_v60 = vpop.eup %3719  ;;  %v1527_v42 = vadd.f32 %v1495_v10, %v4887_v3  ;;  %v1557_v2 = vmul.f32 0.7978846, %v1525_v43 }
 0x2a0   : > { %v3722_v27 = vpop.eup %3721  ;;  %v1617_v44 = vadd.f32 1.0, %v3720_v60  ;;  %v1528_v40 = vadd.f32 %v1496_v53, %v4891_v0  ;;  %v1558_v38 = vmul.f32 0.7978846, %v1526_v57  ;;  %v1400_v53 = vmul.f32 0.5, %v4891_v0 }
 0x2a1   : > { %v3724_v49 = vpop.eup %3723  ;;  %v1346_v36 = vpop.f32.mrb[16].mxu1  ;;  %v1618_v45 = vadd.f32 1.0, %v3722_v27  ;;  %v1559_v47 = vmul.f32 0.7978846, %v1527_v42  ;;  %3727 = vtanh.f32 %v1557_v2 }
 0x2a2   : > { %v3726_v61 = vpop.eup %3725  ;;  %v4912_v14 = vadd.f32 %v1346_v36, %v4781_v18  ;;  %v1348_v26 = vpop.f32.mrb[17].mxu1  ;;  %v1619_v34 = vadd.f32 1.0, %v3724_v49  ;;  %v1649_v9 = vmul.f32 %v1617_v44, %v1393_v39  ;;  %v1560_v41 = vmul.f32 0.7978846, %v1528_v40 }
 0x2a3   : > { %v4915_v56 = vadd.f32 %v1348_v26, %v4785_v15  ;;  %v1350_v52 = vpop.f32.mrb[18].mxu1  ;;  %v1620_v23 = vadd.f32 1.0, %v3726_v61  ;;  %v1650_v12 = vmul.f32 %v1618_v45, %v1394_v30  ;;  %3729 = vtanh.f32 %v1558_v38 }
 0x2a4   : > { %v1433_v7 = vmul.f32 0.044715, %v4912_v14  ;;  %v4919_v55 = vadd.f32 %v1350_v52, %v4781_v18  ;;  %v1352_v37 = vpop.f32.mrb[19].mxu1  ;;  %v1651_v19 = vmul.f32 %v1619_v34, %v1395_v54  ;;  %3731 = vtanh.f32 %v1560_v41 }
 0x2a5   : > { %v1434_v11 = vmul.f32 0.044715, %v4915_v56  ;;  %v4923_v46 = vadd.f32 %v1352_v37, %v4785_v15  ;;  %v1652_v28 = vmul.f32 %v1620_v23, %v1396_v33  ;;  %3733 = vtanh.f32 %v1559_v47 }
 0x2a6   : > { %v1465_v50 = vmul.f32 %v1433_v7, %v4912_v14  ;;  %v1435_v35 = vmul.f32 0.044715, %v4919_v55  ;;  %v1677_v58 = vpack.c.bf16 %v1651_v19, %v1649_v9 }
 0x2a7   : > { %v1466_v62 = vmul.f32 %v1434_v11, %v4915_v56  ;;  %v1436_v4 = vmul.f32 0.044715, %v4923_v46  ;;  %v1678_v32 = vpack.c.bf16 %v1652_v28, %v1650_v12 }
 0x2a8   : > { %v1467_v1 = vmul.f32 %v1435_v35, %v4919_v55  ;;  %v1497_v20 = vmul.f32 %v1465_v50, %v4912_v14 }
 0x2a9   : > { %v1498_v63 = vmul.f32 %v1466_v62, %v4915_v56  ;;  %v1468_v31 = vmul.f32 %v1436_v4, %v4923_v46  ;;  %v1356_v13 = vpop.f32.mrb[20].mxu1  ;;  %1872 = vmatprep.mubr.bf16.mxu0 %v1678_v32 }
 0x2aa   : > { %v1499_v59 = vmul.f32 %v1467_v1, %v4919_v55  ;;  %v4936_v24 = vadd.f32 %v1356_v13, %v4781_v18  ;;  %v1358_v25 = vpop.f32.mrb[21].mxu1  ;;  %1873 = vmatmul.mubr.bf16.gmra.mrb[40].mxu0 %v1677_v58  ;;  %v1529_v54 = vadd.f32 %v1497_v20, %v4912_v14 }
 0x2ab   : > { %v3728_v21 = vpop.eup %3727  ;;  %v1500_v51 = vmul.f32 %v1468_v31, %v4923_v46  ;;  %v4941_v22 = vadd.f32 %v1358_v25, %v4785_v15  ;;  %v1360_v29 = vpop.f32.mrb[22].mxu1  ;;  %v1530_v8 = vadd.f32 %v1498_v63, %v4915_v56 }
 0x2ac   : > { %v1437_v6 = vmul.f32 0.044715, %v4936_v24  ;;  %v4947_v10 = vadd.f32 %v1360_v29, %v4781_v18  ;;  %v1362_v43 = vpop.f32.mrb[23].mxu1  ;;  %v1621_v5 = vadd.f32 1.0, %v3728_v21  ;;  %v1531_v44 = vadd.f32 %v1499_v59, %v4919_v55 }
 0x2ad   : > { %v3730_v57 = vpop.eup %3729  ;;  %v1438_v60 = vmul.f32 0.044715, %v4941_v22  ;;  %v4952_v30 = vadd.f32 %v1362_v43, %v4785_v15  ;;  %v1532_v39 = vadd.f32 %v1500_v51, %v4923_v46  ;;  %v1562_v3 = vmul.f32 0.7978846, %v1530_v8 }
 0x2ae   : > { %v3732_v42 = vpop.eup %3731  ;;  %v1439_v2 = vmul.f32 0.044715, %v4947_v10  ;;  %v1622_v27 = vadd.f32 1.0, %v3730_v57  ;;  %v1469_v33 = vmul.f32 %v1437_v6, %v4936_v24  ;;  %v1653_v61 = vmul.f32 %v1621_v5, %v1397_v16 }
 0x2af   : > { %v3734_v40 = vpop.eup %3733  ;;  %v1470_v0 = vmul.f32 %v1438_v60, %v4941_v22  ;;  %v1440_v38 = vmul.f32 0.044715, %v4952_v30  ;;  %v1624_v49 = vadd.f32 1.0, %v3732_v42  ;;  %v1564_v36 = vmul.f32 0.7978846, %v1532_v39 }
 0x2b0   : > { %v1471_v45 = vmul.f32 %v1439_v2, %v4947_v10  ;;  %v1623_v47 = vadd.f32 1.0, %v3734_v40  ;;  %v1654_v9 = vmul.f32 %v1622_v27, %v1398_v48  ;;  %3735 = vtanh.f32 %v1562_v3 }
 0x2b1   : > { %v1472_v26 = vmul.f32 %v1440_v38, %v4952_v30  ;;  %v1366_v34 = vpop.f32.mrb[24].mxu1  ;;  %v1656_v41 = vmul.f32 %v1624_v49, %v1400_v53  ;;  %v1502_v52 = vmul.f32 %v1470_v0, %v4941_v22  ;;  %3737 = vtanh.f32 %v1564_v36 }
 0x2b2   : > { %v4965_v23 = vadd.f32 %v1366_v34, %v4781_v18  ;;  %v1368_v12 = vpop.f32.mrb[25].mxu1  ;;  %v1655_v7 = vmul.f32 %v1623_v47, %v1399_v17  ;;  %v1561_v50 = vmul.f32 0.7978846, %v1529_v54  ;;  %v1563_v32 = vmul.f32 0.7978846, %v1531_v44 }
 0x2b3   : > { %v1504_v37 = vmul.f32 %v1472_v26, %v4952_v30  ;;  %v4969_v19 = vadd.f32 %v1368_v12, %v4785_v15  ;;  %v1370_v11 = vpop.f32.mrb[26].mxu1  ;;  %v1680_v28 = vpack.c.bf16 %v1656_v41, %v1654_v9  ;;  %v1501_v1 = vmul.f32 %v1469_v33, %v4936_v24 }
 0x2b4   : > { %v1441_v35 = vmul.f32 0.044715, %v4965_v23  ;;  %v4973_v58 = vadd.f32 %v1370_v11, %v4781_v18  ;;  %v1372_v62 = vpop.f32.mrb[27].mxu1  ;;  %v1679_v4 = vpack.c.bf16 %v1655_v7, %v1653_v61  ;;  %3739 = vtanh.f32 %v1561_v50 }
 0x2b5   : > { %v1442_v63 = vmul.f32 0.044715, %v4969_v19  ;;  %v4978_v31 = vadd.f32 %v1372_v62, %v4785_v15  ;;  %1880 = vmatprep.mubr.bf16.mxu0 %v1680_v28  ;;  %v1503_v13 = vmul.f32 %v1471_v45, %v4947_v10  ;;  %3741 = vtanh.f32 %v1563_v32 }
 0x2b6   : > { %v1473_v16 = vmul.f32 %v1441_v35, %v4965_v23  ;;  %v1443_v20 = vmul.f32 0.044715, %v4973_v58  ;;  %1881 = vmatmul.mubr.bf16.gmra.mrb[44].mxu0 %v1679_v4  ;;  %v1534_v48 = vadd.f32 %v1502_v52, %v4941_v22  ;;  %v1536_v21 = vadd.f32 %v1504_v37, %v4952_v30 }
 0x2b7   : > { %v1474_v59 = vmul.f32 %v1442_v63, %v4969_v19  ;;  %v1444_v25 = vmul.f32 0.044715, %v4978_v31  ;;  %v1402_v51 = vmul.f32 0.5, %v4915_v56  ;;  %v1404_v29 = vmul.f32 0.5, %v4923_v46 }
 0x2b8   : > { %v1401_v17 = vmul.f32 0.5, %v4912_v14  ;;  %v1505_v8 = vmul.f32 %v1473_v16, %v4965_v23  ;;  %v1403_v43 = vmul.f32 0.5, %v4919_v55  ;;  %v1566_v53 = vmul.f32 0.7978846, %v1534_v48 }
 0x2b9   : > { %v1376_v6 = vpop.f32.mrb[28].mxu1  ;;  %v1568_v5 = vmul.f32 0.7978846, %v1536_v21  ;;  %v1476_v57 = vmul.f32 %v1444_v25, %v4978_v31  ;;  %v1533_v3 = vadd.f32 %v1501_v1, %v4936_v24  ;;  %v1535_v56 = vadd.f32 %v1503_v13, %v4947_v10 }
 0x2ba   : > { %v4994_v60 = vadd.f32 %v1376_v6, %v4781_v18  ;;  %v1378_v39 = vpop.f32.mrb[29].mxu1  ;;  %v3736_v46 = vpop.eup %3735  ;;  %v1506_v14 = vmul.f32 %v1474_v59, %v4969_v19  ;;  %v1475_v42 = vmul.f32 %v1443_v20, %v4973_v58  ;;  %3743 = vtanh.f32 %v1566_v53 }
 0x2bb   : > { %v5001_v2 = vadd.f32 %v1378_v39, %v4785_v15  ;;  %v1380_v55 = vpop.f32.mrb[30].mxu1  ;;  %v3738_v27 = vpop.eup %3737  ;;  %v1626_v0 = vadd.f32 1.0, %v3736_v46  ;;  %3745 = vtanh.f32 %v1568_v5  ;;  %v1565_v33 = vmul.f32 0.7978846, %v1533_v3 }
 0x2bc   : > { %v1445_v54 = vmul.f32 0.044715, %v4994_v60  ;;  %v5005_v44 = vadd.f32 %v1380_v55, %v4781_v18  ;;  %v1382_v40 = vpop.f32.mrb[31].mxu1  ;;  %v1628_v36 = vadd.f32 1.0, %v3738_v27  ;;  %v1508_v45 = vmul.f32 %v1476_v57, %v4978_v31 }
 0x2bd   : > { %v1446_v38 = vmul.f32 0.044715, %v5001_v2  ;;  %v5009_v49 = vadd.f32 %v1382_v40, %v4785_v15  ;;  %v1658_v61 = vmul.f32 %v1626_v0, %v1402_v51  ;;  %v1567_v26 = vmul.f32 0.7978846, %v1535_v56 }
 0x2be   : > { %v1447_v47 = vmul.f32 0.044715, %v5005_v44  ;;  %v3740_v34 = vpop.eup %3739  ;;  %v1660_v41 = vmul.f32 %v1628_v36, %v1404_v29  ;;  %3747 = vtanh.f32 %v1565_v33  ;;  %v1507_v12 = vmul.f32 %v1475_v42, %v4973_v58 }
 0x2bf   : > { %v1478_v18 = vmul.f32 %v1446_v38, %v5001_v2  ;;  %v1448_v9 = vmul.f32 0.044715, %v5009_v49  ;;  %v3742_v52 = vpop.eup %3741  ;;  %v1477_v15 = vmul.f32 %v1445_v54, %v4994_v60  ;;  %v1625_v7 = vadd.f32 1.0, %v3740_v34 }
 0x2c0   : > { %3749 = vtanh.f32 %v1567_v26  ;;  %v1479_v37 = vmul.f32 %v1447_v47, %v5005_v44  ;;  %v1682_v28 = vpack.c.bf16 %v1660_v41, %v1658_v61  ;;  %v1627_v50 = vadd.f32 1.0, %v3742_v52 }
 0x2c1   : > { %v1480_v11 = vmul.f32 %v1448_v9, %v5009_v49  ;;  %v1510_v35 = vmul.f32 %v1478_v18, %v5001_v2  ;;  %v1406_v62 = vmul.f32 0.5, %v4941_v22  ;;  %v1538_v4 = vadd.f32 %v1506_v14, %v4969_v19 }
 0x2c2   : > { %1888 = vmatprep.mubr.bf16.mxu0 %v1682_v28  ;;  %v1657_v1 = vmul.f32 %v1625_v7, %v1401_v17  ;;  %v1659_v63 = vmul.f32 %v1627_v50, %v1403_v43  ;;  %v1540_v13 = vadd.f32 %v1508_v45, %v4978_v31  ;;  %v1408_v16 = vmul.f32 0.5, %v4952_v30 }
 0x2c3   : > { %v1512_v32 = vmul.f32 %v1480_v11, %v5009_v49  ;;  %v1570_v20 = vmul.f32 0.7978846, %v1538_v4  ;;  %v1537_v59 = vadd.f32 %v1505_v8, %v4965_v23  ;;  %v1539_v25 = vadd.f32 %v1507_v12, %v4973_v58 }
 0x2c4   : > { %v3744_v48 = vpop.eup %3743  ;;  %v1509_v21 = vmul.f32 %v1477_v15, %v4994_v60  ;;  %v1511_v22 = vmul.f32 %v1479_v37, %v5005_v44  ;;  %v1681_v51 = vpack.c.bf16 %v1659_v63, %v1657_v1  ;;  %v1572_v29 = vmul.f32 0.7978846, %v1540_v13 }
 0x2c5   : > { %v3746_v6 = vpop.eup %3745  ;;  %v1630_v53 = vadd.f32 1.0, %v3744_v48  ;;  %3751 = vtanh.f32 %v1570_v20  ;;  %v1569_v17 = vmul.f32 0.7978846, %v1537_v59  ;;  %v1571_v43 = vmul.f32 0.7978846, %v1539_v25 }
 0x2c6   : > { %1889 = vmatmul.mubr.bf16.gmra.mrb[48].mxu0 %v1681_v51  ;;  %v1632_v5 = vadd.f32 1.0, %v3746_v6  ;;  %3753 = vtanh.f32 %v1572_v29  ;;  %v1542_v30 = vadd.f32 %v1510_v35, %v5001_v2  ;;  %v1544_v8 = vadd.f32 %v1512_v32, %v5009_v49  ;;  %v3626_v6 = vld [vmem:[%s5241_s7 + $0x8] sm:$0xff]  }
 0x2c7   : > { %v1662_v57 = vmul.f32 %v1630_v53, %v1406_v62  ;;  %3755 = vtanh.f32 %v1569_v17  ;;  %v1405_v42 = vmul.f32 0.5, %v4936_v24  ;;  %v1541_v27 = vadd.f32 %v1509_v21, %v4994_v60  ;;  %v3629_v53 = vld [vmem:[%s5241_s7 + $0x20] sm:$0xff]   ;;  %v3630_v17 = vld [vmem:[%s5241_s7 + $0x28] sm:$0xff]  }
 0x2c8   : > { %v3748_v39 = vpop.eup %3747  ;;  %v1664_v3 = vmul.f32 %v1632_v5, %v1408_v16  ;;  %3757 = vtanh.f32 %v1571_v43  ;;  %v1574_v56 = vmul.f32 0.7978846, %v1542_v30  ;;  %v1576_v46 = vmul.f32 0.7978846, %v1544_v8  ;;  %v3631_v43 = vld [vmem:[%s5241_s7 + $0x30] sm:$0xff]   ;;  %v3632_v5 = vld [vmem:[%s5241_s7 + $0x38] sm:$0xff]  }
 0x2c9   : > { %v1629_v55 = vadd.f32 1.0, %v3748_v39  ;;  %v1543_v54 = vadd.f32 %v1511_v22, %v5005_v44  ;;  %v1407_v0 = vmul.f32 0.5, %v4947_v10  ;;  %v1573_v36 = vmul.f32 0.7978846, %v1541_v27  ;;  %v3633_v30 = vld [vmem:[%s5243_s9] sm:$0xff]  }
 0x2ca   : > { %v3750_v14 = vpop.eup %3749  ;;  %v1684_v40 = vpack.c.bf16 %v1664_v3, %v1662_v57  ;;  %3759 = vtanh.f32 %v1574_v56  ;;  %v1410_v9 = vmul.f32 0.5, %v4969_v19  ;;  %v1412_v10 = vmul.f32 0.5, %v4978_v31  ;;  %3398 = vmatprep.subr.bf16.mxu0 %v3633_v30  ;;  %v5070_v57 = vld [vmem:[#allocation7] ss:$0 sm:$0xff] }
 0x2cb   : > { %v1631_v38 = vadd.f32 1.0, %v3750_v14  ;;  %3761 = vtanh.f32 %v1576_v46  ;;  %v1575_v33 = vmul.f32 0.7978846, %v1543_v54  ;;  %v1661_v45 = vmul.f32 %v1629_v55, %v1405_v42  ;;  %3399 = vmatpush3.bf16.msra.mxu0 %v3633_v30 }
 0x2cc   : > { %1896 = vmatprep.mubr.bf16.mxu0 %v1684_v40  ;;  %3763 = vtanh.f32 %v1573_v36  ;;  %v1409_v12 = vmul.f32 0.5, %v4965_v23  ;;  %v1411_v11 = vmul.f32 0.5, %v4973_v58  ;;  %v1414_v19 = vmul.f32 0.5, %v5001_v2 }
 0x2cd   : > { %v1663_v47 = vmul.f32 %v1631_v38, %v1407_v0  ;;  %3765 = vtanh.f32 %v1575_v33  ;;  %v1416_v31 = vmul.f32 0.5, %v5009_v49  ;;  %v1413_v58 = vmul.f32 0.5, %v4994_v60  ;;  %v3625_v49 = vld [vmem:[%s5241_s7] sm:$0xff]   ;;  %v3627_v60 = vld [vmem:[%s5241_s7 + $0x10] sm:$0xff]  }
 0x2ce   : > { %v1415_v48 = vmul.f32 0.5, %v5005_v44  ;;  %3366 = vmatprep.subr.bf16.mxu1 %v3625_v49  ;;  %v3628_v44 = vld [vmem:[%s5241_s7 + $0x18] sm:$0xff]  }
 0x2cf   : > { %v1683_v61 = vpack.c.bf16 %v1663_v47, %v1661_v45  ;;  %v3752_v24 = vpop.eup %3751  ;;  %3367 = vmatpush3.bf16.msra.mxu1 %v3625_v49 }
 0x2d0   : > { %v3754_v26 = vpop.eup %3753  ;;  %v1634_v34 = vadd.f32 1.0, %v3752_v24  ;;  %3368 = vmatprep.subr.bf16.mxu1 %v3626_v6 }
 0x2d1   : > { %1897 = vmatmul.mubr.bf16.gmra.mrb[52].mxu0 %v1683_v61  ;;  %v3756_v18 = vpop.eup %3755  ;;  %v1636_v41 = vadd.f32 1.0, %v3754_v26 }
 0x2d2   : > { %v3758_v52 = vpop.eup %3757  ;;  %v1633_v15 = vadd.f32 1.0, %v3756_v18  ;;  %v1666_v7 = vmul.f32 %v1634_v34, %v1410_v9 }
 0x2d3   : > { %v1668_v37 = vmul.f32 %v1636_v41, %v1412_v10  ;;  %v1635_v28 = vadd.f32 1.0, %v3758_v52  ;;  %3369 = vmatpush3.bf16.msra.mxu1 %v3626_v6 }
 0x2d4   : > { %v3760_v50 = vpop.eup %3759  ;;  %v1665_v4 = vmul.f32 %v1633_v15, %v1409_v12  ;;  %3370 = vmatprep.subr.bf16.mxu1 %v3627_v60 }
 0x2d5   : > { %v3762_v35 = vpop.eup %3761  ;;  %v1686_v62 = vpack.c.bf16 %v1668_v37, %v1666_v7  ;;  %v1667_v32 = vmul.f32 %v1635_v28, %v1411_v11  ;;  %v1638_v1 = vadd.f32 1.0, %v3760_v50 }
 0x2d6   : > { %v1640_v63 = vadd.f32 1.0, %v3762_v35  ;;  %v3764_v13 = vpop.eup %3763 }
 0x2d7   : > { %1904 = vmatprep.mubr.bf16.mxu0 %v1686_v62  ;;  %v1685_v23 = vpack.c.bf16 %v1667_v32, %v1665_v4  ;;  %v3766_v16 = vpop.eup %3765  ;;  %v1670_v20 = vmul.f32 %v1638_v1, %v1414_v19  ;;  %v1637_v25 = vadd.f32 1.0, %v3764_v13  ;;  %3371 = vmatpush3.bf16.msra.mxu1 %v3627_v60 }
 0x2d8   : > { %v1672_v59 = vmul.f32 %v1640_v63, %v1416_v31  ;;  %v1639_v21 = vadd.f32 1.0, %v3766_v16  ;;  %3372 = vmatprep.subr.bf16.mxu1 %v3628_v44 }
 0x2d9   : > { %1905 = vmatmul.mubr.bf16.gmra.mrb[56].mxu0 %v1685_v23  ;;  %v1669_v51 = vmul.f32 %v1637_v25, %v1413_v58 }
 0x2da   : > { %v1688_v22 = vpack.c.bf16 %v1672_v59, %v1670_v20  ;;  %v1671_v29 = vmul.f32 %v1639_v21, %v1415_v48 }
 0x2db   : > { %3373 = vmatpush3.bf16.msra.mxu1 %v3628_v44 }
 0x2dc   : > { %1912 = vmatprep.mubr.bf16.mxu0 %v1688_v22  ;;  %v1687_v2 = vpack.c.bf16 %v1671_v29, %v1669_v51  ;;  %3374 = vmatprep.subr.bf16.mxu1 %v3629_v53 }
 0x2df   : > { %3375 = vmatpush3.bf16.msra.mxu1 %v3629_v53 }
 0x2e0   : > { %3376 = vmatprep.subr.bf16.mxu1 %v3630_v17 }
 0x2e1   : > { %1913 = vmatmul.mubr.bf16.gmra.mrb[60].mxu0 %v1687_v2 }
 0x2e3   : > { %3377 = vmatpush3.bf16.msra.mxu1 %v3630_v17 }
 0x2e4   : > { %3378 = vmatprep.subr.bf16.mxu1 %v3631_v43 }
 0x2e7   : > { %3379 = vmatpush3.bf16.msra.mxu1 %v3631_v43 }
 0x2e8   : > { %3380 = vmatprep.subr.bf16.mxu1 %v3632_v5 }
 0x2eb   : > { %3381 = vmatpush3.bf16.msra.mxu1 %v3632_v5 }
 0x366   : > { %v3280_v8 = vpop.f32.mrb[32].mxu0 }
 0x367   : > { %v3281_v39 = vpop.f32.mrb[33].mxu0 }
 0x368   : > { %v3282_v3 = vadd.f32 %v3281_v39, %v3280_v8  ;;  %v3283_v56 = vpop.f32.mrb[34].mxu0 }
 0x369   : > { %v3284_v46 = vpop.f32.mrb[35].mxu0 }
 0x36a   : > { %v1859_v14 = vadd.f32 %v3282_v3, %v5070_v57  ;;  %v3285_v42 = vadd.f32 %v3284_v46, %v3283_v56 }
 0x36c   : > { %v1937_v55 = vmul.f32 0.044715, %v1859_v14  ;;  %v1862_v27 = vadd.f32 %v3285_v42, %v5070_v57  ;;  %v1921_v16 = vmul.f32 0.5, %v1859_v14 }
 0x36e   : > { %v1953_v54 = vmul.f32 %v1937_v55, %v1859_v14  ;;  %v1938_v40 = vmul.f32 0.044715, %v1862_v27  ;;  %v3286_v0 = vpop.f32.mrb[36].mxu0  ;;  %v1922_v58 = vmul.f32 0.5, %v1862_v27 }
 0x36f   : > { %v3287_v38 = vpop.f32.mrb[37].mxu0 }
 0x370   : > { %v1954_v36 = vmul.f32 %v1938_v40, %v1862_v27  ;;  %v3288_v33 = vadd.f32 %v3287_v38, %v3286_v0  ;;  %v3289_v45 = vpop.f32.mrb[38].mxu0  ;;  %v1969_v47 = vmul.f32 %v1953_v54, %v1859_v14 }
 0x371   : > { %v3290_v61 = vpop.f32.mrb[39].mxu0 }
 0x372   : > { %v1867_v24 = vadd.f32 %v3288_v33, %v5070_v57  ;;  %v3291_v26 = vadd.f32 %v3290_v61, %v3289_v45  ;;  %v1970_v34 = vmul.f32 %v1954_v36, %v1862_v27  ;;  %v1985_v18 = vadd.f32 %v1969_v47, %v1859_v14 }
 0x374   : > { %v1939_v9 = vmul.f32 0.044715, %v1867_v24  ;;  %v1870_v10 = vadd.f32 %v3291_v26, %v5070_v57  ;;  %v1986_v41 = vadd.f32 %v1970_v34, %v1862_v27  ;;  %v2001_v52 = vmul.f32 0.7978846, %v1985_v18 }
 0x375   : > { %v1923_v5 = vmul.f32 0.5, %v1867_v24 }
 0x376   : > { %v1955_v12 = vmul.f32 %v1939_v9, %v1867_v24  ;;  %v1940_v15 = vmul.f32 0.044715, %v1870_v10  ;;  %v2002_v7 = vmul.f32 0.7978846, %v1986_v41  ;;  %3767 = vtanh.f32 %v2001_v52 }
 0x377   : > { %v1924_v30 = vmul.f32 0.5, %v1870_v10 }
 0x378   : > { %v1971_v37 = vmul.f32 %v1955_v12, %v1867_v24  ;;  %v1956_v11 = vmul.f32 %v1940_v15, %v1870_v10  ;;  %3769 = vtanh.f32 %v2002_v7 }
 0x37a   : > { %v1987_v28 = vadd.f32 %v1971_v37, %v1867_v24  ;;  %v1972_v50 = vmul.f32 %v1956_v11, %v1870_v10 }
 0x37c   : > { %v2003_v35 = vmul.f32 0.7978846, %v1987_v28  ;;  %v1988_v62 = vadd.f32 %v1972_v50, %v1870_v10 }
 0x37d   : > { %v3292_v32 = vpop.f32.mrb[40].mxu0 }
 0x37e   : > { %3771 = vtanh.f32 %v2003_v35  ;;  %v2004_v4 = vmul.f32 0.7978846, %v1988_v62  ;;  %v3293_v1 = vpop.f32.mrb[41].mxu0 }
 0x37f   : > { %v3294_v31 = vadd.f32 %v3293_v1, %v3292_v32  ;;  %v3295_v63 = vpop.f32.mrb[42].mxu0 }
 0x380   : > { %3773 = vtanh.f32 %v2004_v4  ;;  %v3768_v19 = vpop.eup %3767  ;;  %v3296_v23 = vpop.f32.mrb[43].mxu0 }
 0x381   : > { %v2033_v20 = vadd.f32 1.0, %v3768_v19  ;;  %v1875_v59 = vadd.f32 %v3294_v31, %v5070_v57  ;;  %v3297_v25 = vadd.f32 %v3296_v23, %v3295_v63 }
 0x382   : > { %v3770_v13 = vpop.eup %3769 }
 0x383   : > { %v2034_v48 = vadd.f32 1.0, %v3770_v13  ;;  %v1941_v21 = vmul.f32 0.044715, %v1875_v59  ;;  %v1878_v22 = vadd.f32 %v3297_v25, %v5070_v57  ;;  %v2049_v51 = vmul.f32 %v2033_v20, %v1921_v16 }
 0x384   : > { %v1925_v28 = vmul.f32 0.5, %v1875_v59 }
 0x385   : > { %v2050_v29 = vmul.f32 %v2034_v48, %v1922_v58  ;;  %v1957_v2 = vmul.f32 %v1941_v21, %v1875_v59  ;;  %v1942_v49 = vmul.f32 0.044715, %v1878_v22  ;;  %v1926_v50 = vmul.f32 0.5, %v1878_v22 }
 0x387   : > { %v2065_v6 = vpack.c.bf16 %v2050_v29, %v2049_v51  ;;  %v1958_v44 = vmul.f32 %v1942_v49, %v1878_v22  ;;  %v1973_v17 = vmul.f32 %v1957_v2, %v1875_v59 }
 0x388   : > { %v3772_v60 = vpop.eup %3771 }
 0x389   : > { %3382 = vmatprep.mubr.bf16.mxu1 %v2065_v6  ;;  %v2035_v53 = vadd.f32 1.0, %v3772_v60  ;;  %v3298_v8 = vpop.f32.mrb[44].mxu0  ;;  %v1974_v3 = vmul.f32 %v1958_v44, %v1878_v22  ;;  %v1989_v56 = vadd.f32 %v1973_v17, %v1875_v59 }
 0x38a   : > { %v3774_v43 = vpop.eup %3773  ;;  %v3299_v46 = vpop.f32.mrb[45].mxu0 }
 0x38b   : > { %v2036_v39 = vadd.f32 1.0, %v3774_v43  ;;  %v2051_v14 = vmul.f32 %v2035_v53, %v1923_v5  ;;  %v3300_v42 = vadd.f32 %v3299_v46, %v3298_v8  ;;  %v3301_v55 = vpop.f32.mrb[46].mxu0  ;;  %v1990_v54 = vadd.f32 %v1974_v3, %v1878_v22 }
 0x38c   : > { %v2005_v40 = vmul.f32 0.7978846, %v1989_v56  ;;  %v3302_v0 = vpop.f32.mrb[47].mxu0 }
 0x38d   : > { %v2052_v27 = vmul.f32 %v2036_v39, %v1924_v30  ;;  %v1883_v38 = vadd.f32 %v3300_v42, %v5070_v57  ;;  %v3303_v36 = vadd.f32 %v3302_v0, %v3301_v55  ;;  %v2006_v45 = vmul.f32 0.7978846, %v1990_v54 }
 0x38e   : > { %3775 = vtanh.f32 %v2005_v40 }
 0x38f   : > { %v2066_v33 = vpack.c.bf16 %v2052_v27, %v2051_v14  ;;  %v1943_v47 = vmul.f32 0.044715, %v1883_v38  ;;  %v1886_v61 = vadd.f32 %v3303_v36, %v5070_v57  ;;  %3777 = vtanh.f32 %v2006_v45 }
 0x390   : > { %v1927_v49 = vmul.f32 0.5, %v1883_v38 }
 0x391   : > { %3383 = vmatmul.mubr.bf16.vlgmr.msra.gmra.mrb[32].mxu1 %v2066_v33  ;;  %v1959_v24 = vmul.f32 %v1943_v47, %v1883_v38  ;;  %v1944_v26 = vmul.f32 0.044715, %v1886_v61  ;;  %v1928_v44 = vmul.f32 0.5, %v1886_v61 }
 0x393   : > { %v1960_v34 = vmul.f32 %v1944_v26, %v1886_v61  ;;  %v1975_v18 = vmul.f32 %v1959_v24, %v1883_v38 }
 0x395   : > { %v1976_v9 = vmul.f32 %v1960_v34, %v1886_v61  ;;  %v1991_v10 = vadd.f32 %v1975_v18, %v1883_v38 }
 0x397   : > { %v1992_v41 = vadd.f32 %v1976_v9, %v1886_v61  ;;  %v2007_v52 = vmul.f32 0.7978846, %v1991_v10 }
 0x398   : > { %v3776_v12 = vpop.eup %3775 }
 0x399   : > { %v3778_v15 = vpop.eup %3777  ;;  %v2037_v7 = vadd.f32 1.0, %v3776_v12  ;;  %v2008_v37 = vmul.f32 0.7978846, %v1992_v41  ;;  %3779 = vtanh.f32 %v2007_v52  ;;  %v3304_v11 = vpop.f32.mrb[48].mxu0 }
 0x39a   : > { %v2038_v35 = vadd.f32 1.0, %v3778_v15  ;;  %v3305_v62 = vpop.f32.mrb[49].mxu0 }
 0x39b   : > { %3781 = vtanh.f32 %v2008_v37  ;;  %v3306_v4 = vadd.f32 %v3305_v62, %v3304_v11  ;;  %v3307_v32 = vpop.f32.mrb[50].mxu0  ;;  %v2053_v1 = vmul.f32 %v2037_v7, %v1925_v28 }
 0x39c   : > { %v2054_v19 = vmul.f32 %v2038_v35, %v1926_v50  ;;  %v3308_v31 = vpop.f32.mrb[51].mxu0 }
 0x39d   : > { %v1891_v63 = vadd.f32 %v3306_v4, %v5070_v57  ;;  %v3309_v13 = vadd.f32 %v3308_v31, %v3307_v32 }
 0x39e   : > { %v2067_v23 = vpack.c.bf16 %v2054_v19, %v2053_v1 }
 0x39f   : > { %v1945_v16 = vmul.f32 0.044715, %v1891_v63  ;;  %v1894_v20 = vadd.f32 %v3309_v13, %v5070_v57  ;;  %v1929_v35 = vmul.f32 0.5, %v1891_v63 }
 0x3a0   : > { %3386 = vmatprep.mubr.bf16.mxu1 %v2067_v23 }
 0x3a1   : > { %v1961_v25 = vmul.f32 %v1945_v16, %v1891_v63  ;;  %v1946_v58 = vmul.f32 0.044715, %v1894_v20  ;;  %v1930_v62 = vmul.f32 0.5, %v1894_v20 }
 0x3a3   : > { %v3780_v59 = vpop.eup %3779  ;;  %v1962_v48 = vmul.f32 %v1946_v58, %v1894_v20  ;;  %v1977_v51 = vmul.f32 %v1961_v25, %v1891_v63 }
 0x3a4   : > { %v3310_v21 = vpop.f32.mrb[52].mxu0  ;;  %v2039_v22 = vadd.f32 1.0, %v3780_v59 }
 0x3a5   : > { %v3782_v29 = vpop.eup %3781  ;;  %v3311_v2 = vpop.f32.mrb[53].mxu0  ;;  %v1978_v17 = vmul.f32 %v1962_v48, %v1894_v20  ;;  %v1993_v30 = vadd.f32 %v1977_v51, %v1891_v63 }
 0x3a6   : > { %v3312_v6 = vadd.f32 %v3311_v2, %v3310_v21  ;;  %v3313_v60 = vpop.f32.mrb[54].mxu0  ;;  %v2040_v53 = vadd.f32 1.0, %v3782_v29  ;;  %v2055_v5 = vmul.f32 %v2039_v22, %v1927_v49 }
 0x3a7   : > { %v3314_v43 = vpop.f32.mrb[55].mxu0  ;;  %v1994_v56 = vadd.f32 %v1978_v17, %v1894_v20  ;;  %v2009_v46 = vmul.f32 0.7978846, %v1993_v30 }
 0x3a8   : > { %v5083_v8 = vadd.f32 %v3312_v6, %v5070_v57  ;;  %v3315_v39 = vadd.f32 %v3314_v43, %v3313_v60  ;;  %v2056_v3 = vmul.f32 %v2040_v53, %v1928_v44 }
 0x3a9   : > { %v2010_v27 = vmul.f32 0.7978846, %v1994_v56  ;;  %3783 = vtanh.f32 %v2009_v46 }
 0x3aa   : > { %v1947_v14 = vmul.f32 0.044715, %v5083_v8  ;;  %v5087_v42 = vadd.f32 %v3315_v39, %v5070_v57  ;;  %v2068_v55 = vpack.c.bf16 %v2056_v3, %v2055_v5  ;;  %v1931_v5 = vmul.f32 0.5, %v5083_v8 }
 0x3ab   : > { %3785 = vtanh.f32 %v2010_v27 }
 0x3ac   : > { %v1963_v54 = vmul.f32 %v1947_v14, %v5083_v8  ;;  %v1948_v40 = vmul.f32 0.044715, %v5087_v42  ;;  %3387 = vmatmul.mubr.bf16.gmra.mrb[36].mxu1 %v2068_v55  ;;  %v3316_v0 = vpop.f32.mrb[56].mxu0  ;;  %v1932_v30 = vmul.f32 0.5, %v5087_v42 }
 0x3ad   : > { %v3317_v36 = vpop.f32.mrb[57].mxu0 }
 0x3ae   : > { %v1964_v38 = vmul.f32 %v1948_v40, %v5087_v42  ;;  %v1979_v33 = vmul.f32 %v1963_v54, %v5083_v8  ;;  %v3318_v45 = vadd.f32 %v3317_v36, %v3316_v0  ;;  %v3319_v47 = vpop.f32.mrb[58].mxu0 }
 0x3af   : > { %v3320_v61 = vpop.f32.mrb[59].mxu0 }
 0x3b0   : > { %v1980_v24 = vmul.f32 %v1964_v38, %v5087_v42  ;;  %v1995_v26 = vadd.f32 %v1979_v33, %v5083_v8  ;;  %v1907_v34 = vadd.f32 %v3318_v45, %v5070_v57  ;;  %v3321_v18 = vadd.f32 %v3320_v61, %v3319_v47 }
 0x3b2   : > { %v1996_v9 = vadd.f32 %v1980_v24, %v5087_v42  ;;  %v2011_v10 = vmul.f32 0.7978846, %v1995_v26  ;;  %v1949_v41 = vmul.f32 0.044715, %v1907_v34  ;;  %v1910_v52 = vadd.f32 %v3321_v18, %v5070_v57 }
 0x3b3   : > { %v3784_v15 = vpop.eup %3783  ;;  %v1933_v36 = vmul.f32 0.5, %v1907_v34 }
 0x3b4   : > { %v2012_v12 = vmul.f32 0.7978846, %v1996_v9  ;;  %3787 = vtanh.f32 %v2011_v10  ;;  %v1965_v7 = vmul.f32 %v1949_v41, %v1907_v34  ;;  %v1950_v37 = vmul.f32 0.044715, %v1910_v52  ;;  %v3322_v11 = vpop.f32.mrb[60].mxu0 }
 0x3b5   : > { %v3786_v28 = vpop.eup %3785  ;;  %v3323_v50 = vpop.f32.mrb[61].mxu0  ;;  %v2041_v4 = vadd.f32 1.0, %v3784_v15  ;;  %v1934_v33 = vmul.f32 0.5, %v1910_v52 }
 0x3b6   : > { %3789 = vtanh.f32 %v2012_v12  ;;  %v1966_v32 = vmul.f32 %v1950_v37, %v1910_v52  ;;  %v3324_v1 = vadd.f32 %v3323_v50, %v3322_v11  ;;  %v3325_v19 = vpop.f32.mrb[62].mxu0  ;;  %v2042_v31 = vadd.f32 1.0, %v3786_v28  ;;  %v5111_v37 = vld [vmem:[#allocation8] ss:$0 sm:$0xff] }
 0x3b7   : > { %v1981_v13 = vmul.f32 %v1965_v7, %v1907_v34  ;;  %v3326_v23 = vpop.f32.mrb[63].mxu0  ;;  %v2057_v16 = vmul.f32 %v2041_v4, %v1929_v35  ;;  %v3636_v7 = vld [vmem:[%s5243_s9 + $0x18] sm:$0xff]  }
 0x3b8   : > { %v1915_v25 = vadd.f32 %v3324_v1, %v5070_v57  ;;  %v3327_v58 = vadd.f32 %v3326_v23, %v3325_v19  ;;  %v2058_v59 = vmul.f32 %v2042_v31, %v1930_v62  ;;  %v1982_v48 = vmul.f32 %v1966_v32, %v1910_v52 }
 0x3b9   : > { %v1997_v21 = vadd.f32 %v1981_v13, %v1907_v34  ;;  %v3634_v34 = vld [vmem:[%s5243_s9 + $0x8] sm:$0xff]  }
 0x3ba   : > { %v1951_v22 = vmul.f32 0.044715, %v1915_v25  ;;  %v1918_v51 = vadd.f32 %v3327_v58, %v5070_v57  ;;  %v2069_v63 = vpack.c.bf16 %v2058_v59, %v2057_v16  ;;  %v1998_v20 = vadd.f32 %v1982_v48, %v1910_v52  ;;  %3400 = vmatprep.subr.bf16.mxu0 %v3634_v34  ;;  %v3635_v52 = vld [vmem:[%s5243_s9 + $0x10] sm:$0xff]  }
 0x3bb   : > { %v2013_v29 = vmul.f32 0.7978846, %v1997_v21  ;;  %v1935_v18 = vmul.f32 0.5, %v1915_v25  ;;  %3401 = vmatpush3.bf16.msra.mxu0 %v3634_v34 }
 0x3bc   : > { %v1967_v2 = vmul.f32 %v1951_v22, %v1915_v25  ;;  %v1952_v49 = vmul.f32 0.044715, %v1918_v51  ;;  %3390 = vmatprep.mubr.bf16.mxu1 %v2069_v63  ;;  %v2014_v6 = vmul.f32 0.7978846, %v1998_v20  ;;  %v1936_v9 = vmul.f32 0.5, %v1918_v51  ;;  %3402 = vmatprep.subr.bf16.mxu0 %v3635_v52 }
 0x3bd   : > { %3791 = vtanh.f32 %v2013_v29 }
 0x3be   : > { %v3788_v60 = vpop.eup %3787  ;;  %v1968_v44 = vmul.f32 %v1952_v49, %v1918_v51  ;;  %3793 = vtanh.f32 %v2014_v6  ;;  %v1983_v17 = vmul.f32 %v1967_v2, %v1915_v25 }
 0x3bf   : > { %v2043_v53 = vadd.f32 1.0, %v3788_v60  ;;  %3403 = vmatpush3.bf16.msra.mxu0 %v3635_v52 }
 0x3c0   : > { %v3790_v43 = vpop.eup %3789  ;;  %v1984_v57 = vmul.f32 %v1968_v44, %v1918_v51  ;;  %v1999_v3 = vadd.f32 %v1983_v17, %v1915_v25  ;;  %3404 = vmatprep.subr.bf16.mxu0 %v3636_v7 }
 0x3c1   : > { %v2044_v39 = vadd.f32 1.0, %v3790_v43  ;;  %v2059_v56 = vmul.f32 %v2043_v53, %v1931_v5 }
 0x3c2   : > { %v2000_v14 = vadd.f32 %v1984_v57, %v1918_v51  ;;  %v2015_v55 = vmul.f32 0.7978846, %v1999_v3 }
 0x3c3   : > { %v2060_v46 = vmul.f32 %v2044_v39, %v1932_v30  ;;  %3405 = vmatpush3.bf16.msra.mxu0 %v3636_v7 }
 0x3c4   : > { %v2016_v54 = vmul.f32 0.7978846, %v2000_v14  ;;  %3795 = vtanh.f32 %v2015_v55 }
 0x3c5   : > { %v2070_v27 = vpack.c.bf16 %v2060_v46, %v2059_v56 }
 0x3c6   : > { %3797 = vtanh.f32 %v2016_v54 }
 0x3c7   : > { %3391 = vmatmul.mubr.bf16.gmra.mrb[40].mxu1 %v2070_v27  ;;  %v3792_v40 = vpop.eup %3791 }
 0x3c8   : > { %v3794_v0 = vpop.eup %3793  ;;  %v2045_v38 = vadd.f32 1.0, %v3792_v40 }
 0x3c9   : > { %v2046_v8 = vadd.f32 1.0, %v3794_v0 }
 0x3ca   : > { %v2061_v45 = vmul.f32 %v2045_v38, %v1933_v36 }
 0x3cb   : > { %v2062_v42 = vmul.f32 %v2046_v8, %v1934_v33 }
 0x3cd   : > { %v2071_v47 = vpack.c.bf16 %v2062_v42, %v2061_v45 }
 0x3ce   : > { %v3796_v61 = vpop.eup %3795 }
 0x3cf   : > { %3394 = vmatprep.mubr.bf16.mxu1 %v2071_v47  ;;  %v2047_v24 = vadd.f32 1.0, %v3796_v61 }
 0x3d0   : > { %v3798_v26 = vpop.eup %3797 }
 0x3d1   : > { %v2048_v10 = vadd.f32 1.0, %v3798_v26  ;;  %v2063_v41 = vmul.f32 %v2047_v24, %v1935_v18 }
 0x3d3   : > { %v2064_v12 = vmul.f32 %v2048_v10, %v1936_v9 }
 0x3d5   : > { %v2072_v15 = vpack.c.bf16 %v2064_v12, %v2063_v41 }
 0x3d7   : > { %3395 = vmatmul.mubr.bf16.gmra.mrb[44].mxu1 %v2072_v15 }
 0x464   : > { %v3384_v11 = vpop.f32.mrb[32].mxu1 }
 0x465   : > { %v2187_v28 = vadd.f32 %v3384_v11, %v5111_v37  ;;  %v2178_v50 = vpop.f32.mrb[33].mxu1 }
 0x466   : > { %v2179_v35 = vadd.f32 %v5111_v37, %v2178_v50  ;;  %v3385_v62 = vpop.f32.mrb[34].mxu1 }
 0x467   : > { %v2259_v4 = vmul.f32 0.044715, %v2187_v28  ;;  %v2190_v32 = vadd.f32 %v3385_v62, %v5111_v37  ;;  %v2181_v1 = vpop.f32.mrb[35].mxu1  ;;  %v2243_v57 = vmul.f32 0.5, %v2187_v28 }
 0x468   : > { %v2257_v19 = vmul.f32 0.044715, %v2179_v35  ;;  %v2182_v31 = vadd.f32 %v5111_v37, %v2181_v1  ;;  %v2241_v46 = vmul.f32 0.5, %v2179_v35 }
 0x469   : > { %v2275_v13 = vmul.f32 %v2259_v4, %v2187_v28  ;;  %v2260_v23 = vmul.f32 0.044715, %v2190_v32  ;;  %v2244_v3 = vmul.f32 0.5, %v2190_v32 }
 0x46a   : > { %v2273_v16 = vmul.f32 %v2257_v19, %v2179_v35  ;;  %v2258_v25 = vmul.f32 0.044715, %v2182_v31  ;;  %v2242_v14 = vmul.f32 0.5, %v2182_v31 }
 0x46b   : > { %v2291_v58 = vmul.f32 %v2275_v13, %v2187_v28  ;;  %v2276_v59 = vmul.f32 %v2260_v23, %v2190_v32 }
 0x46c   : > { %v2289_v48 = vmul.f32 %v2273_v16, %v2179_v35  ;;  %v2274_v21 = vmul.f32 %v2258_v25, %v2182_v31 }
 0x46d   : > { %v2307_v22 = vadd.f32 %v2291_v58, %v2187_v28  ;;  %v2292_v51 = vmul.f32 %v2276_v59, %v2190_v32 }
 0x46e   : > { %v2305_v63 = vadd.f32 %v2289_v48, %v2179_v35  ;;  %v2290_v20 = vmul.f32 %v2274_v21, %v2182_v31 }
 0x46f   : > { %v2323_v29 = vmul.f32 0.7978846, %v2307_v22  ;;  %v2308_v2 = vadd.f32 %v2292_v51, %v2190_v32 }
 0x470   : > { %v2321_v49 = vmul.f32 0.7978846, %v2305_v63  ;;  %v2306_v6 = vadd.f32 %v2290_v20, %v2182_v31 }
 0x471   : > { %3799 = vtanh.f32 %v2323_v29  ;;  %v2324_v60 = vmul.f32 0.7978846, %v2308_v2 }
 0x472   : > { %3801 = vtanh.f32 %v2321_v49  ;;  %v2322_v44 = vmul.f32 0.7978846, %v2306_v6 }
 0x473   : > { %3803 = vtanh.f32 %v2324_v60 }
 0x474   : > { %3805 = vtanh.f32 %v2322_v44 }
 0x47b   : > { %v3800_v53 = vpop.eup %3799 }
 0x47c   : > { %v3802_v17 = vpop.eup %3801  ;;  %v2355_v43 = vadd.f32 1.0, %v3800_v53 }
 0x47d   : > { %v3804_v5 = vpop.eup %3803  ;;  %v2353_v30 = vadd.f32 1.0, %v3802_v17 }
 0x47e   : > { %v3806_v39 = vpop.eup %3805  ;;  %v2356_v56 = vadd.f32 1.0, %v3804_v5  ;;  %v2371_v27 = vmul.f32 %v2355_v43, %v2243_v57 }
 0x47f   : > { %v2354_v55 = vadd.f32 1.0, %v3806_v39  ;;  %v3388_v40 = vpop.f32.mrb[36].mxu1  ;;  %v2369_v0 = vmul.f32 %v2353_v30, %v2241_v46 }
 0x480   : > { %v2372_v54 = vmul.f32 %v2356_v56, %v2244_v3  ;;  %v2203_v33 = vadd.f32 %v3388_v40, %v5111_v37  ;;  %v2194_v8 = vpop.f32.mrb[37].mxu1 }
 0x481   : > { %v2370_v38 = vmul.f32 %v2354_v55, %v2242_v14  ;;  %v2195_v45 = vadd.f32 %v5111_v37, %v2194_v8  ;;  %v3389_v42 = vpop.f32.mrb[38].mxu1 }
 0x482   : > { %v2386_v36 = vpack.c.bf16 %v2372_v54, %v2371_v27  ;;  %v2263_v61 = vmul.f32 0.044715, %v2203_v33  ;;  %v2206_v24 = vadd.f32 %v3389_v42, %v5111_v37  ;;  %v2197_v26 = vpop.f32.mrb[39].mxu1  ;;  %v2247_v21 = vmul.f32 0.5, %v2203_v33 }
 0x483   : > { %v2385_v47 = vpack.c.bf16 %v2370_v38, %v2369_v0  ;;  %v2261_v18 = vmul.f32 0.044715, %v2195_v45  ;;  %v2198_v9 = vadd.f32 %v5111_v37, %v2197_v26  ;;  %v2245_v20 = vmul.f32 0.5, %v2195_v45 }
 0x484   : > { %v2279_v10 = vmul.f32 %v2263_v61, %v2203_v33  ;;  %v2264_v41 = vmul.f32 0.044715, %v2206_v24  ;;  %v2248_v22 = vmul.f32 0.5, %v2206_v24 }
 0x485   : > { %3406 = vmatprep.mubr.msk.bf16.mxu0 %vm626_vm0, %v2385_v47  ;;  %v2277_v12 = vmul.f32 %v2261_v18, %v2195_v45  ;;  %v2262_v15 = vmul.f32 0.044715, %v2198_v9  ;;  %v2246_v29 = vmul.f32 0.5, %v2198_v9 }
 0x486   : > { %3407 = vmatmul.mubr.msk.bf16.vlgmr.msra.gmra.mrb[64].mxu0 %vm626_vm0, %v2386_v36  ;;  %v2295_v34 = vmul.f32 %v2279_v10, %v2203_v33  ;;  %v2280_v52 = vmul.f32 %v2264_v41, %v2206_v24 }
 0x487   : > { %v2293_v7 = vmul.f32 %v2277_v12, %v2195_v45  ;;  %v2278_v11 = vmul.f32 %v2262_v15, %v2198_v9 }
 0x488   : > { %v2311_v28 = vadd.f32 %v2295_v34, %v2203_v33  ;;  %v2296_v50 = vmul.f32 %v2280_v52, %v2206_v24 }
 0x489   : > { %v2309_v35 = vadd.f32 %v2293_v7, %v2195_v45  ;;  %v2294_v62 = vmul.f32 %v2278_v11, %v2198_v9 }
 0x48a   : > { %v2327_v4 = vmul.f32 0.7978846, %v2311_v28  ;;  %v2312_v32 = vadd.f32 %v2296_v50, %v2206_v24 }
 0x48b   : > { %v2325_v1 = vmul.f32 0.7978846, %v2309_v35  ;;  %v2310_v19 = vadd.f32 %v2294_v62, %v2198_v9 }
 0x48c   : > { %3807 = vtanh.f32 %v2327_v4  ;;  %v2328_v31 = vmul.f32 0.7978846, %v2312_v32 }
 0x48d   : > { %3809 = vtanh.f32 %v2325_v1  ;;  %v2326_v13 = vmul.f32 0.7978846, %v2310_v19 }
 0x48e   : > { %3811 = vtanh.f32 %v2328_v31 }
 0x48f   : > { %3813 = vtanh.f32 %v2326_v13 }
 0x496   : > { %v3808_v23 = vpop.eup %3807 }
 0x497   : > { %v3810_v16 = vpop.eup %3809  ;;  %v2359_v25 = vadd.f32 1.0, %v3808_v23 }
 0x498   : > { %v3812_v58 = vpop.eup %3811  ;;  %v2357_v59 = vadd.f32 1.0, %v3810_v16 }
 0x499   : > { %v3814_v48 = vpop.eup %3813  ;;  %v2360_v51 = vadd.f32 1.0, %v3812_v58  ;;  %v2375_v60 = vmul.f32 %v2359_v25, %v2247_v21 }
 0x49a   : > { %v3392_v63 = vpop.f32.mrb[40].mxu1  ;;  %v2358_v2 = vadd.f32 1.0, %v3814_v48  ;;  %v2373_v43 = vmul.f32 %v2357_v59, %v2245_v20 }
 0x49b   : > { %v2219_v49 = vadd.f32 %v3392_v63, %v5111_v37  ;;  %v2210_v6 = vpop.f32.mrb[41].mxu1  ;;  %v2376_v44 = vmul.f32 %v2360_v51, %v2248_v22 }
 0x49c   : > { %v2211_v53 = vadd.f32 %v5111_v37, %v2210_v6  ;;  %v3393_v17 = vpop.f32.mrb[42].mxu1  ;;  %v2374_v5 = vmul.f32 %v2358_v2, %v2246_v29 }
 0x49d   : > { %v2267_v30 = vmul.f32 0.044715, %v2219_v49  ;;  %v2222_v39 = vadd.f32 %v3393_v17, %v5111_v37  ;;  %v2213_v57 = vpop.f32.mrb[43].mxu1  ;;  %v2388_v3 = vpack.c.bf16 %v2376_v44, %v2375_v60  ;;  %v2251_v16 = vmul.f32 0.5, %v2219_v49 }
 0x49e   : > { %v2265_v56 = vmul.f32 0.044715, %v2211_v53  ;;  %v2214_v46 = vadd.f32 %v5111_v37, %v2213_v57  ;;  %v2387_v14 = vpack.c.bf16 %v2374_v5, %v2373_v43  ;;  %v2249_v21 = vmul.f32 0.5, %v2211_v53 }
 0x49f   : > { %v2283_v55 = vmul.f32 %v2267_v30, %v2219_v49  ;;  %v2268_v27 = vmul.f32 0.044715, %v2222_v39  ;;  %v2252_v29 = vmul.f32 0.5, %v2222_v39 }
 0x4a0   : > { %v2281_v54 = vmul.f32 %v2265_v56, %v2211_v53  ;;  %v2266_v40 = vmul.f32 0.044715, %v2214_v46  ;;  %3410 = vmatprep.mubr.msk.bf16.mxu0 %vm626_vm0, %v2387_v14  ;;  %v2250_v60 = vmul.f32 0.5, %v2214_v46 }
 0x4a1   : > { %v2299_v0 = vmul.f32 %v2283_v55, %v2219_v49  ;;  %v2284_v38 = vmul.f32 %v2268_v27, %v2222_v39  ;;  %3411 = vmatmul.mubr.msk.bf16.gmra.mrb[68].mxu0 %vm626_vm0, %v2388_v3 }
 0x4a2   : > { %v2297_v36 = vmul.f32 %v2281_v54, %v2211_v53  ;;  %v2282_v33 = vmul.f32 %v2266_v40, %v2214_v46 }
 0x4a3   : > { %v2315_v8 = vadd.f32 %v2299_v0, %v2219_v49  ;;  %v2300_v45 = vmul.f32 %v2284_v38, %v2222_v39 }
 0x4a4   : > { %v2313_v42 = vadd.f32 %v2297_v36, %v2211_v53  ;;  %v2298_v47 = vmul.f32 %v2282_v33, %v2214_v46 }
 0x4a5   : > { %v2331_v61 = vmul.f32 0.7978846, %v2315_v8  ;;  %v2316_v24 = vadd.f32 %v2300_v45, %v2222_v39 }
 0x4a6   : > { %v2329_v26 = vmul.f32 0.7978846, %v2313_v42  ;;  %v2314_v18 = vadd.f32 %v2298_v47, %v2214_v46 }
 0x4a7   : > { %3815 = vtanh.f32 %v2331_v61  ;;  %v2332_v9 = vmul.f32 0.7978846, %v2316_v24 }
 0x4a8   : > { %3817 = vtanh.f32 %v2329_v26  ;;  %v2330_v10 = vmul.f32 0.7978846, %v2314_v18 }
 0x4a9   : > { %3819 = vtanh.f32 %v2332_v9 }
 0x4aa   : > { %3821 = vtanh.f32 %v2330_v10  ;;  %v3396_v41 = vpop.f32.mrb[44].mxu1 }
 0x4ab   : > { %v2235_v12 = vadd.f32 %v3396_v41, %v5111_v37  ;;  %v2226_v15 = vpop.f32.mrb[45].mxu1  ;;  %v3637_v41 = vld [vmem:[#allocation10] sm:$0xff]  }
 0x4ac   : > { %v2227_v34 = vadd.f32 %v5111_v37, %v2226_v15  ;;  %v3397_v52 = vpop.f32.mrb[46].mxu1  ;;  %3422 = vmatprep.subr.bf16.mxu0 %v3637_v41  ;;  %v3638_v15 = vld [vmem:[#allocation10 + $0x8] sm:$0xff]   ;;  %3442 = vmatprep.subr.bf16.mxu1 %v3637_v41 }
 0x4ad   : > { %v2271_v7 = vmul.f32 0.044715, %v2235_v12  ;;  %v2238_v11 = vadd.f32 %v3397_v52, %v5111_v37  ;;  %v2229_v28 = vpop.f32.mrb[47].mxu1  ;;  %v2255_v36 = vmul.f32 0.5, %v2235_v12  ;;  %3423 = vmatpush3.bf16.msra.mxu0 %v3637_v41  ;;  %3444 = vmatpush3.bf16.msra.mxu1 %v3637_v41 }
 0x4ae   : > { %v2269_v50 = vmul.f32 0.044715, %v2227_v34  ;;  %v2230_v35 = vadd.f32 %v5111_v37, %v2229_v28  ;;  %v2253_v45 = vmul.f32 0.5, %v2227_v34  ;;  %3424 = vmatprep.subr.bf16.mxu0 %v3638_v15  ;;  %3443 = vmatprep.subr.bf16.mxu1 %v3638_v15 }
 0x4af   : > { %v2287_v62 = vmul.f32 %v2271_v7, %v2235_v12  ;;  %v2272_v4 = vmul.f32 0.044715, %v2238_v11  ;;  %v2256_v33 = vmul.f32 0.5, %v2238_v11 }
 0x4b0   : > { %v2285_v1 = vmul.f32 %v2269_v50, %v2227_v34  ;;  %v2270_v19 = vmul.f32 0.044715, %v2230_v35  ;;  %v2254_v42 = vmul.f32 0.5, %v2230_v35 }
 0x4b1   : > { %v3816_v32 = vpop.eup %3815  ;;  %v2303_v13 = vmul.f32 %v2287_v62, %v2235_v12  ;;  %v2288_v23 = vmul.f32 %v2272_v4, %v2238_v11  ;;  %3425 = vmatpush3.bf16.msra.mxu0 %v3638_v15  ;;  %3445 = vmatpush3.bf16.msra.mxu1 %v3638_v15 }
 0x4b2   : > { %v3818_v31 = vpop.eup %3817  ;;  %v2363_v25 = vadd.f32 1.0, %v3816_v32  ;;  %v2301_v59 = vmul.f32 %v2285_v1, %v2227_v34  ;;  %v2286_v48 = vmul.f32 %v2270_v19, %v2230_v35 }
 0x4b3   : > { %v3820_v58 = vpop.eup %3819  ;;  %v2361_v22 = vadd.f32 1.0, %v3818_v31  ;;  %v2319_v63 = vadd.f32 %v2303_v13, %v2235_v12  ;;  %v2304_v20 = vmul.f32 %v2288_v23, %v2238_v11  ;;  %v5140_v12 = vld [vmem:[%s5244_s10] ss:$0 sm:$0xff] }
 0x4b4   : > { %v3822_v51 = vpop.eup %3821  ;;  %v2364_v37 = vadd.f32 1.0, %v3820_v58  ;;  %v2317_v2 = vadd.f32 %v2301_v59, %v2227_v34  ;;  %v2302_v6 = vmul.f32 %v2286_v48, %v2230_v35  ;;  %v2379_v5 = vmul.f32 %v2363_v25, %v2251_v16 }
 0x4b5   : > { %v2362_v44 = vadd.f32 1.0, %v3822_v51  ;;  %v2335_v17 = vmul.f32 0.7978846, %v2319_v63  ;;  %v2320_v43 = vadd.f32 %v2304_v20, %v2238_v11  ;;  %v2377_v3 = vmul.f32 %v2361_v22, %v2249_v21 }
 0x4b6   : > { %v2380_v30 = vmul.f32 %v2364_v37, %v2252_v29  ;;  %v2333_v49 = vmul.f32 0.7978846, %v2317_v2  ;;  %v2318_v57 = vadd.f32 %v2302_v6, %v2230_v35 }
 0x4b7   : > { %v2378_v56 = vmul.f32 %v2362_v44, %v2250_v60  ;;  %3823 = vtanh.f32 %v2335_v17  ;;  %v2336_v53 = vmul.f32 0.7978846, %v2320_v43 }
 0x4b8   : > { %v2390_v14 = vpack.c.bf16 %v2380_v30, %v2379_v5  ;;  %3825 = vtanh.f32 %v2333_v49  ;;  %v2334_v55 = vmul.f32 0.7978846, %v2318_v57 }
 0x4b9   : > { %v2389_v27 = vpack.c.bf16 %v2378_v56, %v2377_v3  ;;  %3827 = vtanh.f32 %v2336_v53 }
 0x4ba   : > { %3829 = vtanh.f32 %v2334_v55 }
 0x4bb   : > { %3414 = vmatprep.mubr.msk.bf16.mxu0 %vm626_vm0, %v2389_v27 }
 0x4bc   : > { %3415 = vmatmul.mubr.msk.bf16.gmra.mrb[72].mxu0 %vm626_vm0, %v2390_v14 }
 0x4c1   : > { %v3824_v39 = vpop.eup %3823 }
 0x4c2   : > { %v3826_v46 = vpop.eup %3825  ;;  %v2367_v54 = vadd.f32 1.0, %v3824_v39 }
 0x4c3   : > { %v3828_v40 = vpop.eup %3827  ;;  %v2365_v0 = vadd.f32 1.0, %v3826_v46 }
 0x4c4   : > { %v3830_v38 = vpop.eup %3829  ;;  %v2368_v8 = vadd.f32 1.0, %v3828_v40  ;;  %v2383_v61 = vmul.f32 %v2367_v54, %v2255_v36 }
 0x4c5   : > { %v2366_v47 = vadd.f32 1.0, %v3830_v38  ;;  %v2381_v26 = vmul.f32 %v2365_v0, %v2253_v45 }
 0x4c6   : > { %v2384_v24 = vmul.f32 %v2368_v8, %v2256_v33 }
 0x4c7   : > { %v2382_v18 = vmul.f32 %v2366_v47, %v2254_v42 }
 0x4c8   : > { %v2392_v9 = vpack.c.bf16 %v2384_v24, %v2383_v61 }
 0x4c9   : > { %v2391_v10 = vpack.c.bf16 %v2382_v18, %v2381_v26 }
 0x4cb   : > { %3418 = vmatprep.mubr.msk.bf16.mxu0 %vm626_vm0, %v2391_v10 }
 0x4cc   : > { %3419 = vmatmul.mubr.msk.bf16.gmra.mrb[76].mxu0 %vm626_vm0, %v2392_v9 }
 0x559   : > { %v3408_v34 = vpop.f32.mrb[64].mxu0 }
 0x55a   : > { %v2499_v52 = vadd.f32 %v3408_v34, %v5140_v12  ;;  %v2490_v7 = vpop.f32.mrb[65].mxu0 }
 0x55b   : > { %v2491_v11 = vadd.f32 %v5140_v12, %v2490_v7  ;;  %v3409_v28 = vpop.f32.mrb[66].mxu0 }
 0x55c   : > { %v2571_v50 = vmul.f32 0.044715, %v2499_v52  ;;  %v2502_v35 = vadd.f32 %v3409_v28, %v5140_v12  ;;  %v2493_v62 = vpop.f32.mrb[67].mxu0  ;;  %v2555_v30 = vmul.f32 0.5, %v2499_v52 }
 0x55d   : > { %v2569_v4 = vmul.f32 0.044715, %v2491_v11  ;;  %v2494_v32 = vadd.f32 %v5140_v12, %v2493_v62  ;;  %v2553_v3 = vmul.f32 0.5, %v2491_v11 }
 0x55e   : > { %v2587_v1 = vmul.f32 %v2571_v50, %v2499_v52  ;;  %v2572_v19 = vmul.f32 0.044715, %v2502_v35  ;;  %v2556_v49 = vmul.f32 0.5, %v2502_v35 }
 0x55f   : > { %v2585_v31 = vmul.f32 %v2569_v4, %v2491_v11  ;;  %v2570_v13 = vmul.f32 0.044715, %v2494_v32  ;;  %v2554_v56 = vmul.f32 0.5, %v2494_v32 }
 0x560   : > { %v2603_v23 = vmul.f32 %v2587_v1, %v2499_v52  ;;  %v2588_v16 = vmul.f32 %v2572_v19, %v2502_v35 }
 0x561   : > { %v2601_v25 = vmul.f32 %v2585_v31, %v2491_v11  ;;  %v2586_v58 = vmul.f32 %v2570_v13, %v2494_v32 }
 0x562   : > { %v2619_v59 = vadd.f32 %v2603_v23, %v2499_v52  ;;  %v2604_v48 = vmul.f32 %v2588_v16, %v2502_v35 }
 0x563   : > { %v2617_v21 = vadd.f32 %v2601_v25, %v2491_v11  ;;  %v2602_v22 = vmul.f32 %v2586_v58, %v2494_v32 }
 0x564   : > { %v2635_v51 = vmul.f32 0.7978846, %v2619_v59  ;;  %v2620_v63 = vadd.f32 %v2604_v48, %v2502_v35 }
 0x565   : > { %v2633_v20 = vmul.f32 0.7978846, %v2617_v21  ;;  %v2618_v29 = vadd.f32 %v2602_v22, %v2494_v32 }
 0x566   : > { %3831 = vtanh.f32 %v2635_v51  ;;  %v2636_v37 = vmul.f32 0.7978846, %v2620_v63 }
 0x567   : > { %3833 = vtanh.f32 %v2633_v20  ;;  %v2634_v2 = vmul.f32 0.7978846, %v2618_v29 }
 0x568   : > { %3835 = vtanh.f32 %v2636_v37 }
 0x569   : > { %3837 = vtanh.f32 %v2634_v2 }
 0x570   : > { %v3832_v6 = vpop.eup %3831 }
 0x571   : > { %v3834_v60 = vpop.eup %3833  ;;  %v2667_v44 = vadd.f32 1.0, %v3832_v6 }
 0x572   : > { %v3836_v17 = vpop.eup %3835  ;;  %v2665_v43 = vadd.f32 1.0, %v3834_v60 }
 0x573   : > { %v3838_v5 = vpop.eup %3837  ;;  %v2668_v57 = vadd.f32 1.0, %v3836_v17  ;;  %v2683_v14 = vmul.f32 %v2667_v44, %v2555_v30 }
 0x574   : > { %v2666_v53 = vadd.f32 1.0, %v3838_v5  ;;  %v3412_v27 = vpop.f32.mrb[68].mxu0  ;;  %v2681_v39 = vmul.f32 %v2665_v43, %v2553_v3 }
 0x575   : > { %v2684_v55 = vmul.f32 %v2668_v57, %v2556_v49  ;;  %v2515_v40 = vadd.f32 %v3412_v27, %v5140_v12  ;;  %v2506_v0 = vpop.f32.mrb[69].mxu0 }
 0x576   : > { %v2682_v46 = vmul.f32 %v2666_v53, %v2554_v56  ;;  %v2507_v38 = vadd.f32 %v5140_v12, %v2506_v0  ;;  %v3413_v36 = vpop.f32.mrb[70].mxu0 }
 0x577   : > { %v2698_v54 = vpack.c.bf16 %v2684_v55, %v2683_v14  ;;  %v2575_v8 = vmul.f32 0.044715, %v2515_v40  ;;  %v2518_v45 = vadd.f32 %v3413_v36, %v5140_v12  ;;  %v2509_v42 = vpop.f32.mrb[71].mxu0  ;;  %v2559_v58 = vmul.f32 0.5, %v2515_v40 }
 0x578   : > { %v2697_v33 = vpack.c.bf16 %v2682_v46, %v2681_v39  ;;  %v2573_v47 = vmul.f32 0.044715, %v2507_v38  ;;  %v2510_v61 = vadd.f32 %v5140_v12, %v2509_v42  ;;  %v2557_v22 = vmul.f32 0.5, %v2507_v38 }
 0x579   : > { %v2591_v24 = vmul.f32 %v2575_v8, %v2515_v40  ;;  %v2576_v26 = vmul.f32 0.044715, %v2518_v45  ;;  %v2560_v59 = vmul.f32 0.5, %v2518_v45 }
 0x57a   : > { %3426 = vmatprep.mubr.msk.bf16.mxu0 %vm2728_vm1, %v2697_v33  ;;  %v2589_v18 = vmul.f32 %v2573_v47, %v2507_v38  ;;  %v2574_v9 = vmul.f32 0.044715, %v2510_v61  ;;  %v2558_v51 = vmul.f32 0.5, %v2510_v61 }
 0x57b   : > { %3427 = vmatmul.mubr.msk.bf16.vlgmr.msra.gmra.mrb[80].mxu0 %vm2728_vm1, %v2698_v54  ;;  %v2607_v10 = vmul.f32 %v2591_v24, %v2515_v40  ;;  %v2592_v41 = vmul.f32 %v2576_v26, %v2518_v45 }
 0x57c   : > { %v2605_v15 = vmul.f32 %v2589_v18, %v2507_v38  ;;  %v2590_v34 = vmul.f32 %v2574_v9, %v2510_v61 }
 0x57d   : > { %v2623_v52 = vadd.f32 %v2607_v10, %v2515_v40  ;;  %v2608_v7 = vmul.f32 %v2592_v41, %v2518_v45 }
 0x57e   : > { %v2621_v11 = vadd.f32 %v2605_v15, %v2507_v38  ;;  %v2606_v28 = vmul.f32 %v2590_v34, %v2510_v61 }
 0x57f   : > { %v2639_v50 = vmul.f32 0.7978846, %v2623_v52  ;;  %v2624_v35 = vadd.f32 %v2608_v7, %v2518_v45 }
 0x580   : > { %v2637_v62 = vmul.f32 0.7978846, %v2621_v11  ;;  %v2622_v4 = vadd.f32 %v2606_v28, %v2510_v61 }
 0x581   : > { %3839 = vtanh.f32 %v2639_v50  ;;  %v2640_v32 = vmul.f32 0.7978846, %v2624_v35 }
 0x582   : > { %3841 = vtanh.f32 %v2637_v62  ;;  %v2638_v1 = vmul.f32 0.7978846, %v2622_v4 }
 0x583   : > { %3843 = vtanh.f32 %v2640_v32 }
 0x584   : > { %3845 = vtanh.f32 %v2638_v1 }
 0x58b   : > { %v3840_v19 = vpop.eup %3839 }
 0x58c   : > { %v3842_v31 = vpop.eup %3841  ;;  %v2671_v13 = vadd.f32 1.0, %v3840_v19 }
 0x58d   : > { %v3844_v23 = vpop.eup %3843  ;;  %v2669_v16 = vadd.f32 1.0, %v3842_v31 }
 0x58e   : > { %v3846_v25 = vpop.eup %3845  ;;  %v2672_v48 = vadd.f32 1.0, %v3844_v23  ;;  %v2687_v20 = vmul.f32 %v2671_v13, %v2559_v58 }
 0x58f   : > { %v3416_v21 = vpop.f32.mrb[72].mxu0  ;;  %v2670_v63 = vadd.f32 1.0, %v3846_v25  ;;  %v2685_v44 = vmul.f32 %v2669_v16, %v2557_v22 }
 0x590   : > { %v2688_v29 = vmul.f32 %v2672_v48, %v2560_v59  ;;  %v2531_v37 = vadd.f32 %v3416_v21, %v5140_v12  ;;  %v2522_v2 = vpop.f32.mrb[73].mxu0 }
 0x591   : > { %v2523_v6 = vadd.f32 %v5140_v12, %v2522_v2  ;;  %v3417_v60 = vpop.f32.mrb[74].mxu0  ;;  %v2686_v17 = vmul.f32 %v2670_v63, %v2558_v51 }
 0x592   : > { %v2700_v43 = vpack.c.bf16 %v2688_v29, %v2687_v20  ;;  %v2579_v5 = vmul.f32 0.044715, %v2531_v37  ;;  %v2534_v30 = vadd.f32 %v3417_v60, %v5140_v12  ;;  %v2525_v49 = vpop.f32.mrb[75].mxu0  ;;  %v2563_v31 = vmul.f32 0.5, %v2531_v37 }
 0x593   : > { %v2577_v57 = vmul.f32 0.044715, %v2523_v6  ;;  %v2526_v3 = vadd.f32 %v5140_v12, %v2525_v49  ;;  %v2699_v56 = vpack.c.bf16 %v2686_v17, %v2685_v44  ;;  %v2561_v58 = vmul.f32 0.5, %v2523_v6 }
 0x594   : > { %v2595_v53 = vmul.f32 %v2579_v5, %v2531_v37  ;;  %v2580_v14 = vmul.f32 0.044715, %v2534_v30  ;;  %v2564_v51 = vmul.f32 0.5, %v2534_v30 }
 0x595   : > { %v2593_v55 = vmul.f32 %v2577_v57, %v2523_v6  ;;  %v2578_v27 = vmul.f32 0.044715, %v2526_v3  ;;  %3430 = vmatprep.mubr.msk.bf16.mxu1 %vm2728_vm1, %v2699_v56  ;;  %v2562_v29 = vmul.f32 0.5, %v2526_v3 }
 0x596   : > { %v2611_v39 = vmul.f32 %v2595_v53, %v2531_v37  ;;  %v2596_v46 = vmul.f32 %v2580_v14, %v2534_v30  ;;  %3431 = vmatmul.mubr.msk.bf16.vlgmr.msra.gmra.mrb[48].mxu1 %vm2728_vm1, %v2700_v43 }
 0x597   : > { %v2609_v54 = vmul.f32 %v2593_v55, %v2523_v6  ;;  %v2594_v40 = vmul.f32 %v2578_v27, %v2526_v3 }
 0x598   : > { %v2627_v0 = vadd.f32 %v2611_v39, %v2531_v37  ;;  %v2612_v38 = vmul.f32 %v2596_v46, %v2534_v30 }
 0x599   : > { %v2625_v36 = vadd.f32 %v2609_v54, %v2523_v6  ;;  %v2610_v33 = vmul.f32 %v2594_v40, %v2526_v3 }
 0x59a   : > { %v2643_v8 = vmul.f32 0.7978846, %v2627_v0  ;;  %v2628_v45 = vadd.f32 %v2612_v38, %v2534_v30 }
 0x59b   : > { %v2641_v42 = vmul.f32 0.7978846, %v2625_v36  ;;  %v2626_v47 = vadd.f32 %v2610_v33, %v2526_v3 }
 0x59c   : > { %3847 = vtanh.f32 %v2643_v8  ;;  %v2644_v61 = vmul.f32 0.7978846, %v2628_v45 }
 0x59d   : > { %3849 = vtanh.f32 %v2641_v42  ;;  %v2642_v24 = vmul.f32 0.7978846, %v2626_v47 }
 0x59e   : > { %3851 = vtanh.f32 %v2644_v61 }
 0x59f   : > { %3853 = vtanh.f32 %v2642_v24  ;;  %v3420_v26 = vpop.f32.mrb[76].mxu0 }
 0x5a0   : > { %v2547_v18 = vadd.f32 %v3420_v26, %v5140_v12  ;;  %v2538_v9 = vpop.f32.mrb[77].mxu0 }
 0x5a1   : > { %v2539_v10 = vadd.f32 %v5140_v12, %v2538_v9  ;;  %v3421_v41 = vpop.f32.mrb[78].mxu0 }
 0x5a2   : > { %v2583_v15 = vmul.f32 0.044715, %v2547_v18  ;;  %v2550_v34 = vadd.f32 %v3421_v41, %v5140_v12  ;;  %v2541_v52 = vpop.f32.mrb[79].mxu0  ;;  %v2567_v54 = vmul.f32 0.5, %v2547_v18 }
 0x5a3   : > { %v2581_v7 = vmul.f32 0.044715, %v2539_v10  ;;  %v2542_v11 = vadd.f32 %v5140_v12, %v2541_v52  ;;  %v2565_v38 = vmul.f32 0.5, %v2539_v10 }
 0x5a4   : > { %v2599_v28 = vmul.f32 %v2583_v15, %v2547_v18  ;;  %v2584_v50 = vmul.f32 0.044715, %v2550_v34  ;;  %v2568_v40 = vmul.f32 0.5, %v2550_v34 }
 0x5a5   : > { %v2597_v62 = vmul.f32 %v2581_v7, %v2539_v10  ;;  %v2582_v4 = vmul.f32 0.044715, %v2542_v11  ;;  %v2566_v36 = vmul.f32 0.5, %v2542_v11 }
 0x5a6   : > { %v3848_v35 = vpop.eup %3847  ;;  %v2615_v1 = vmul.f32 %v2599_v28, %v2547_v18  ;;  %v2600_v19 = vmul.f32 %v2584_v50, %v2550_v34 }
 0x5a7   : > { %v3850_v32 = vpop.eup %3849  ;;  %v2675_v13 = vadd.f32 1.0, %v3848_v35  ;;  %v2613_v16 = vmul.f32 %v2597_v62, %v2539_v10  ;;  %v2598_v25 = vmul.f32 %v2582_v4, %v2542_v11 }
 0x5a8   : > { %v3852_v23 = vpop.eup %3851  ;;  %v2673_v59 = vadd.f32 1.0, %v3850_v32  ;;  %v2631_v21 = vadd.f32 %v2615_v1, %v2547_v18  ;;  %v2616_v22 = vmul.f32 %v2600_v19, %v2550_v34  ;;  %v3168_v18 = vld [vmem:[%s5283_s28] ss:$0 sm:$0xff] }
 0x5a9   : > { %v3854_v48 = vpop.eup %3853  ;;  %v2676_v12 = vadd.f32 1.0, %v3852_v23  ;;  %v2629_v63 = vadd.f32 %v2613_v16, %v2539_v10  ;;  %v2614_v20 = vmul.f32 %v2598_v25, %v2542_v11  ;;  %v2691_v17 = vmul.f32 %v2675_v13, %v2563_v31 }
 0x5aa   : > { %v2674_v2 = vadd.f32 1.0, %v3854_v48  ;;  %v2647_v60 = vmul.f32 0.7978846, %v2631_v21  ;;  %v2632_v44 = vadd.f32 %v2616_v22, %v2550_v34  ;;  %v2689_v49 = vmul.f32 %v2673_v59, %v2561_v58 }
 0x5ab   : > { %v2692_v43 = vmul.f32 %v2676_v12, %v2564_v51  ;;  %v2645_v37 = vmul.f32 0.7978846, %v2629_v63  ;;  %v2630_v5 = vadd.f32 %v2614_v20, %v2542_v11 }
 0x5ac   : > { %v2690_v57 = vmul.f32 %v2674_v2, %v2562_v29  ;;  %3855 = vtanh.f32 %v2647_v60  ;;  %v2648_v6 = vmul.f32 0.7978846, %v2632_v44 }
 0x5ad   : > { %v2702_v56 = vpack.c.bf16 %v2692_v43, %v2691_v17  ;;  %3857 = vtanh.f32 %v2645_v37  ;;  %v2646_v53 = vmul.f32 0.7978846, %v2630_v5 }
 0x5ae   : > { %v2701_v14 = vpack.c.bf16 %v2690_v57, %v2689_v49  ;;  %3859 = vtanh.f32 %v2648_v6 }
 0x5af   : > { %3861 = vtanh.f32 %v2646_v53 }
 0x5b0   : > { %3434 = vmatprep.mubr.msk.bf16.mxu1 %vm2728_vm1, %v2701_v14 }
 0x5b1   : > { %3435 = vmatmul.mubr.msk.bf16.gmra.mrb[52].mxu1 %vm2728_vm1, %v2702_v56 }
 0x5b6   : > { %v3856_v30 = vpop.eup %3855 }
 0x5b7   : > { %v3858_v3 = vpop.eup %3857  ;;  %v2679_v55 = vadd.f32 1.0, %v3856_v30 }
 0x5b8   : > { %v3860_v27 = vpop.eup %3859  ;;  %v2677_v39 = vadd.f32 1.0, %v3858_v3 }
 0x5b9   : > { %v3862_v46 = vpop.eup %3861  ;;  %v2680_v0 = vadd.f32 1.0, %v3860_v27  ;;  %v2695_v8 = vmul.f32 %v2679_v55, %v2567_v54 }
 0x5ba   : > { %v2678_v33 = vadd.f32 1.0, %v3862_v46  ;;  %v2693_v42 = vmul.f32 %v2677_v39, %v2565_v38 }
 0x5bb   : > { %v2696_v45 = vmul.f32 %v2680_v0, %v2568_v40 }
 0x5bc   : > { %v2694_v47 = vmul.f32 %v2678_v33, %v2566_v36 }
 0x5bd   : > { %v2704_v61 = vpack.c.bf16 %v2696_v45, %v2695_v8 }
 0x5be   : > { %v2703_v24 = vpack.c.bf16 %v2694_v47, %v2693_v42 }
 0x5c0   : > { %3438 = vmatprep.mubr.msk.bf16.mxu1 %vm2728_vm1, %v2703_v24 }
 0x5c1   : > { %3439 = vmatmul.mubr.msk.bf16.gmra.mrb[56].mxu1 %vm2728_vm1, %v2704_v61 }
 0x64e   : > { %v3428_v26 = vpop.f32.mrb[80].mxu0 }
 0x64f   : > { %v2787_v9 = vpop.f32.mrb[81].mxu0  ;;  %v2796_v41 = vadd.f32 %v3428_v26, %v3168_v18 }
 0x650   : > { %v3429_v10 = vpop.f32.mrb[82].mxu0  ;;  %v2788_v52 = vadd.f32 %v3168_v18, %v2787_v9 }
 0x651   : > { %v2799_v15 = vadd.f32 %v3429_v10, %v3168_v18  ;;  %v2790_v34 = vpop.f32.mrb[83].mxu0 }
 0x652   : > { %v2791_v7 = vadd.f32 %v3168_v18, %v2790_v34 }
 0x653   : > { %v3225_v11 = vpack.c.bf16 %v2799_v15, %v2796_v41 }
 0x654   : > { %v3220_v28 = vpack.c.bf16 %v2791_v7, %v2788_v52 }
 0x655   : > { %3257 = vst [vmem:[%s5172_s20 + $0x8] sm:$0xff] %v3225_v11  }
 0x656   : > { %3221 = vst [vmem:[%s5172_s20] sm:$0xff] %v3220_v28  }
 0x669   : > { %v3432_v50 = vpop.f32.mrb[48].mxu1 }
 0x66a   : > { %v2803_v35 = vpop.f32.mrb[49].mxu1  ;;  %v2812_v4 = vadd.f32 %v3432_v50, %v3168_v18 }
 0x66b   : > { %v3433_v62 = vpop.f32.mrb[50].mxu1  ;;  %v2804_v19 = vadd.f32 %v3168_v18, %v2803_v35 }
 0x66c   : > { %v2815_v32 = vadd.f32 %v3433_v62, %v3168_v18  ;;  %v2806_v1 = vpop.f32.mrb[51].mxu1 }
 0x66d   : > { %v2807_v31 = vadd.f32 %v3168_v18, %v2806_v1 }
 0x66e   : > { %v3235_v13 = vpack.c.bf16 %v2815_v32, %v2812_v4 }
 0x66f   : > { %v3230_v23 = vpack.c.bf16 %v2807_v31, %v2804_v19 }
 0x670   : > { %3259 = vst [vmem:[%s5172_s20 + $0x18] sm:$0xff] %v3235_v13  }
 0x671   : > { %3258 = vst [vmem:[%s5172_s20 + $0x10] sm:$0xff] %v3230_v23  }
 0x684   : > { %v3436_v16 = vpop.f32.mrb[52].mxu1 }
 0x685   : > { %v2819_v25 = vpop.f32.mrb[53].mxu1  ;;  %v2828_v59 = vadd.f32 %v3436_v16, %v3168_v18 }
 0x686   : > { %v3437_v58 = vpop.f32.mrb[54].mxu1  ;;  %v2820_v22 = vadd.f32 %v3168_v18, %v2819_v25 }
 0x687   : > { %v2831_v48 = vadd.f32 %v3437_v58, %v3168_v18  ;;  %v2822_v21 = vpop.f32.mrb[55].mxu1 }
 0x688   : > { %v2823_v51 = vadd.f32 %v3168_v18, %v2822_v21 }
 0x689   : > { %v3245_v12 = vpack.c.bf16 %v2831_v48, %v2828_v59 }
 0x68a   : > { %v3240_v63 = vpack.c.bf16 %v2823_v51, %v2820_v22 }
 0x68b   : > { %3261 = vst [vmem:[%s5172_s20 + $0x28] sm:$0xff] %v3245_v12  }
 0x68c   : > { %3260 = vst [vmem:[%s5172_s20 + $0x20] sm:$0xff] %v3240_v63  }
 0x694   : > { %v3440_v20 = vpop.f32.mrb[56].mxu1 }
 0x695   : > { %v2835_v29 = vpop.f32.mrb[57].mxu1  ;;  %v2844_v60 = vadd.f32 %v3440_v20, %v3168_v18 }
 0x696   : > { %v3441_v2 = vpop.f32.mrb[58].mxu1  ;;  %v2836_v43 = vadd.f32 %v3168_v18, %v2835_v29 }
 0x697   : > { %v2847_v44 = vadd.f32 %v3441_v2, %v3168_v18  ;;  %v2838_v17 = vpop.f32.mrb[59].mxu1 }
 0x698   : > { %v2839_v37 = vadd.f32 %v3168_v18, %v2838_v17 }
 0x699   : > { %v3255_v5 = vpack.c.bf16 %v2847_v44, %v2844_v60 }
 0x69a   : > { %v3250_v49 = vpack.c.bf16 %v2839_v37, %v2836_v43 }
 0x69b   : > { %3263 = vst [vmem:[%s5172_s20 + $0x38] sm:$0xff] %v3255_v5  }
 0x69c   : > { %3262 = vst [vmem:[%s5172_s20 + $0x30] sm:$0xff] %v3250_v49  }
 0x69d   : > { %4016 = shalt.err (!%p4013_p0)
}
 0x69e   : > { %s4017_s30 = scalar_lea.hbm %s5187_s15, 1024  ;;  %s4021_s28 = scalar_lea.hbm %s5285_s24, 2048 }
 0x69f   : > { %p4018_p10 = scmp.ne.s32.totalorder %s5187_s15, %s4017_s30  ;;  %p4022_p4 = scmp.lt.u32.totalorder %s5187_s15, %s5285_s24 }
 0x6a0   : > { %p4023_p12 = scmp.lt.u32.totalorder %s4021_s28, %s4017_s30  ;;  %p4025_p8 = scmp.lt.u32.totalorder %s4017_s30, %s5187_s15 }
 0x6a1   : > { %p4019_p2 = pnand %p4018_p10, %p5286_p11 }
 0x6a2   : > { %p4024_p7 = por %p4023_p12, %p4022_p4 }
 0x6a3   : > { %p4020_p3 = pneg %p4019_p2 }
 0x6a4   : > { %p4026_p13 = por %p4025_p8, %p4024_p7 }
 0x6a6   : > { %p4027_p1 = pnand %p4026_p13, %p4020_p3 }
 0x6a8   : > { %4030 = shalt.err (!%p4027_p1)
}
 0x6a9   : > { %s4088_s21 = smov 64   ;;  %s4089_s19 = smov 4  }
 0x6aa   : > { %3466 = dma.vmem_to_hbm [thread:$0]  (%p5286_p11), %s5182_s23, 1024, %s5187_s15, %s5193_s27, %s4088_s21, %s4088_s21, %s4089_s19  }
 0x6ab PF: > { %s5287_s14 = sld [smem:[#allocation18_spill]]  ;;  %s5288_s29 = sld [smem:[#allocation16_spill]] }
 0x6ac   : > { %s5289_s22 = sld [smem:[#allocation22_spill]] }
 0x6b1   : > { %p3498_p6 = scmp.ge.s32.totalorder %s5287_s14, 2  ;;  %s2959_s13 = sand.u32 1, %s5288_s29  }
 0x6b2   : > { %p5290_p9 = scmp.ne.s32.totalorder %s5289_s22, 0  ;;  %s2960_s18 = scalar_lea.sflag [#allocation4], %s2959_s13 }
 0x6b4   : > { %p3485_p5 = pnand %p3498_p6, %p5290_p9 }
 0x6b6   : > { %4060 = dma.done.wait (!%p3485_p5), %s2960_s18, 1024  }
 0x6b7   : > { %4062 = vsyncadd (!%p3485_p5), %s2960_s18, 4294966272  ;;  %s5291_s28 = sld [smem:[#allocation19_spill]]  ;;  %s5292_s30 = sld [smem:[#allocation17_spill]] }
 0x6b8   : > { %s5293_s27 = sld [smem:[#allocation20_spill]]  ;;  %s5294_s25 = smov %s4069_s26 }
 0x6bd   : > { %p26_p0 = scmp.ge.s32.totalorder %s5291_s28, 4   ;;  %s5295_s26 = smov %s5292_s30 }
 0x6bf   :  { %28 = sbr.rel (!%p26_p0) target bundleno = 9 (0x9), region = 128 }
 0x6c6   :  { %2965 = vsyncpa [#allocation3], 1 }
 0x6c7   :  { %2967 = vsyncpa [#allocation3 + $0x1], 1 }
 0x6c8   :  { %2968 = vsyncpa [#allocation6], 1 }
 0x6c9   :  { %2969 = vsyncpa [#allocation9], 1 }
 0x6ca   :  { %2970 = vsyncpa [#allocation4], 1 }
 0x6cb   :  { %2972 = vsyncpa [#allocation4 + $0x1], 1 }

</bundles_post_ra>
